<compile_context>
chip_gen: v7x
topology: tpu7x:2x2x1
jax: 0.10.0
libtpu: 0.0.40
codegen_flags: <defaults>
</compile_context>

<pallas_src>
import functools

import jax
import jax.numpy as jnp
from jax.experimental import pallas as pl
from jax.experimental.pallas import tpu as pltpu

# Keep the pure-JAX reference and the in-kernel MXU matmuls numerically
# comparable (f32 accumulation on both sides).
jax.config.update("jax_default_matmul_precision", "highest")

EPS = 1e-5
KH = KW = 3
# (Cin, Cout, stride) for conv1..conv4 -- matches the PyTorch module.
CONV_CFG = ((1, 8, 2), (8, 8, 2), (8, 8, 1), (8, 16, 1))


def _pyramid(h0, w0):
    """Per-layer spatial sizes (valid 3x3 convs with the configured strides)."""
    hs, ws = [h0], [w0]
    h, w = h0, w0
    for _, _, s in CONV_CFG:
        h = (h - KH) // s + 1
        w = (w - KW) // s + 1
        hs.append(h)
        ws.append(w)
    return hs, ws


# ---------------------------------------------------------------------------
# One-time parameter folding (run once, outside the per-step forward)
# ---------------------------------------------------------------------------
def _build_sel(wi, wo, stride, batch, dtype=jnp.float32):
    """S[j, wo*B+b, wi*B+b'] = 1  iff  wi == stride*wo + j  and  b == b'."""
    rows = jnp.arange(wo * batch)
    cols = jnp.arange(wi * batch)
    r_w, r_b = rows // batch, rows % batch
    c_w, c_b = cols // batch, cols % batch
    j = jnp.arange(KW)
    hit = c_w[None, None, :] == stride * r_w[None, :, None] + j[:, None, None]
    same_b = (c_b[None, :] == r_b[:, None])[None]
    return (hit & same_b).astype(dtype)


def _build_mix(w_oihw, scale, stride, hi, ho):
    """M[j, h*Cin+ci, ho*Cout+co] = scale[co] * W[co, ci, h - stride*ho, j] (windowed)."""
    cout, cin = w_oihw.shape[:2]
    diff = jnp.arange(hi)[:, None] - stride * jnp.arange(ho)[None, :]    # (hi, ho)
    valid = (diff >= 0) & (diff < KH)
    di = jnp.clip(diff, 0, KH - 1)
    w_s = w_oihw * scale[:, None, None, None]                            # (co, ci, kh, kw)
    g = w_s[:, :, di, :]                                                 # (co, ci, hi, ho, kw)
    g = jnp.where(valid[None, None, :, :, None], g, 0.0)
    return jnp.transpose(g, (4, 2, 1, 3, 0)).reshape(KW, hi * cin, ho * cout)


def fold_params(params, batch, h0=30, w0=45):
    """Fold BN into the conv weights and expand every layer into its
    (row-selection, lane-mixing) matmul factors + packed bias tile."""
    p = params
    hs, ws = _pyramid(h0, w0)
    actions = p["aW2"].shape[1]
    hid = p["sW1"].shape[1]                       # 64
    h4, w4, c4 = hs[4], ws[4], CONV_CFG[3][1]
    feat = h4 * w4 * c4                           # 192 == PyTorch view(-1, 192)
    assert feat == p["sW1"].shape[0] + p["aW1"].shape[0]

    folded = {}
    bias_rows = []
    for l, (cin, cout, stride) in enumerate(CONV_CFG, start=1):
        scale = p[f"g{l}"] / jnp.sqrt(p[f"v{l}"] + EPS)
        bias_c = p[f"b{l}"] - p[f"m{l}"] * scale
        folded[f"m{l}"] = _build_mix(p[f"w{l}"], scale, stride, hs[l - 1], hs[l])
        bias_rows.append(jnp.tile(bias_c, hs[l]))             # lane index = ho*Cout + co
        if stride != 1:
            folded[f"s{l}"] = _build_sel(ws[l - 1], ws[l], stride, batch)

    # Dueling head: block-diagonal (state | advantage) weights with the
    # PyTorch view(-1, 192) flatten order folded into a row permutation.
    w1bd = jnp.zeros((feat, 2 * hid), jnp.float32)
    w1bd = w1bd.at[: feat // 2, :hid].set(p["sW1"])
    w1bd = w1bd.at[feat // 2:, hid:].set(p["aW1"])
    wi = jnp.arange(w4)[:, None, None]
    hi = jnp.arange(h4)[None, :, None]
    ci = jnp.arange(c4)[None, None, :]
    old_row = (ci * (h4 * w4) + hi * w4 + wi).reshape(-1)     # new order (w, h, c)
    folded["w1h"] = w1bd[old_row].reshape(w4, h4 * c4, 2 * hid)

    w2bd = jnp.zeros((2 * hid, 1 + actions), jnp.float32)
    w2bd = w2bd.at[:hid, 0:1].set(p["sW2"])
    w2bd = w2bd.at[hid:, 1:].set(p["aW2"])
    folded["w2h"] = w2bd

    bias_rows += [jnp.concatenate([p["sb1"], p["ab1"]]),
                  jnp.concatenate([p["sb2"], p["ab2"]])]
    lanes = max(128, max(int(r.shape[0]) for r in bias_rows))
    bias = jnp.zeros((len(bias_rows), lanes), jnp.float32)
    for i, r in enumerate(bias_rows):
        bias = bias.at[i, : r.shape[0]].set(r)
    folded["bias"] = bias
    return folded


# ---------------------------------------------------------------------------
# Fused forward: one pallas_call for the whole network
# ---------------------------------------------------------------------------
def duel_qnet_forward(x_nchw, folded):
    n, _, h0, w0 = x_nchw.shape
    hs, ws = _pyramid(h0, w0)
    actions = folded["w2h"].shape[1] - 1
    lane_w = [hs[l] * CONV_CFG[l - 1][1] for l in range(1, 5)]   # Ho*Cout per layer

    def kernel(x0_ref, s1_ref, s2_ref, m1_ref, m2_ref, m3_ref, m4_ref,
               bias_ref, w1h_ref, w2h_ref, o_ref):
        dot = functools.partial(jnp.dot, preferred_element_type=jnp.float32)

        def conv_s2(a_in, s_ref, m_ref, brow, width):
            # stride-2 conv: width-stride via 0/1 selection matmul (rows);
            # height window + channel mix + BN scale live in m_ref (lanes).
            acc = dot(dot(s_ref[0], a_in), m_ref[0])
            for j in range(1, KW):
                acc = acc + dot(dot(s_ref[j], a_in), m_ref[j])
            return jnp.maximum(acc + bias_ref[brow:brow + 1, :width], 0.0)

        def conv_s1(a_in, m_ref, brow, width, w_out):
            # stride-1 conv: the width window is a free static row slice.
            rows = w_out * n
            acc = dot(a_in[0:rows, :], m_ref[0])
            for j in range(1, KW):
                acc = acc + dot(a_in[j * n:j * n + rows, :], m_ref[j])
            return jnp.maximum(acc + bias_ref[brow:brow + 1, :width], 0.0)

        a1 = conv_s2(x0_ref[...], s1_ref, m1_ref, 0, lane_w[0])   # (W1*n, H1*8)
        a2 = conv_s2(a1,          s2_ref, m2_ref, 1, lane_w[1])   # (W2*n, H2*8)
        a3 = conv_s1(a2, m3_ref, 2, lane_w[2], ws[3])             # (W3*n, H3*8)
        a4 = conv_s1(a3, m4_ref, 3, lane_w[3], ws[4])             # (W4*n, H4*16)

        # Dueling head layer 1: lane-dense 128-wide block-diagonal matmul;
        # the view(-1, 192) flatten + x1/x2 split are folded into w1h rows.
        h = bias_ref[4:5, :w1h_ref.shape[2]]                      # (1, 128)
        for w in range(ws[4]):
            h = h + dot(a4[w * n:(w + 1) * n, :], w1h_ref[w])
        h = jnp.maximum(h, 0.0)                                   # (n, 128)

        # Layer 2 + dueling combine: q = V + (A - mean(A)).
        y = dot(h, w2h_ref[...]) + bias_ref[5:6, :1 + actions]    # (n, 1+A)
        sv, adv = y[:, 0:1], y[:, 1:]
        o_ref[...] = sv + adv - jnp.mean(adv, axis=1, keepdims=True)

    # Input layout X0[w*n + b, h] = x[b, 0, h, w]  (tiny, input-only transform).
    x0 = jnp.transpose(x_nchw[:, 0], (2, 0, 1)).reshape(w0 * n, h0)

    vmem = pl.BlockSpec(memory_space=pltpu.MemorySpace.VMEM)
    # NOTE: for large RL batches, add a batch grid with
    # dimension_semantics=("parallel",) to spread work across both v7x cores.
    return pl.pallas_call(
        kernel,
        out_shape=jax.ShapeDtypeStruct((n, actions), jnp.float32),
        in_specs=[vmem] * 10,
        out_specs=vmem,
    )(x0, folded["s1"], folded["s2"], folded["m1"], folded["m2"],
      folded["m3"], folded["m4"], folded["bias"], folded["w1h"], folded["w2h"])


# ---------------------------------------------------------------------------
# Pure-JAX reference (correctness check)
# ---------------------------------------------------------------------------
def reference_forward(x_nchw, p):
    def cbr(x, w, g, b, m, v, s):
        y = jax.lax.conv_general_dilated(
            x, w, (s, s), "VALID", dimension_numbers=("NCHW", "OIHW", "NCHW"))
        inv_std = 1.0 / jnp.sqrt(v + EPS)
        y = y * (g * inv_std)[None, :, None, None] + \
            (b - m * g * inv_std)[None, :, None, None]
        return jnp.maximum(y, 0.0)

    x = cbr(x_nchw, p["w1"], p["g1"], p["b1"], p["m1"], p["v1"], 2)
    x = cbr(x, p["w2"], p["g2"], p["b2"], p["m2"], p["v2"], 2)
    x = cbr(x, p["w3"], p["g3"], p["b3"], p["m3"], p["v3"], 1)
    x = cbr(x, p["w4"], p["g4"], p["b4"], p["m4"], p["v4"], 1)
    feat = x.reshape(x.shape[0], -1)          # NCHW flatten == view(-1, 192)
    x1, x2 = feat[:, :96], feat[:, 96:]
    h1 = jnp.maximum(x1 @ p["sW1"] + p["sb1"], 0.0)
    sv = h1 @ p["sW2"] + p["sb2"]
    h2 = jnp.maximum(x2 @ p["aW1"] + p["ab1"], 0.0)
    adv = h2 @ p["aW2"] + p["ab2"]
    return sv + (adv - adv.mean(axis=1, keepdims=True))


# ---------------------------------------------------------------------------
# Deterministic parameter init (key splitting on demand -> no StopIteration)
# ---------------------------------------------------------------------------
def init_params(key, actions):
    def nxt():
        nonlocal key
        key, sub = jax.random.split(key)
        return sub

    def conv_w(c_out, c_in):
        return 0.1 * jax.random.normal(nxt(), (c_out, c_in, 3, 3), jnp.float32)

    def bn(c):
        g = 1.0 + 0.1 * jax.random.normal(nxt(), (c,), jnp.float32)
        b = 0.1 * jax.random.normal(nxt(), (c,), jnp.float32)
        m = 0.1 * jax.random.normal(nxt(), (c,), jnp.float32)
        v = jax.random.uniform(nxt(), (c,), jnp.float32, 0.5, 1.5)
        return g, b, m, v

    p = {}
    p["w1"] = conv_w(8, 1);  p["g1"], p["b1"], p["m1"], p["v1"] = bn(8)
    p["w2"] = conv_w(8, 8);  p["g2"], p["b2"], p["m2"], p["v2"] = bn(8)
    p["w3"] = conv_w(8, 8);  p["g3"], p["b3"], p["m3"], p["v3"] = bn(8)
    p["w4"] = conv_w(16, 8); p["g4"], p["b4"], p["m4"], p["v4"] = bn(16)
    p["sW1"] = 0.1 * jax.random.normal(nxt(), (96, 64), jnp.float32)
    p["sb1"] = 0.1 * jax.random.normal(nxt(), (64,), jnp.float32)
    p["sW2"] = 0.1 * jax.random.normal(nxt(), (64, 1), jnp.float32)
    p["sb2"] = 0.1 * jax.random.normal(nxt(), (1,), jnp.float32)
    p["aW1"] = 0.1 * jax.random.normal(nxt(), (96, 64), jnp.float32)
    p["ab1"] = 0.1 * jax.random.normal(nxt(), (64,), jnp.float32)
    p["aW2"] = 0.1 * jax.random.normal(nxt(), (64, actions), jnp.float32)
    p["ab2"] = 0.1 * jax.random.normal(nxt(), (actions,), jnp.float32)
    return p


if __name__ == "__main__":
    ACTIONS = 8
    key = jax.random.PRNGKey(0)
    pkey, xkey = jax.random.split(key)
    params = init_params(pkey, ACTIONS)

    # Batch=2, 1 channel, 30x45 frames (the resolution implied by view(-1, 192)).
    x = jax.random.normal(xkey, (2, 1, 30, 45), jnp.float32)

    folded = fold_params(params, batch=x.shape[0], h0=x.shape[2], w0=x.shape[3])
    fwd = jax.jit(duel_qnet_forward)
    out = jax.block_until_ready(fwd(x, folded))

    ref = jax.block_until_ready(reference_forward(x, params))
    assert out.shape == (2, ACTIONS), out.shape
    max_err = float(jnp.max(jnp.abs(out - ref)))
    assert jnp.allclose(out, ref, atol=2e-3, rtol=2e-3), \
        f"mismatch vs reference (max abs err {max_err})"
    print("KERNEL_OK")
</pallas_src>

<mosaic_0001>
module attributes {stable_mosaic.version = 11 : i64} {
  func.func @kernel(%arg0: memref<90x30xf32, #tpu.memory_space<vmem>>, %arg1: memref<3x44x90xf32, #tpu.memory_space<vmem>>, %arg2: memref<3x20x44xf32, #tpu.memory_space<vmem>>, %arg3: memref<3x30x112xf32, #tpu.memory_space<vmem>>, %arg4: memref<3x112x48xf32, #tpu.memory_space<vmem>>, %arg5: memref<3x48x32xf32, #tpu.memory_space<vmem>>, %arg6: memref<3x32x32xf32, #tpu.memory_space<vmem>>, %arg7: memref<6x128xf32, #tpu.memory_space<vmem>>, %arg8: memref<6x32x128xf32, #tpu.memory_space<vmem>>, %arg9: memref<128x9xf32, #tpu.memory_space<vmem>>, %arg10: memref<2x8xf32, #tpu.memory_space<vmem>>) attributes {dimension_semantics = [], scalar_prefetch = 0 : i64, scratch_operands = 0 : i64, tpu.core_type = #tpu.core_type<tc>} {
    %c0 = arith.constant 0 : index
    %c0_0 = arith.constant 0 : index
    %0 = vector.load %arg0[%c0, %c0_0] : memref<90x30xf32, #tpu.memory_space<vmem>>, vector<90x30xf32>
    %c0_1 = arith.constant 0 : index
    %c0_2 = arith.constant 0 : index
    %c0_3 = arith.constant 0 : index
    %1 = vector.load %arg1[%c0_1, %c0_2, %c0_3] : memref<3x44x90xf32, #tpu.memory_space<vmem>>, vector<1x44x90xf32>
    %2 = vector.shape_cast %1 : vector<1x44x90xf32> to vector<44x90xf32>
    %cst = arith.constant dense<0.000000e+00> : vector<44x30xf32>
    %3 = tpu.matmul %2, %0, %cst {dimension_numbers = #tpu.dot_dimension_numbers<[1], [0], [0], [1], [0, 0, 1, 1], [], []>, precision = #tpu.contract_precision<fp32>} : vector<44x90xf32>, vector<90x30xf32>, vector<44x30xf32> -> vector<44x30xf32>
    %c0_4 = arith.constant 0 : index
    %c0_5 = arith.constant 0 : index
    %c0_6 = arith.constant 0 : index
    %4 = vector.load %arg3[%c0_4, %c0_5, %c0_6] : memref<3x30x112xf32, #tpu.memory_space<vmem>>, vector<1x30x112xf32>
    %5 = vector.shape_cast %4 : vector<1x30x112xf32> to vector<30x112xf32>
    %cst_7 = arith.constant dense<0.000000e+00> : vector<44x112xf32>
    %6 = tpu.matmul %3, %5, %cst_7 {dimension_numbers = #tpu.dot_dimension_numbers<[1], [0], [0], [1], [0, 0, 1, 1], [], []>, precision = #tpu.contract_precision<fp32>} : vector<44x30xf32>, vector<30x112xf32>, vector<44x112xf32> -> vector<44x112xf32>
    %c1 = arith.constant 1 : index
    %c0_8 = arith.constant 0 : index
    %c0_9 = arith.constant 0 : index
    %7 = vector.load %arg1[%c1, %c0_8, %c0_9] : memref<3x44x90xf32, #tpu.memory_space<vmem>>, vector<1x44x90xf32>
    %8 = vector.shape_cast %7 : vector<1x44x90xf32> to vector<44x90xf32>
    %cst_10 = arith.constant dense<0.000000e+00> : vector<44x30xf32>
    %9 = tpu.matmul %8, %0, %cst_10 {dimension_numbers = #tpu.dot_dimension_numbers<[1], [0], [0], [1], [0, 0, 1, 1], [], []>, precision = #tpu.contract_precision<fp32>} : vector<44x90xf32>, vector<90x30xf32>, vector<44x30xf32> -> vector<44x30xf32>
    %c1_11 = arith.constant 1 : index
    %c0_12 = arith.constant 0 : index
    %c0_13 = arith.constant 0 : index
    %10 = vector.load %arg3[%c1_11, %c0_12, %c0_13] : memref<3x30x112xf32, #tpu.memory_space<vmem>>, vector<1x30x112xf32>
    %11 = vector.shape_cast %10 : vector<1x30x112xf32> to vector<30x112xf32>
    %cst_14 = arith.constant dense<0.000000e+00> : vector<44x112xf32>
    %12 = tpu.matmul %9, %11, %cst_14 {dimension_numbers = #tpu.dot_dimension_numbers<[1], [0], [0], [1], [0, 0, 1, 1], [], []>, precision = #tpu.contract_precision<fp32>} : vector<44x30xf32>, vector<30x112xf32>, vector<44x112xf32> -> vector<44x112xf32>
    %13 = arith.addf %6, %12 : vector<44x112xf32>
    %c2 = arith.constant 2 : index
    %c0_15 = arith.constant 0 : index
    %c0_16 = arith.constant 0 : index
    %14 = vector.load %arg1[%c2, %c0_15, %c0_16] : memref<3x44x90xf32, #tpu.memory_space<vmem>>, vector<1x44x90xf32>
    %15 = vector.shape_cast %14 : vector<1x44x90xf32> to vector<44x90xf32>
    %cst_17 = arith.constant dense<0.000000e+00> : vector<44x30xf32>
    %16 = tpu.matmul %15, %0, %cst_17 {dimension_numbers = #tpu.dot_dimension_numbers<[1], [0], [0], [1], [0, 0, 1, 1], [], []>, precision = #tpu.contract_precision<fp32>} : vector<44x90xf32>, vector<90x30xf32>, vector<44x30xf32> -> vector<44x30xf32>
    %c2_18 = arith.constant 2 : index
    %c0_19 = arith.constant 0 : index
    %c0_20 = arith.constant 0 : index
    %17 = vector.load %arg3[%c2_18, %c0_19, %c0_20] : memref<3x30x112xf32, #tpu.memory_space<vmem>>, vector<1x30x112xf32>
    %18 = vector.shape_cast %17 : vector<1x30x112xf32> to vector<30x112xf32>
    %cst_21 = arith.constant dense<0.000000e+00> : vector<44x112xf32>
    %19 = tpu.matmul %16, %18, %cst_21 {dimension_numbers = #tpu.dot_dimension_numbers<[1], [0], [0], [1], [0, 0, 1, 1], [], []>, precision = #tpu.contract_precision<fp32>} : vector<44x30xf32>, vector<30x112xf32>, vector<44x112xf32> -> vector<44x112xf32>
    %20 = arith.addf %13, %19 : vector<44x112xf32>
    %c0_22 = arith.constant 0 : index
    %c0_23 = arith.constant 0 : index
    %21 = vector.load %arg7[%c0_22, %c0_23] : memref<6x128xf32, #tpu.memory_space<vmem>>, vector<1x112xf32>
    %22 = vector.broadcast %21 : vector<1x112xf32> to vector<44x112xf32>
    %23 = arith.addf %20, %22 : vector<44x112xf32>
    %cst_24 = arith.constant 0.000000e+00 : f32
    %24 = vector.broadcast %cst_24 : f32 to vector<44x112xf32>
    %25 = arith.maximumf %23, %24 : vector<44x112xf32>
    %c0_25 = arith.constant 0 : index
    %c0_26 = arith.constant 0 : index
    %c0_27 = arith.constant 0 : index
    %26 = vector.load %arg2[%c0_25, %c0_26, %c0_27] : memref<3x20x44xf32, #tpu.memory_space<vmem>>, vector<1x20x44xf32>
    %27 = vector.shape_cast %26 : vector<1x20x44xf32> to vector<20x44xf32>
    %cst_28 = arith.constant dense<0.000000e+00> : vector<20x112xf32>
    %28 = tpu.matmul %27, %25, %cst_28 {dimension_numbers = #tpu.dot_dimension_numbers<[1], [0], [0], [1], [0, 0, 1, 1], [], []>, precision = #tpu.contract_precision<fp32>} : vector<20x44xf32>, vector<44x112xf32>, vector<20x112xf32> -> vector<20x112xf32>
    %c0_29 = arith.constant 0 : index
    %c0_30 = arith.constant 0 : index
    %c0_31 = arith.constant 0 : index
    %29 = vector.load %arg4[%c0_29, %c0_30, %c0_31] : memref<3x112x48xf32, #tpu.memory_space<vmem>>, vector<1x112x48xf32>
    %30 = vector.shape_cast %29 : vector<1x112x48xf32> to vector<112x48xf32>
    %cst_32 = arith.constant dense<0.000000e+00> : vector<20x48xf32>
    %31 = tpu.matmul %28, %30, %cst_32 {dimension_numbers = #tpu.dot_dimension_numbers<[1], [0], [0], [1], [0, 0, 1, 1], [], []>, precision = #tpu.contract_precision<fp32>} : vector<20x112xf32>, vector<112x48xf32>, vector<20x48xf32> -> vector<20x48xf32>
    %c1_33 = arith.constant 1 : index
    %c0_34 = arith.constant 0 : index
    %c0_35 = arith.constant 0 : index
    %32 = vector.load %arg2[%c1_33, %c0_34, %c0_35] : memref<3x20x44xf32, #tpu.memory_space<vmem>>, vector<1x20x44xf32>
    %33 = vector.shape_cast %32 : vector<1x20x44xf32> to vector<20x44xf32>
    %cst_36 = arith.constant dense<0.000000e+00> : vector<20x112xf32>
    %34 = tpu.matmul %33, %25, %cst_36 {dimension_numbers = #tpu.dot_dimension_numbers<[1], [0], [0], [1], [0, 0, 1, 1], [], []>, precision = #tpu.contract_precision<fp32>} : vector<20x44xf32>, vector<44x112xf32>, vector<20x112xf32> -> vector<20x112xf32>
    %c1_37 = arith.constant 1 : index
    %c0_38 = arith.constant 0 : index
    %c0_39 = arith.constant 0 : index
    %35 = vector.load %arg4[%c1_37, %c0_38, %c0_39] : memref<3x112x48xf32, #tpu.memory_space<vmem>>, vector<1x112x48xf32>
    %36 = vector.shape_cast %35 : vector<1x112x48xf32> to vector<112x48xf32>
    %cst_40 = arith.constant dense<0.000000e+00> : vector<20x48xf32>
    %37 = tpu.matmul %34, %36, %cst_40 {dimension_numbers = #tpu.dot_dimension_numbers<[1], [0], [0], [1], [0, 0, 1, 1], [], []>, precision = #tpu.contract_precision<fp32>} : vector<20x112xf32>, vector<112x48xf32>, vector<20x48xf32> -> vector<20x48xf32>
    %38 = arith.addf %31, %37 : vector<20x48xf32>
    %c2_41 = arith.constant 2 : index
    %c0_42 = arith.constant 0 : index
    %c0_43 = arith.constant 0 : index
    %39 = vector.load %arg2[%c2_41, %c0_42, %c0_43] : memref<3x20x44xf32, #tpu.memory_space<vmem>>, vector<1x20x44xf32>
    %40 = vector.shape_cast %39 : vector<1x20x44xf32> to vector<20x44xf32>
    %cst_44 = arith.constant dense<0.000000e+00> : vector<20x112xf32>
    %41 = tpu.matmul %40, %25, %cst_44 {dimension_numbers = #tpu.dot_dimension_numbers<[1], [0], [0], [1], [0, 0, 1, 1], [], []>, precision = #tpu.contract_precision<fp32>} : vector<20x44xf32>, vector<44x112xf32>, vector<20x112xf32> -> vector<20x112xf32>
    %c2_45 = arith.constant 2 : index
    %c0_46 = arith.constant 0 : index
    %c0_47 = arith.constant 0 : index
    %42 = vector.load %arg4[%c2_45, %c0_46, %c0_47] : memref<3x112x48xf32, #tpu.memory_space<vmem>>, vector<1x112x48xf32>
    %43 = vector.shape_cast %42 : vector<1x112x48xf32> to vector<112x48xf32>
    %cst_48 = arith.constant dense<0.000000e+00> : vector<20x48xf32>
    %44 = tpu.matmul %41, %43, %cst_48 {dimension_numbers = #tpu.dot_dimension_numbers<[1], [0], [0], [1], [0, 0, 1, 1], [], []>, precision = #tpu.contract_precision<fp32>} : vector<20x112xf32>, vector<112x48xf32>, vector<20x48xf32> -> vector<20x48xf32>
    %45 = arith.addf %38, %44 : vector<20x48xf32>
    %c1_49 = arith.constant 1 : index
    %c0_50 = arith.constant 0 : index
    %46 = vector.load %arg7[%c1_49, %c0_50] : memref<6x128xf32, #tpu.memory_space<vmem>>, vector<1x48xf32>
    %47 = vector.broadcast %46 : vector<1x48xf32> to vector<20x48xf32>
    %48 = arith.addf %45, %47 : vector<20x48xf32>
    %cst_51 = arith.constant 0.000000e+00 : f32
    %49 = vector.broadcast %cst_51 : f32 to vector<20x48xf32>
    %50 = arith.maximumf %48, %49 : vector<20x48xf32>
    %51 = vector.extract_strided_slice %50 {offsets = [0, 0], sizes = [16, 48], strides = [1, 1]} : vector<20x48xf32> to vector<16x48xf32>
    %c0_52 = arith.constant 0 : index
    %c0_53 = arith.constant 0 : index
    %c0_54 = arith.constant 0 : index
    %52 = vector.load %arg5[%c0_52, %c0_53, %c0_54] : memref<3x48x32xf32, #tpu.memory_space<vmem>>, vector<1x48x32xf32>
    %53 = vector.shape_cast %52 : vector<1x48x32xf32> to vector<48x32xf32>
    %cst_55 = arith.constant dense<0.000000e+00> : vector<16x32xf32>
    %54 = tpu.matmul %51, %53, %cst_55 {dimension_numbers = #tpu.dot_dimension_numbers<[1], [0], [0], [1], [0, 0, 1, 1], [], []>, precision = #tpu.contract_precision<fp32>} : vector<16x48xf32>, vector<48x32xf32>, vector<16x32xf32> -> vector<16x32xf32>
    %55 = vector.extract_strided_slice %50 {offsets = [2, 0], sizes = [16, 48], strides = [1, 1]} : vector<20x48xf32> to vector<16x48xf32>
    %c1_56 = arith.constant 1 : index
    %c0_57 = arith.constant 0 : index
    %c0_58 = arith.constant 0 : index
    %56 = vector.load %arg5[%c1_56, %c0_57, %c0_58] : memref<3x48x32xf32, #tpu.memory_space<vmem>>, vector<1x48x32xf32>
    %57 = vector.shape_cast %56 : vector<1x48x32xf32> to vector<48x32xf32>
    %cst_59 = arith.constant dense<0.000000e+00> : vector<16x32xf32>
    %58 = tpu.matmul %55, %57, %cst_59 {dimension_numbers = #tpu.dot_dimension_numbers<[1], [0], [0], [1], [0, 0, 1, 1], [], []>, precision = #tpu.contract_precision<fp32>} : vector<16x48xf32>, vector<48x32xf32>, vector<16x32xf32> -> vector<16x32xf32>
    %59 = arith.addf %54, %58 : vector<16x32xf32>
    %60 = vector.extract_strided_slice %50 {offsets = [4, 0], sizes = [16, 48], strides = [1, 1]} : vector<20x48xf32> to vector<16x48xf32>
    %c2_60 = arith.constant 2 : index
    %c0_61 = arith.constant 0 : index
    %c0_62 = arith.constant 0 : index
    %61 = vector.load %arg5[%c2_60, %c0_61, %c0_62] : memref<3x48x32xf32, #tpu.memory_space<vmem>>, vector<1x48x32xf32>
    %62 = vector.shape_cast %61 : vector<1x48x32xf32> to vector<48x32xf32>
    %cst_63 = arith.constant dense<0.000000e+00> : vector<16x32xf32>
    %63 = tpu.matmul %60, %62, %cst_63 {dimension_numbers = #tpu.dot_dimension_numbers<[1], [0], [0], [1], [0, 0, 1, 1], [], []>, precision = #tpu.contract_precision<fp32>} : vector<16x48xf32>, vector<48x32xf32>, vector<16x32xf32> -> vector<16x32xf32>
    %64 = arith.addf %59, %63 : vector<16x32xf32>
    %c2_64 = arith.constant 2 : index
    %c0_65 = arith.constant 0 : index
    %65 = vector.load %arg7[%c2_64, %c0_65] : memref<6x128xf32, #tpu.memory_space<vmem>>, vector<1x32xf32>
    %66 = vector.broadcast %65 : vector<1x32xf32> to vector<16x32xf32>
    %67 = arith.addf %64, %66 : vector<16x32xf32>
    %cst_66 = arith.constant 0.000000e+00 : f32
    %68 = vector.broadcast %cst_66 : f32 to vector<16x32xf32>
    %69 = arith.maximumf %67, %68 : vector<16x32xf32>
    %70 = vector.extract_strided_slice %69 {offsets = [0, 0], sizes = [12, 32], strides = [1, 1]} : vector<16x32xf32> to vector<12x32xf32>
    %c0_67 = arith.constant 0 : index
    %c0_68 = arith.constant 0 : index
    %c0_69 = arith.constant 0 : index
    %71 = vector.load %arg6[%c0_67, %c0_68, %c0_69] : memref<3x32x32xf32, #tpu.memory_space<vmem>>, vector<1x32x32xf32>
    %72 = vector.shape_cast %71 : vector<1x32x32xf32> to vector<32x32xf32>
    %cst_70 = arith.constant dense<0.000000e+00> : vector<12x32xf32>
    %73 = tpu.matmul %70, %72, %cst_70 {dimension_numbers = #tpu.dot_dimension_numbers<[1], [0], [0], [1], [0, 0, 1, 1], [], []>, precision = #tpu.contract_precision<fp32>} : vector<12x32xf32>, vector<32x32xf32>, vector<12x32xf32> -> vector<12x32xf32>
    %74 = vector.extract_strided_slice %69 {offsets = [2, 0], sizes = [12, 32], strides = [1, 1]} : vector<16x32xf32> to vector<12x32xf32>
    %c1_71 = arith.constant 1 : index
    %c0_72 = arith.constant 0 : index
    %c0_73 = arith.constant 0 : index
    %75 = vector.load %arg6[%c1_71, %c0_72, %c0_73] : memref<3x32x32xf32, #tpu.memory_space<vmem>>, vector<1x32x32xf32>
    %76 = vector.shape_cast %75 : vector<1x32x32xf32> to vector<32x32xf32>
    %cst_74 = arith.constant dense<0.000000e+00> : vector<12x32xf32>
    %77 = tpu.matmul %74, %76, %cst_74 {dimension_numbers = #tpu.dot_dimension_numbers<[1], [0], [0], [1], [0, 0, 1, 1], [], []>, precision = #tpu.contract_precision<fp32>} : vector<12x32xf32>, vector<32x32xf32>, vector<12x32xf32> -> vector<12x32xf32>
    %78 = arith.addf %73, %77 : vector<12x32xf32>
    %79 = vector.extract_strided_slice %69 {offsets = [4, 0], sizes = [12, 32], strides = [1, 1]} : vector<16x32xf32> to vector<12x32xf32>
    %c2_75 = arith.constant 2 : index
    %c0_76 = arith.constant 0 : index
    %c0_77 = arith.constant 0 : index
    %80 = vector.load %arg6[%c2_75, %c0_76, %c0_77] : memref<3x32x32xf32, #tpu.memory_space<vmem>>, vector<1x32x32xf32>
    %81 = vector.shape_cast %80 : vector<1x32x32xf32> to vector<32x32xf32>
    %cst_78 = arith.constant dense<0.000000e+00> : vector<12x32xf32>
    %82 = tpu.matmul %79, %81, %cst_78 {dimension_numbers = #tpu.dot_dimension_numbers<[1], [0], [0], [1], [0, 0, 1, 1], [], []>, precision = #tpu.contract_precision<fp32>} : vector<12x32xf32>, vector<32x32xf32>, vector<12x32xf32> -> vector<12x32xf32>
    %83 = arith.addf %78, %82 : vector<12x32xf32>
    %c3 = arith.constant 3 : index
    %c0_79 = arith.constant 0 : index
    %84 = vector.load %arg7[%c3, %c0_79] : memref<6x128xf32, #tpu.memory_space<vmem>>, vector<1x32xf32>
    %85 = vector.broadcast %84 : vector<1x32xf32> to vector<12x32xf32>
    %86 = arith.addf %83, %85 : vector<12x32xf32>
    %cst_80 = arith.constant 0.000000e+00 : f32
    %87 = vector.broadcast %cst_80 : f32 to vector<12x32xf32>
    %88 = arith.maximumf %86, %87 : vector<12x32xf32>
    %c4 = arith.constant 4 : index
    %c0_81 = arith.constant 0 : index
    %89 = vector.load %arg7[%c4, %c0_81] : memref<6x128xf32, #tpu.memory_space<vmem>>, vector<1x128xf32>
    %90 = vector.extract_strided_slice %88 {offsets = [0, 0], sizes = [2, 32], strides = [1, 1]} : vector<12x32xf32> to vector<2x32xf32>
    %c0_82 = arith.constant 0 : index
    %c0_83 = arith.constant 0 : index
    %c0_84 = arith.constant 0 : index
    %91 = vector.load %arg8[%c0_82, %c0_83, %c0_84] : memref<6x32x128xf32, #tpu.memory_space<vmem>>, vector<1x32x128xf32>
    %92 = vector.shape_cast %91 : vector<1x32x128xf32> to vector<32x128xf32>
    %cst_85 = arith.constant dense<0.000000e+00> : vector<2x128xf32>
    %93 = tpu.matmul %90, %92, %cst_85 {dimension_numbers = #tpu.dot_dimension_numbers<[1], [0], [0], [1], [0, 0, 1, 1], [], []>, precision = #tpu.contract_precision<fp32>} : vector<2x32xf32>, vector<32x128xf32>, vector<2x128xf32> -> vector<2x128xf32>
    %94 = vector.broadcast %89 : vector<1x128xf32> to vector<2x128xf32>
    %95 = arith.addf %94, %93 : vector<2x128xf32>
    %96 = vector.extract_strided_slice %88 {offsets = [2, 0], sizes = [2, 32], strides = [1, 1]} : vector<12x32xf32> to vector<2x32xf32>
    %c1_86 = arith.constant 1 : index
    %c0_87 = arith.constant 0 : index
    %c0_88 = arith.constant 0 : index
    %97 = vector.load %arg8[%c1_86, %c0_87, %c0_88] : memref<6x32x128xf32, #tpu.memory_space<vmem>>, vector<1x32x128xf32>
    %98 = vector.shape_cast %97 : vector<1x32x128xf32> to vector<32x128xf32>
    %cst_89 = arith.constant dense<0.000000e+00> : vector<2x128xf32>
    %99 = tpu.matmul %96, %98, %cst_89 {dimension_numbers = #tpu.dot_dimension_numbers<[1], [0], [0], [1], [0, 0, 1, 1], [], []>, precision = #tpu.contract_precision<fp32>} : vector<2x32xf32>, vector<32x128xf32>, vector<2x128xf32> -> vector<2x128xf32>
    %100 = arith.addf %95, %99 : vector<2x128xf32>
    %101 = vector.extract_strided_slice %88 {offsets = [4, 0], sizes = [2, 32], strides = [1, 1]} : vector<12x32xf32> to vector<2x32xf32>
    %c2_90 = arith.constant 2 : index
    %c0_91 = arith.constant 0 : index
    %c0_92 = arith.constant 0 : index
    %102 = vector.load %arg8[%c2_90, %c0_91, %c0_92] : memref<6x32x128xf32, #tpu.memory_space<vmem>>, vector<1x32x128xf32>
    %103 = vector.shape_cast %102 : vector<1x32x128xf32> to vector<32x128xf32>
    %cst_93 = arith.constant dense<0.000000e+00> : vector<2x128xf32>
    %104 = tpu.matmul %101, %103, %cst_93 {dimension_numbers = #tpu.dot_dimension_numbers<[1], [0], [0], [1], [0, 0, 1, 1], [], []>, precision = #tpu.contract_precision<fp32>} : vector<2x32xf32>, vector<32x128xf32>, vector<2x128xf32> -> vector<2x128xf32>
    %105 = arith.addf %100, %104 : vector<2x128xf32>
    %106 = vector.extract_strided_slice %88 {offsets = [6, 0], sizes = [2, 32], strides = [1, 1]} : vector<12x32xf32> to vector<2x32xf32>
    %c3_94 = arith.constant 3 : index
    %c0_95 = arith.constant 0 : index
    %c0_96 = arith.constant 0 : index
    %107 = vector.load %arg8[%c3_94, %c0_95, %c0_96] : memref<6x32x128xf32, #tpu.memory_space<vmem>>, vector<1x32x128xf32>
    %108 = vector.shape_cast %107 : vector<1x32x128xf32> to vector<32x128xf32>
    %cst_97 = arith.constant dense<0.000000e+00> : vector<2x128xf32>
    %109 = tpu.matmul %106, %108, %cst_97 {dimension_numbers = #tpu.dot_dimension_numbers<[1], [0], [0], [1], [0, 0, 1, 1], [], []>, precision = #tpu.contract_precision<fp32>} : vector<2x32xf32>, vector<32x128xf32>, vector<2x128xf32> -> vector<2x128xf32>
    %110 = arith.addf %105, %109 : vector<2x128xf32>
    %111 = vector.extract_strided_slice %88 {offsets = [8, 0], sizes = [2, 32], strides = [1, 1]} : vector<12x32xf32> to vector<2x32xf32>
    %c4_98 = arith.constant 4 : index
    %c0_99 = arith.constant 0 : index
    %c0_100 = arith.constant 0 : index
    %112 = vector.load %arg8[%c4_98, %c0_99, %c0_100] : memref<6x32x128xf32, #tpu.memory_space<vmem>>, vector<1x32x128xf32>
    %113 = vector.shape_cast %112 : vector<1x32x128xf32> to vector<32x128xf32>
    %cst_101 = arith.constant dense<0.000000e+00> : vector<2x128xf32>
    %114 = tpu.matmul %111, %113, %cst_101 {dimension_numbers = #tpu.dot_dimension_numbers<[1], [0], [0], [1], [0, 0, 1, 1], [], []>, precision = #tpu.contract_precision<fp32>} : vector<2x32xf32>, vector<32x128xf32>, vector<2x128xf32> -> vector<2x128xf32>
    %115 = arith.addf %110, %114 : vector<2x128xf32>
    %116 = vector.extract_strided_slice %88 {offsets = [10, 0], sizes = [2, 32], strides = [1, 1]} : vector<12x32xf32> to vector<2x32xf32>
    %c5 = arith.constant 5 : index
    %c0_102 = arith.constant 0 : index
    %c0_103 = arith.constant 0 : index
    %117 = vector.load %arg8[%c5, %c0_102, %c0_103] : memref<6x32x128xf32, #tpu.memory_space<vmem>>, vector<1x32x128xf32>
    %118 = vector.shape_cast %117 : vector<1x32x128xf32> to vector<32x128xf32>
    %cst_104 = arith.constant dense<0.000000e+00> : vector<2x128xf32>
    %119 = tpu.matmul %116, %118, %cst_104 {dimension_numbers = #tpu.dot_dimension_numbers<[1], [0], [0], [1], [0, 0, 1, 1], [], []>, precision = #tpu.contract_precision<fp32>} : vector<2x32xf32>, vector<32x128xf32>, vector<2x128xf32> -> vector<2x128xf32>
    %120 = arith.addf %115, %119 : vector<2x128xf32>
    %cst_105 = arith.constant 0.000000e+00 : f32
    %121 = vector.broadcast %cst_105 : f32 to vector<2x128xf32>
    %122 = arith.maximumf %120, %121 : vector<2x128xf32>
    %c0_106 = arith.constant 0 : index
    %c0_107 = arith.constant 0 : index
    %123 = vector.load %arg9[%c0_106, %c0_107] : memref<128x9xf32, #tpu.memory_space<vmem>>, vector<128x9xf32>
    %cst_108 = arith.constant dense<0.000000e+00> : vector<2x9xf32>
    %124 = tpu.matmul %122, %123, %cst_108 {dimension_numbers = #tpu.dot_dimension_numbers<[1], [0], [0], [1], [0, 0, 1, 1], [], []>, precision = #tpu.contract_precision<fp32>} : vector<2x128xf32>, vector<128x9xf32>, vector<2x9xf32> -> vector<2x9xf32>
    %c5_109 = arith.constant 5 : index
    %c0_110 = arith.constant 0 : index
    %125 = vector.load %arg7[%c5_109, %c0_110] : memref<6x128xf32, #tpu.memory_space<vmem>>, vector<1x9xf32>
    %126 = vector.broadcast %125 : vector<1x9xf32> to vector<2x9xf32>
    %127 = arith.addf %124, %126 : vector<2x9xf32>
    %128 = vector.extract_strided_slice %127 {offsets = [0, 0], sizes = [2, 1], strides = [1, 1]} : vector<2x9xf32> to vector<2x1xf32>
    %129 = vector.extract_strided_slice %127 {offsets = [0, 1], sizes = [2, 8], strides = [1, 1]} : vector<2x9xf32> to vector<2x8xf32>
    %130 = vector.broadcast %128 : vector<2x1xf32> to vector<2x8xf32>
    %131 = arith.addf %130, %129 : vector<2x8xf32>
    %cst_111 = arith.constant dense<0.000000e+00> : vector<2xf32>
    %132 = vector.multi_reduction <add>, %129, %cst_111 [1] : vector<2x8xf32> to vector<2xf32>
    %133 = vector.shape_cast %132 : vector<2xf32> to vector<2x1xf32>
    %cst_112 = arith.constant 8.000000e+00 : f32
    %134 = vector.broadcast %cst_112 : f32 to vector<2x1xf32>
    %135 = arith.divf %133, %134 : vector<2x1xf32>
    %136 = vector.broadcast %135 : vector<2x1xf32> to vector<2x8xf32>
    %137 = arith.subf %131, %136 : vector<2x8xf32>
    %c0_113 = arith.constant 0 : index
    %c0_114 = arith.constant 0 : index
    %138 = vector.load %arg10[%c0_113, %c0_114] : memref<2x8xf32, #tpu.memory_space<vmem>>, vector<2x8xf32>
    tpu.vector_store %arg10[%c0_113, %c0_114], %137 {strides = array<i32>} : memref<2x8xf32, #tpu.memory_space<vmem>>, vector<2x8xf32>,
    return
  }
}

</mosaic_0001>

<bundles_post_ra>
// kernel: duel_qnet_forward.1
= control target key start
LH: loop header
LB: loop body
LE: loop exit
PB: predicated region body
PF: predicated region fallthrough
CT: control target
= control target key end

     0   :  { %vm54_vm0 = vcmask 736256   ;;  %vm73_vm1 = vcmask 1041408   ;;  %s26698_s0 = inlined_call_operand.vmem [shape: f32[90,30], index: 0, kind: input, shape index: {}]   ;;  %s26699_s1 = inlined_call_operand.vmem [shape: f32[3,44,90], index: 1, kind: input, shape index: {}]   ;;  %s26700_s2 = inlined_call_operand.vmem [shape: f32[3,20,44], index: 2, kind: input, shape index: {}]   ;;  %s26701_s3 = inlined_call_operand.vmem [shape: f32[3,30,112], index: 3, kind: input, shape index: {}]   ;;  %s26702_s4 = inlined_call_operand.vmem [shape: f32[3,112,48], index: 4, kind: input, shape index: {}]   ;;  %s26703_s5 = inlined_call_operand.vmem [shape: f32[3,48,32], index: 5, kind: input, shape index: {}]   ;;  %s26704_s6 = inlined_call_operand.vmem [shape: f32[3,32,32], index: 6, kind: input, shape index: {}]   ;;  %s26705_s7 = inlined_call_operand.vmem [shape: f32[6,128], index: 7, kind: input, shape index: {}]   ;;  %s26706_s8 = inlined_call_operand.vmem [shape: f32[6,32,128], index: 8, kind: input, shape index: {}]   ;;  %s26707_s9 = inlined_call_operand.vmem [shape: f32[128,9], index: 9, kind: input, shape index: {}]   ;;  %s26708_s10 = inlined_call_operand.hbm [shape: f32[2,8], index: 10, kind: output, shape index: {}]  }
   0x1   :  { %v36_v0 = vld [vmem:[%s26698_s0] sm:$0xff]  ;;  %v37_v1 = vld [vmem:[%s26698_s0 + $0x8] sm:$0xff]  ;;  %v38_v2 = vld [vmem:[%s26698_s0 + $0x10] sm:$0xff] }
   0x2   :  { %v78_v3 = vand.u32 4294901760, %v36_v0  ;;  %v81_v4 = vand.u32 4294901760, %v37_v1  ;;  %v39_v5 = vld [vmem:[%s26698_s0 + $0x18] sm:$0xff]  ;;  %v84_v6 = vand.u32 4294901760, %v38_v2  ;;  %v22776_v7 = vld [vmem:[%s26698_s0 + $0x20] sm:$0xff]  ;;  %v22781_v8 = vld [vmem:[%s26698_s0 + $0x28] sm:$0xff] }
   0x3   :  { %v87_v9 = vand.u32 4294901760, %v39_v5  ;;  %v90_v10 = vand.u32 4294901760, %v22776_v7  ;;  %v93_v11 = vand.u32 4294901760, %v22781_v8  ;;  %v22788_v12 = vld [vmem:[%s26698_s0 + $0x30] sm:$0xff]  ;;  %v22793_v13 = vld [vmem:[%s26698_s0 + $0x38] sm:$0xff]  ;;  %v22798_v14 = vld [vmem:[%s26698_s0 + $0x40] sm:$0xff] }
   0x4   :  { %v22800_v15 = vpack.c.bf16 %v81_v4, %v78_v3  ;;  %v96_v16 = vand.u32 4294901760, %v22788_v12  ;;  %v99_v17 = vand.u32 4294901760, %v22793_v13  ;;  %v22807_v18 = vld [vmem:[%s26698_s0 + $0x48] sm:$0xff]  ;;  %v22812_v19 = vld [vmem:[%s26698_s0 + $0x50] sm:$0xff]  ;;  %v48_v20 = vld [vmem:[%s26699_s1] sm:$0xff]  ;;  %v102_v22 = vand.u32 4294901760, %v22798_v14 }
   0x5   :  { %v22817_v21 = vpack.c.bf16 %v87_v9, %v84_v6  ;;  %v15779_v23 = vld [vmem:[%s26699_s1 + $0x30] sm:$0xff]  ;;  %v49_v24 = vld [vmem:[%s26699_s1 + $0x8] sm:$0xff]  ;;  %v22832_v25 = vpack.c.bf16 %v93_v11, %v90_v10  ;;  %v105_v26 = vand.u32 4294901760, %v22807_v18  ;;  %v47_v27 = vld [vmem:[%s26698_s0 + $0x58] sm:$0x3]  ;;  %v56_v28 = vsel %vm54_vm0, %v48_v20, 0 }
   0x6   :  { %20404 = vmatprep.subr.bf16.mxu0 %v22800_v15  ;;  %20548 = vmatprep.subr.bf16.mxu1 %v22800_v15  ;;  %v22839_v29 = vsub.f32 %v36_v0, %v78_v3  ;;  %v15780_v30 = vld [vmem:[%s26699_s1 + $0x38] sm:$0xff]  ;;  %v22850_v31 = vpack.c.bf16 %v99_v17, %v96_v16  ;;  %v108_v32 = vand.u32 4294901760, %v22812_v19  ;;  %v22853_v33 = vand.u32 4294901760, %v56_v28 }
   0x7   :  { %20406 = vmatpush3.bf16.msra.mxu0 %v22800_v15  ;;  %20550 = vmatpush3.bf16.msra.mxu1 %v22800_v15  ;;  %v22855_v34 = vsub.f32 %v37_v1, %v81_v4  ;;  %v893_v36 = vsel %vm54_vm0, %v15779_v23, 0  ;;  %v59_v37 = vsel %vm54_vm0, %v49_v24, 0  ;;  %v896_v38 = vsel %vm54_vm0, %v15780_v30, 0 }
   0x8   :  { %20408 = vmatprep.subr.bf16.mxu0 %v22817_v21  ;;  %20552 = vmatprep.subr.bf16.mxu1 %v22817_v21  ;;  %v217_v35 = vand.u32 4294901760, %v22839_v29  ;;  %v22864_v39 = vsel %vm73_vm1, %v47_v27, 0  ;;  %v22867_v40 = vsub.f32 %v56_v28, %v22853_v33  ;;  %v22870_v42 = vand.u32 4294901760, %v893_v36 }
   0x9   :  { %v26724_v41 = vand.u32 4294901760, %v22855_v34  ;;  %v22875_v44 = vand.u32 4294901760, %v59_v37  ;;  %v22877_v45 = vand.u32 4294901760, %v896_v38  ;;  %v22879_v46 = vsub.f32 %v38_v2, %v84_v6 }
   0xa   :  { %v218_v43 = vsub.f32 %v22839_v29, %v217_v35 }
   0xb   :  { %15 = vsyncpa [#allocation3], 0  ;;  %20410 = vmatpush3.bf16.msra.mxu0 %v22817_v21  ;;  %20554 = vmatpush3.bf16.msra.mxu1 %v22817_v21  ;;  %v26713_v47 = vand.u32 4294901760, %v22867_v40  ;;  %v225_v48 = vsub.f32 %v22855_v34, %v26724_v41  ;;  %v22888_v49 = vsub.f32 %v893_v36, %v22870_v42  ;;  %v22890_v50 = vsub.f32 %v39_v5, %v87_v9  ;;  %v50_v5 = vld [vmem:[%s26699_s1 + $0x10] sm:$0xff]  ;;  %s22705_s12 = smov [#allocation2]  }
   0xc   :  { %20412 = vmatprep.subr.bf16.mxu0 %v22832_v25  ;;  %20556 = vmatprep.subr.bf16.mxu1 %v22832_v25  ;;  %v111_v51 = vand.u32 4294901760, %v22864_v39  ;;  %v22896_v52 = vsub.f32 %v59_v37, %v22875_v44  ;;  %v22899_v53 = vsub.f32 %v896_v38, %v22877_v45  ;;  %v26723_v54 = vand.u32 4294901760, %v22879_v46  ;;  %v51_v37 = vld [vmem:[%s26699_s1 + $0x18] sm:$0xff]  ;;  %s15771_s13 = sshll.u32 %s22705_s12, 4  ;;  %s15772_s13 = int_to_ptr.vmem [resolvable:$true] %s15771_s13 }
   0xd   :  { %v157_v55 = vsub.f32 %v22867_v40, %v26713_v47  ;;  %v219_v56 = vand.u32 4294901760, %v218_v43  ;;  %v26712_v57 = vand.u32 4294901760, %v22888_v49  ;;  %v26722_v58 = vand.u32 4294901760, %v22890_v50  ;;  %p22681_p1 = scmp.lt.s32.totalorder %s15772_s13, %s15772_s13 }
   0xe   :  { %v226_v59 = vand.u32 4294901760, %v225_v48  ;;  %v26710_v60 = vand.u32 4294901760, %v22896_v52  ;;  %v26709_v61 = vand.u32 4294901760, %v22899_v53  ;;  %v22912_v62 = vsub.f32 %v22776_v7, %v90_v10 }
   0xf   :  { %20414 = vmatpush3.bf16.msra.mxu0 %v22832_v25  ;;  %20558 = vmatpush3.bf16.msra.mxu1 %v22832_v25  ;;  %v158_v63 = vand.u32 4294901760, %v157_v55  ;;  %v990_v0 = vsub.f32 %v22888_v49, %v26712_v57  ;;  %v232_v1 = vsub.f32 %v22879_v46, %v26723_v54  ;;  %v22928_v2 = vpack.c.bf16 %v105_v26, %v102_v22 }
  0x10   :  { %20416 = vmatprep.subr.bf16.mxu0 %v22850_v31  ;;  %20560 = vmatprep.subr.bf16.mxu1 %v22850_v31  ;;  %v22934_v3 = vpack.c.bf16 %v111_v51, %v108_v32  ;;  %v26721_v4 = vand.u32 4294901760, %v22912_v62  ;;  %v239_v7 = vsub.f32 %v22890_v50, %v26722_v58  ;;  %v22946_v9 = vsub.f32 %v22781_v8, %v93_v11  ;;  %v15781_v11 = vld [vmem:[%s26699_s1 + $0x40] sm:$0xff] }
  0x11   :  { %17409 = vmatprep.mubr.f32.mxu0 %v158_v63  ;;  %v991_v6 = vand.u32 4294901760, %v990_v0  ;;  %v22951_v10 = vsub.f32 %v22788_v12, %v96_v16  ;;  %v22953_v20 = vpack.c.bf16 %v226_v59, %v219_v56  ;;  %v22958_v23 = vsub.f32 %v22896_v52, %v26710_v60  ;;  %v15782_v63 = vld [vmem:[%s26699_s1 + $0x48] sm:$0xff] }
  0x12   :  { %v22963_v24 = vsub.f32 %v22899_v53, %v26709_v61  ;;  %v22968_v8 = vsub.f32 %v22793_v13, %v99_v17  ;;  %v233_v12 = vand.u32 4294901760, %v232_v1  ;;  %v26720_v16 = vand.u32 4294901760, %v22946_v9 }
  0x13   :  { %26790 = vst [vmem:[#allocation5_spill] sm:$0xff] %v22953_v20  ;;  %20418 = vmatpush3.bf16.msra.mxu0 %v22850_v31  ;;  %20562 = vmatpush3.bf16.msra.mxu1 %v22850_v31  ;;  %v26719_v27 = vand.u32 4294901760, %v22951_v10  ;;  %v62_v28 = vsel %vm54_vm0, %v50_v5, 0  ;;  %v246_v13 = vsub.f32 %v22912_v62, %v26721_v4  ;;  %v22989_v36 = vsub.f32 %v22798_v14, %v102_v22 }
  0x14   :  { %20420 = vmatprep.subr.bf16.mxu0 %v22928_v2  ;;  %20564 = vmatprep.subr.bf16.mxu1 %v22928_v2  ;;  %v26715_v17 = vand.u32 4294901760, %v22968_v8  ;;  %v22984_v30 = vand.u32 4294901760, %v62_v28  ;;  %v240_v38 = vand.u32 4294901760, %v239_v7  ;;  %v253_v43 = vsub.f32 %v22946_v9, %v26720_v16 }
  0x15   :  { %17607 = vmatprep.mubr.f32.mxu1 %v991_v6  ;;  %v23000_v48 = vsub.f32 %v22951_v10, %v26719_v27  ;;  %v899_v55 = vsel %vm54_vm0, %v15781_v11, 0  ;;  %v23014_v56 = vsub.f32 %v22807_v18, %v105_v26  ;;  %v168_v0 = vand.u32 4294901760, %v22958_v23  ;;  %v52_v23 = vld [vmem:[%s26699_s1 + $0x20] sm:$0xff] }
  0x16   :  { %v23006_v14 = vsub.f32 %v22968_v8, %v26715_v17  ;;  %v23009_v22 = vsub.f32 %v62_v28, %v22984_v30  ;;  %v23016_v59 = vand.u32 4294901760, %v899_v55  ;;  %v1001_v1 = vand.u32 4294901760, %v22963_v24 }
  0x17   :  { %20422 = vmatpush3.bf16.msra.mxu0 %v22928_v2  ;;  %20566 = vmatpush3.bf16.msra.mxu1 %v22928_v2  ;;  %v26714_v5 = vand.u32 4294901760, %v22989_v36  ;;  %v65_v6 = vsel %vm54_vm0, %v51_v37, 0  ;;  %v247_v18 = vand.u32 4294901760, %v246_v13  ;;  %v254_v26 = vand.u32 4294901760, %v253_v43 }
  0x18   :  { %20424 = vmatprep.subr.bf16.mxu0 %v22934_v3  ;;  %20568 = vmatprep.subr.bf16.mxu1 %v22934_v3  ;;  %v26711_v7 = vand.u32 4294901760, %v23009_v22  ;;  %v23031_v11 = vsub.f32 %v899_v55, %v23016_v59  ;;  %v23036_v24 = vpack.c.bf16 %v240_v38, %v233_v12  ;;  %v261_v28 = vand.u32 4294901760, %v23000_v48 }
  0x19   :  { %v23039_v37 = vand.u32 4294901760, %v65_v6  ;;  %v902_v61 = vsel %vm54_vm0, %v15782_v63, 0  ;;  %v268_v13 = vand.u32 4294901760, %v23006_v14  ;;  %v26717_v55 = vand.u32 4294901760, %v23014_v56  ;;  %v15783_v63 = vld [vmem:[%s26699_s1 + $0x50] sm:$0xff] }
  0x1a   :  { %26791 = vst [vmem:[#allocation6_spill] sm:$0xff] %v23036_v24  ;;  %v177_v43 = vsub.f32 %v23009_v22, %v26711_v7  ;;  %v26716_v60 = vand.u32 4294901760, %v23031_v11  ;;  %v274_v12 = vsub.f32 %v22989_v36, %v26714_v5  ;;  %v23056_v48 = vand.u32 4294901760, %v902_v61 }
  0x1b   :  { %20426 = vmatpush3.bf16.msra.mxu0 %v22934_v3  ;;  %20570 = vmatpush3.bf16.msra.mxu1 %v22934_v3  ;;  %v23054_v38 = vsub.f32 %v65_v6, %v23039_v37  ;;  %v68_v14 = vsel %vm54_vm0, %v52_v23, 0  ;;  %v23064_v7 = vpack.c.bf16 %v254_v26, %v247_v18  ;;  %v23074_v23 = vsub.f32 %v22812_v19, %v108_v32  ;;  %v53_v26 = vld [vmem:[%s26699_s1 + $0x28] sm:$0xf]  ;;  %v15784_v19 = vld [vmem:[%s26699_s1 + $0x58] sm:$0xf] }
  0x1c   :  { %20428 = vmatprep.subr.bf16.mxu0 %v22953_v20  ;;  %20572 = vmatprep.subr.bf16.mxu1 %v22953_v20  ;;  %v1010_v57 = vsub.f32 %v23031_v11, %v26716_v60  ;;  %v23069_v6 = vand.u32 4294901760, %v68_v14  ;;  %v178_v47 = vand.u32 4294901760, %v177_v43  ;;  %v23078_v17 = vsub.f32 %v902_v61, %v23056_v48 }
  0x1d   :  { %26792 = vst [vmem:[#allocation7_spill] sm:$0xff] %v23064_v7  ;;  %v26718_v5 = vand.u32 4294901760, %v23054_v38  ;;  %v23083_v18 = vsub.f32 %v22864_v39, %v111_v51  ;;  %v281_v32 = vsub.f32 %v23014_v56, %v26717_v55  ;;  %v905_v39 = vsel %vm54_vm0, %v15783_v63, 0 }
  0x1e   :  { %17410 = vmatmul.mubr.f32.vlgmr.msra.gmra.mrb[0].mxu0 %v168_v0  ;;  %17608 = vmatmul.mubr.f32.vlgmr.msra.gmra.mrb[0].mxu1 %v1001_v1  ;;  %v1011_v61 = vand.u32 4294901760, %v1010_v57  ;;  %v23095_v43 = vsub.f32 %v68_v14, %v23069_v6  ;;  %v26727_v0 = vand.u32 4294901760, %v23078_v17  ;;  %v287_v1 = vand.u32 4294901760, %v23074_v23 }
  0x1f   :  { %20430 = vmatpush3.bf16.msra.mxu0 %v22953_v20  ;;  %20574 = vmatpush3.bf16.msra.mxu1 %v22953_v20  ;;  %v187_v51 = vsub.f32 %v23054_v38, %v26718_v5  ;;  %v23105_v60 = vand.u32 4294901760, %v905_v39  ;;  %v294_v14 = vand.u32 4294901760, %v23083_v18  ;;  %v71_v63 = vsel %vm54_vm0, %v53_v26, 0 }
  0x20   :  { %20432 = vmatprep.subr.bf16.mxu0 %v23036_v24  ;;  %20576 = vmatprep.subr.bf16.mxu1 %v23036_v24  ;;  %v26725_v57 = vand.u32 4294901760, %v23095_v43  ;;  %v908_v55 = vsel %vm54_vm0, %v15784_v19, 0  ;;  %v275_v5 = vand.u32 4294901760, %v274_v12  ;;  %v1020_v16 = vsub.f32 %v23078_v17, %v26727_v0 }
  0x21   :  { %17412 = vmatprep.mubr.f32.mxu0 %v178_v47  ;;  %17610 = vmatprep.mubr.f32.mxu1 %v1011_v61  ;;  %v188_v27 = vand.u32 4294901760, %v187_v51  ;;  %v23117_v4 = vsub.f32 %v905_v39, %v23105_v60  ;;  %v282_v58 = vand.u32 4294901760, %v281_v32  ;;  %v23122_v41 = vand.u32 4294901760, %v71_v63 }
  0x22   :  { %v197_v54 = vsub.f32 %v23095_v43, %v26725_v57  ;;  %v23124_v26 = vand.u32 4294901760, %v908_v55  ;;  %v23128_v47 = vpack.c.bf16 %v268_v13, %v261_v28  ;;  %v1021_v12 = vand.u32 4294901760, %v1020_v16 }
  0x23   :  { %20434 = vmatpush3.bf16.msra.mxu0 %v23036_v24  ;;  %20578 = vmatpush3.bf16.msra.mxu1 %v23036_v24  ;;  %v288_v19 = vsub.f32 %v23074_v23, %v287_v1  ;;  %v26726_v61 = vand.u32 4294901760, %v23117_v4  ;;  %v295_v39 = vsub.f32 %v23083_v18, %v294_v14  ;;  %v23136_v51 = vsub.f32 %v71_v63, %v23122_v41 }
  0x24   :  { %20436 = vmatprep.subr.bf16.mxu0 %v23064_v7  ;;  %20580 = vmatprep.subr.bf16.mxu1 %v23064_v7  ;;  %v198_v32 = vand.u32 4294901760, %v197_v54  ;;  %v23139_v57 = vsub.f32 %v908_v55, %v23124_v26  ;;  %v23144_v28 = vpack.c.bf16 %v282_v58, %v275_v5  ;;  %v26794_v58 = vand.u32 4294901760, %v22879_v46 }
  0x25   :  { %17413 = vmatmul.mubr.f32.gmra.mrb[2].mxu0 %v188_v27  ;;  %17611 = vmatmul.mubr.f32.gmra.mrb[2].mxu1 %v1021_v12  ;;  %v1030_v16 = vsub.f32 %v23117_v4, %v26726_v61  ;;  %v26730_v13 = vand.u32 4294901760, %v23136_v51  ;;  %v289_v63 = vand.u32 4294901760, %v288_v19  ;;  %v26793_v27 = vand.u32 4294901760, %v22855_v34 }
  0x26   :  { %17415 = vmatprep.mubr.f32.mxu0 %v198_v32  ;;  %v26733_v54 = vand.u32 4294901760, %v23139_v57  ;;  %v26795_v5 = vand.u32 4294901760, %v22890_v50  ;;  %v296_v61 = vand.u32 4294901760, %v295_v39  ;;  %vm1738_vm2 = vcmask 1045504  }
  0x27   :  { %20438 = vmatpush3.bf16.msra.mxu0 %v23064_v7  ;;  %20582 = vmatpush3.bf16.msra.mxu1 %v23064_v7  ;;  %v1031_v55 = vand.u32 4294901760, %v1030_v16  ;;  %v23154_v12 = vpack.c.bf16 %v26793_v27, %v217_v35  ;;  %v207_v19 = vsub.f32 %v23136_v51, %v26730_v13  ;;  %v26797_v16 = vand.u32 4294901760, %v22912_v62 }
  0x28   :  { %v23160_v32 = vpack.c.bf16 %v26795_v5, %v26794_v58  ;;  %20440 = vmatprep.subr.bf16.mxu0 %v23128_v47  ;;  %20584 = vmatprep.subr.bf16.mxu1 %v23128_v47  ;;  %v1040_v35 = vsub.f32 %v23139_v57, %v26733_v54  ;;  %v26798_v27 = vand.u32 4294901760, %v22946_v9  ;;  %v26799_v58 = vand.u32 4294901760, %v22951_v10 }
  0x29   :  { %17613 = vmatprep.mubr.f32.mxu1 %v1031_v55  ;;  %v26800_v5 = vand.u32 4294901760, %v22968_v8  ;;  %v26801_v7 = vand.u32 4294901760, %v22989_v36  ;;  %v26802_v13 = vand.u32 4294901760, %v23014_v56  ;;  %v23188_v54 = vpack.c.bf16 %v294_v14, %v287_v1 }
  0x2a   :  { %26796 = vst [vmem:[#allocation8_spill] sm:$0xff] %v23160_v32  ;;  %v23174_v0 = vpack.c.bf16 %v26798_v27, %v26797_v16  ;;  %v208_v20 = vand.u32 4294901760, %v207_v19  ;;  %v1041_v32 = vand.u32 4294901760, %v1040_v35  ;;  %v23194_v55 = vpack.c.bf16 %v296_v61, %v289_v63 }
  0x2b   :  { %v23180_v39 = vpack.c.bf16 %v26800_v5, %v26799_v58  ;;  %v23186_v24 = vpack.c.bf16 %v26802_v13, %v26801_v7  ;;  %20442 = vmatpush3.bf16.msra.mxu0 %v23128_v47  ;;  %20586 = vmatpush3.bf16.msra.mxu1 %v23128_v47  ;;  %v23204_v7 = vpack.c.bf16 %v22855_v34, %v22839_v29  ;;  %vm1719_vm3 = vcmask 244736  }
  0x2c   :  { %20444 = vmatprep.subr.bf16.mxu0 %v23144_v28  ;;  %20588 = vmatprep.subr.bf16.mxu1 %v23144_v28  ;;  %v23222_v29 = vpack.c.bf16 %v22946_v9, %v22912_v62  ;;  %v23234_v34 = vpack.c.bf16 %v22968_v8, %v22951_v10  ;;  %v26803_v62 = vand.u32 4294901760, %v22867_v40  ;;  %v26804_v9 = vand.u32 4294901760, %v22888_v49 }
  0x2d   :  { %17416 = vmatmul.mubr.f32.gmra.mrb[4].mxu0 %v208_v20  ;;  %17614 = vmatmul.mubr.f32.gmra.mrb[4].mxu1 %v1041_v32  ;;  %v23212_v20 = vpack.c.bf16 %v22890_v50, %v22879_v46  ;;  %v23246_v46 = vpack.c.bf16 %v23014_v56, %v22989_v36  ;;  %v23256_v50 = vpack.c.bf16 %v23083_v18, %v23074_v23  ;;  %v26808_v8 = vand.u32 4294901760, %v23009_v22 }
  0x2e   :  { %17442 = vmatprep.mubr.f32.mxu0 %v22853_v33  ;;  %17640 = vmatprep.mubr.f32.mxu1 %v22870_v42  ;;  %v26809_v36 = vand.u32 4294901760, %v23031_v11  ;;  %v26813_v56 = vand.u32 4294901760, %v23117_v4  ;;  %vm22701_vm4 = vmmov 0   ;;  %vm4744_vm5 = vcmask 359424  }
  0x2f   :  { %20446 = vmatpush3.bf16.msra.mxu0 %v23144_v28  ;;  %20590 = vmatpush3.bf16.msra.mxu1 %v23144_v28  ;;  %vm4754_vm6 = vcmask 1043456   ;;  %vm5994_vm7 = vcmask 916480   ;;  %vm8785_vm8 = vcmask 392192   ;;  %vm10497_vm9 = vcmask 261120  }
  0x30   :  { %20448 = vmatprep.subr.bf16.mxu0 %v23194_v55  ;;  %20592 = vmatprep.subr.bf16.mxu1 %v23194_v55  ;;  %vm15753_vm10 = vcmask 58368  }
  0x31   :  { %v26807_v10 = vld [vmem:[#allocation8_spill] sm:$0xff] }
  0x33   :  { %20450 = vmatpush3.bf16.msra.mxu0 %v23194_v55  ;;  %20594 = vmatpush3.bf16.msra.mxu1 %v23194_v55 }
  0x34   :  { %20452 = vmatprep.subr.bf16.mxu0 %v23204_v7  ;;  %20596 = vmatprep.subr.bf16.mxu1 %v23204_v7 }
  0x36   :  { %17443 = vmatmul.mubr.f32.vlgmr.msra.gmra.mrb[0].mxu0 %v22875_v44  ;;  %17641 = vmatmul.mubr.f32.vlgmr.msra.gmra.mrb[0].mxu1 %v22877_v45 }
  0x37   :  { %20454 = vmatpush3.bf16.msra.mxu0 %v23204_v7  ;;  %20598 = vmatpush3.bf16.msra.mxu1 %v23204_v7 }
  0x38   :  { %20456 = vmatprep.subr.bf16.mxu0 %v23212_v20  ;;  %20600 = vmatprep.subr.bf16.mxu1 %v23212_v20 }
  0x39   :  { %17445 = vmatprep.mubr.f32.mxu0 %v22984_v30  ;;  %17643 = vmatprep.mubr.f32.mxu1 %v23016_v59 }
  0x3a   :  { %17446 = vmatmul.mubr.f32.gmra.mrb[2].mxu0 %v23039_v37  ;;  %17644 = vmatmul.mubr.f32.gmra.mrb[2].mxu1 %v23056_v48 }
  0x3b   :  { %20458 = vmatpush3.bf16.msra.mxu0 %v23212_v20  ;;  %20602 = vmatpush3.bf16.msra.mxu1 %v23212_v20 }
  0x3c   :  { %20460 = vmatprep.subr.bf16.mxu0 %v23222_v29  ;;  %20604 = vmatprep.subr.bf16.mxu1 %v23222_v29 }
  0x3d   :  { %17448 = vmatprep.mubr.f32.mxu0 %v23069_v6  ;;  %17646 = vmatprep.mubr.f32.mxu1 %v23105_v60 }
  0x3e   :  { %17449 = vmatmul.mubr.f32.gmra.mrb[4].mxu0 %v23122_v41  ;;  %17647 = vmatmul.mubr.f32.gmra.mrb[4].mxu1 %v23124_v26 }
  0x3f   :  { %20462 = vmatpush3.bf16.msra.mxu0 %v23222_v29  ;;  %20606 = vmatpush3.bf16.msra.mxu1 %v23222_v29 }
  0x40   :  { %20464 = vmatprep.subr.bf16.mxu0 %v23234_v34  ;;  %20608 = vmatprep.subr.bf16.mxu1 %v23234_v34 }
  0x41   :  { %17475 = vmatprep.mubr.f32.mxu0 %v22867_v40  ;;  %17673 = vmatprep.mubr.f32.mxu1 %v22888_v49  ;;  %v26805_v40 = vand.u32 4294901760, %v22896_v52  ;;  %v26806_v49 = vand.u32 4294901760, %v22899_v53 }
  0x43   :  { %20466 = vmatpush3.bf16.msra.mxu0 %v23234_v34  ;;  %20610 = vmatpush3.bf16.msra.mxu1 %v23234_v34 }
  0x44   :  { %20468 = vmatprep.subr.bf16.mxu0 %v23246_v46  ;;  %20612 = vmatprep.subr.bf16.mxu1 %v23246_v46 }
  0x47   :  { %20470 = vmatpush3.bf16.msra.mxu0 %v23246_v46  ;;  %20614 = vmatpush3.bf16.msra.mxu1 %v23246_v46 }
  0x48   :  { %20472 = vmatprep.subr.bf16.mxu0 %v23256_v50  ;;  %20616 = vmatprep.subr.bf16.mxu1 %v23256_v50 }
  0x4b   :  { %20474 = vmatpush3.bf16.msra.mxu0 %v23256_v50  ;;  %20618 = vmatpush3.bf16.msra.mxu1 %v23256_v50 }
  0x4c   :  { %20476 = vmatprep.subr.bf16.mxu0 %v22800_v15  ;;  %20620 = vmatprep.subr.bf16.mxu1 %v22800_v15 }
  0x4e   :  { %17476 = vmatmul.mubr.f32.vlgmr.msra.gmra.mrb[0].mxu0 %v22896_v52  ;;  %17674 = vmatmul.mubr.f32.vlgmr.msra.gmra.mrb[0].mxu1 %v22899_v53  ;;  %v26810_v52 = vand.u32 4294901760, %v23054_v38  ;;  %v26811_v53 = vand.u32 4294901760, %v23078_v17 }
  0x4f   :  { %20478 = vmatpush3.bf16.msra.mxu0 %v22800_v15  ;;  %20622 = vmatpush3.bf16.msra.mxu1 %v22800_v15 }
  0x50   :  { %20480 = vmatprep.subr.bf16.mxu0 %v22817_v21  ;;  %20624 = vmatprep.subr.bf16.mxu1 %v22817_v21 }
  0x51   :  { %17478 = vmatprep.mubr.f32.mxu0 %v23009_v22  ;;  %17676 = vmatprep.mubr.f32.mxu1 %v23031_v11  ;;  %v26812_v22 = vand.u32 4294901760, %v23095_v43  ;;  %v26814_v11 = vand.u32 4294901760, %v23136_v51 }
  0x52   :  { %17479 = vmatmul.mubr.f32.gmra.mrb[2].mxu0 %v23054_v38  ;;  %17677 = vmatmul.mubr.f32.gmra.mrb[2].mxu1 %v23078_v17  ;;  %v26815_v17 = vand.u32 4294901760, %v23139_v57 }
  0x53   :  { %20482 = vmatpush3.bf16.msra.mxu0 %v22817_v21  ;;  %20626 = vmatpush3.bf16.msra.mxu1 %v22817_v21 }
  0x54   :  { %20484 = vmatprep.subr.bf16.mxu0 %v22832_v25  ;;  %20628 = vmatprep.subr.bf16.mxu1 %v22832_v25 }
  0x55   :  { %17481 = vmatprep.mubr.f32.mxu0 %v23095_v43  ;;  %17679 = vmatprep.mubr.f32.mxu1 %v23117_v4  ;;  %v15789_v4 = vld [vmem:[%s26699_s1 + $0x60] sm:$0xff]  ;;  %v15791_v43 = vld [vmem:[%s26699_s1 + $0x70] sm:$0xff] }
  0x56   :  { %17482 = vmatmul.mubr.f32.gmra.mrb[4].mxu0 %v23136_v51  ;;  %17680 = vmatmul.mubr.f32.gmra.mrb[4].mxu1 %v23139_v57  ;;  %v3171_v38 = vsel %vm54_vm0, %v15789_v4, 0  ;;  %v3177_v14 = vsel %vm54_vm0, %v15791_v43, 0 }
  0x57   :  { %20486 = vmatpush3.bf16.msra.mxu0 %v22832_v25  ;;  %20630 = vmatpush3.bf16.msra.mxu1 %v22832_v25  ;;  %v23380_v23 = vand.u32 4294901760, %v3171_v38  ;;  %v23424_v61 = vand.u32 4294901760, %v3177_v14 }
  0x58   :  { %20488 = vmatprep.subr.bf16.mxu0 %v22850_v31  ;;  %20632 = vmatprep.subr.bf16.mxu1 %v22850_v31 }
  0x59   :  { %17508 = vmatprep.mubr.f32.mxu0 %v26803_v62  ;;  %17706 = vmatprep.mubr.f32.mxu1 %v26804_v9  ;;  %v23387_v18 = vsub.f32 %v3171_v38, %v23380_v23  ;;  %v26818_v38 = vld [vmem:[#allocation7_spill] sm:$0xff] }
  0x5b   :  { %20490 = vmatpush3.bf16.msra.mxu0 %v22850_v31  ;;  %20634 = vmatpush3.bf16.msra.mxu1 %v22850_v31 }
  0x5c   :  { %20492 = vmatprep.subr.bf16.mxu0 %v22928_v2  ;;  %20636 = vmatprep.subr.bf16.mxu1 %v22928_v2 }
  0x5f   :  { %20494 = vmatpush3.bf16.msra.mxu0 %v22928_v2  ;;  %20638 = vmatpush3.bf16.msra.mxu1 %v22928_v2 }
  0x60   :  { %20496 = vmatprep.subr.bf16.mxu0 %v22934_v3  ;;  %20640 = vmatprep.subr.bf16.mxu1 %v22934_v3 }
  0x63   :  { %20498 = vmatpush3.bf16.msra.mxu0 %v22934_v3  ;;  %20642 = vmatpush3.bf16.msra.mxu1 %v22934_v3 }
  0x64   :  { %20500 = vmatprep.subr.bf16.mxu0 %v23154_v12  ;;  %20644 = vmatprep.subr.bf16.mxu1 %v23154_v12 }
  0x66   :  { %17509 = vmatmul.mubr.f32.vlgmr.msra.gmra.mrb[0].mxu0 %v26805_v40  ;;  %17707 = vmatmul.mubr.f32.vlgmr.msra.gmra.mrb[0].mxu1 %v26806_v49 }
  0x67   :  { %20502 = vmatpush3.bf16.msra.mxu0 %v23154_v12  ;;  %20646 = vmatpush3.bf16.msra.mxu1 %v23154_v12 }
  0x68   :  { %20504 = vmatprep.subr.bf16.mxu0 %v26807_v10  ;;  %20648 = vmatprep.subr.bf16.mxu1 %v26807_v10 }
  0x69   :  { %17511 = vmatprep.mubr.f32.mxu0 %v26808_v8  ;;  %17709 = vmatprep.mubr.f32.mxu1 %v26809_v36 }
  0x6a   :  { %17512 = vmatmul.mubr.f32.gmra.mrb[2].mxu0 %v26810_v52  ;;  %17710 = vmatmul.mubr.f32.gmra.mrb[2].mxu1 %v26811_v53  ;;  %v26816_v53 = vld [vmem:[#allocation5_spill] sm:$0xff] }
  0x6b   :  { %20506 = vmatpush3.bf16.msra.mxu0 %v26807_v10  ;;  %20650 = vmatpush3.bf16.msra.mxu1 %v26807_v10 }
  0x6c   :  { %20508 = vmatprep.subr.bf16.mxu0 %v23174_v0  ;;  %20652 = vmatprep.subr.bf16.mxu1 %v23174_v0 }
  0x6d   :  { %17514 = vmatprep.mubr.f32.mxu0 %v26812_v22  ;;  %17712 = vmatprep.mubr.f32.mxu1 %v26813_v56 }
  0x6e   :  { %17515 = vmatmul.mubr.f32.gmra.mrb[4].mxu0 %v26814_v11  ;;  %17713 = vmatmul.mubr.f32.gmra.mrb[4].mxu1 %v26815_v17  ;;  %v26817_v17 = vld [vmem:[#allocation6_spill] sm:$0xff] }
  0x6f   :  { %20510 = vmatpush3.bf16.msra.mxu0 %v23174_v0  ;;  %20654 = vmatpush3.bf16.msra.mxu1 %v23174_v0 }
  0x70   :  { %20512 = vmatprep.subr.bf16.mxu0 %v23180_v39  ;;  %20656 = vmatprep.subr.bf16.mxu1 %v23180_v39 }
  0x71   :  { %17541 = vmatprep.mubr.f32.mxu0 %v22853_v33  ;;  %17739 = vmatprep.mubr.f32.mxu1 %v22870_v42 }
  0x73   :  { %20514 = vmatpush3.bf16.msra.mxu0 %v23180_v39  ;;  %20658 = vmatpush3.bf16.msra.mxu1 %v23180_v39 }
  0x74   :  { %20516 = vmatprep.subr.bf16.mxu0 %v23186_v24  ;;  %20660 = vmatprep.subr.bf16.mxu1 %v23186_v24 }
  0x77   :  { %20518 = vmatpush3.bf16.msra.mxu0 %v23186_v24  ;;  %20662 = vmatpush3.bf16.msra.mxu1 %v23186_v24 }
  0x78   :  { %20520 = vmatprep.subr.bf16.mxu0 %v23188_v54  ;;  %20664 = vmatprep.subr.bf16.mxu1 %v23188_v54 }
  0x7b   :  { %20522 = vmatpush3.bf16.msra.mxu0 %v23188_v54  ;;  %20666 = vmatpush3.bf16.msra.mxu1 %v23188_v54 }
  0x7c   :  { %20524 = vmatprep.subr.bf16.mxu0 %v22800_v15  ;;  %20668 = vmatprep.subr.bf16.mxu1 %v22800_v15 }
  0x7e   :  { %17542 = vmatmul.mubr.f32.vlgmr.msra.gmra.mrb[0].mxu0 %v22875_v44  ;;  %17740 = vmatmul.mubr.f32.vlgmr.msra.gmra.mrb[0].mxu1 %v22877_v45 }
  0x7f   :  { %20526 = vmatpush3.bf16.msra.mxu0 %v22800_v15  ;;  %20670 = vmatpush3.bf16.msra.mxu1 %v22800_v15 }
  0x80   :  { %20528 = vmatprep.subr.bf16.mxu0 %v22817_v21  ;;  %20672 = vmatprep.subr.bf16.mxu1 %v22817_v21 }
  0x81   :  { %17544 = vmatprep.mubr.f32.mxu0 %v22984_v30  ;;  %17742 = vmatprep.mubr.f32.mxu1 %v23016_v59 }
  0x82   :  { %17545 = vmatmul.mubr.f32.gmra.mrb[2].mxu0 %v23039_v37  ;;  %17743 = vmatmul.mubr.f32.gmra.mrb[2].mxu1 %v23056_v48 }
  0x83   :  { %20530 = vmatpush3.bf16.msra.mxu0 %v22817_v21  ;;  %20674 = vmatpush3.bf16.msra.mxu1 %v22817_v21 }
  0x84   :  { %20532 = vmatprep.subr.bf16.mxu0 %v22832_v25  ;;  %20676 = vmatprep.subr.bf16.mxu1 %v22832_v25 }
  0x85   :  { %17547 = vmatprep.mubr.f32.mxu0 %v23069_v6  ;;  %17745 = vmatprep.mubr.f32.mxu1 %v23105_v60 }
  0x86   :  { %17548 = vmatmul.mubr.f32.gmra.mrb[4].mxu0 %v23122_v41  ;;  %17746 = vmatmul.mubr.f32.gmra.mrb[4].mxu1 %v23124_v26 }
  0x87   :  { %20534 = vmatpush3.bf16.msra.mxu0 %v22832_v25  ;;  %20678 = vmatpush3.bf16.msra.mxu1 %v22832_v25 }
  0x88   :  { %20536 = vmatprep.subr.bf16.mxu0 %v22850_v31  ;;  %20680 = vmatprep.subr.bf16.mxu1 %v22850_v31 }
  0x89   :  { %17574 = vmatprep.mubr.f32.mxu0 %v22853_v33  ;;  %17772 = vmatprep.mubr.f32.mxu1 %v22870_v42  ;;  %v3267_v33 = vand.u32 4294901760, %v23387_v18  ;;  %v15790_v42 = vld [vmem:[%s26699_s1 + $0x68] sm:$0xff] }
  0x8a   :  { %v3174_v57 = vsel %vm54_vm0, %v15790_v42, 0 }
  0x8b   :  { %20538 = vmatpush3.bf16.msra.mxu0 %v22850_v31  ;;  %20682 = vmatpush3.bf16.msra.mxu1 %v22850_v31  ;;  %v3268_v1 = vsub.f32 %v23387_v18, %v3267_v33 }
  0x8c   :  { %20540 = vmatprep.subr.bf16.mxu0 %v22928_v2  ;;  %20684 = vmatprep.subr.bf16.mxu1 %v22928_v2 }
  0x8f   :  { %20542 = vmatpush3.bf16.msra.mxu0 %v22928_v2  ;;  %20686 = vmatpush3.bf16.msra.mxu1 %v22928_v2 }
  0x90   :  { %20544 = vmatprep.subr.bf16.mxu0 %v22934_v3  ;;  %20688 = vmatprep.subr.bf16.mxu1 %v22934_v3 }
  0x93   :  { %20546 = vmatpush3.bf16.msra.mxu0 %v22934_v3  ;;  %20690 = vmatpush3.bf16.msra.mxu1 %v22934_v3 }
  0x94   :  { %20788 = vmatprep.subr.bf16.mxu1 %v22800_v15 }
  0x96   :  { %17575 = vmatmul.mubr.f32.vlgmr.msra.gmra.mrb[0].mxu0 %v22875_v44  ;;  %17773 = vmatmul.mubr.f32.vlgmr.msra.gmra.mrb[0].mxu1 %v22877_v45  ;;  %v15792_v44 = vld [vmem:[%s26699_s1 + $0x78] sm:$0xff]  ;;  %v15793_v45 = vld [vmem:[%s26699_s1 + $0x80] sm:$0xff] }
  0x97   :  { %20790 = vmatpush3.bf16.msra.mxu1 %v22800_v15  ;;  %17577 = vmatprep.mubr.f32.mxu0 %v22984_v30  ;;  %v23420_v30 = vand.u32 4294901760, %v3174_v57  ;;  %v3180_v51 = vsel %vm54_vm0, %v15792_v44, 0  ;;  %v3183_v13 = vsel %vm54_vm0, %v15793_v45, 0 }
  0x98   :  { %17775 = vmatprep.mubr.f32.mxu1 %v23016_v59  ;;  %20792 = vmatprep.subr.bf16.mxu1 %v22817_v21  ;;  %v3269_v59 = vand.u32 4294901760, %v3268_v1  ;;  %v23444_v63 = vand.u32 4294901760, %v3183_v13 }
  0x9a   :  { %17578 = vmatmul.mubr.f32.gmra.mrb[2].mxu0 %v23039_v37  ;;  %17776 = vmatmul.mubr.f32.gmra.mrb[2].mxu1 %v23056_v48  ;;  %v15794_v37 = vld [vmem:[%s26699_s1 + $0x88] sm:$0xf]  ;;  %v23436_v48 = vsub.f32 %v3174_v57, %v23420_v30  ;;  %v23457_v16 = vsub.f32 %v3183_v13, %v23444_v63 }
  0x9b   :  { %20794 = vmatpush3.bf16.msra.mxu1 %v22817_v21  ;;  %17580 = vmatprep.mubr.f32.mxu0 %v23069_v6  ;;  %v23438_v6 = vand.u32 4294901760, %v3180_v51  ;;  %v3186_v32 = vsel %vm54_vm0, %v15794_v37, 0 }
  0x9c   :  { %17778 = vmatprep.mubr.f32.mxu1 %v23105_v60  ;;  %20796 = vmatprep.subr.bf16.mxu1 %v22832_v25  ;;  %v23442_v60 = vsub.f32 %v3177_v14, %v23424_v61  ;;  %v23452_v19 = vand.u32 4294901760, %v3186_v32  ;;  %v3307_v9 = vand.u32 4294901760, %v23457_v16 }
  0x9e   :  { %17581 = vmatmul.mubr.f32.gmra.mrb[4].mxu0 %v23122_v41  ;;  %17779 = vmatmul.mubr.f32.gmra.mrb[4].mxu1 %v23124_v26  ;;  %v3277_v41 = vand.u32 4294901760, %v23436_v48  ;;  %v23450_v26 = vsub.f32 %v3180_v51, %v23438_v6  ;;  %v3287_v35 = vand.u32 4294901760, %v23442_v60  ;;  %v23465_v5 = vsub.f32 %v3186_v32, %v23452_v19 }
  0x9f   :  { %20798 = vmatpush3.bf16.msra.mxu1 %v22832_v25  ;;  %18009 = vmatprep.mubr.f32.mxu1 %v3269_v59  ;;  %v3308_v52 = vsub.f32 %v23457_v16, %v3307_v9 }
  0xa0   :  { %20800 = vmatprep.subr.bf16.mxu1 %v22850_v31  ;;  %v3278_v27 = vsub.f32 %v23436_v48, %v3277_v41  ;;  %v3297_v58 = vand.u32 4294901760, %v23450_v26  ;;  %v3288_v62 = vsub.f32 %v23442_v60, %v3287_v35  ;;  %v3317_v8 = vand.u32 4294901760, %v23465_v5 }
  0xa1   :  { %v3309_v11 = vand.u32 4294901760, %v3308_v52 }
  0xa2   :  { %v3279_v40 = vand.u32 4294901760, %v3278_v27  ;;  %v3298_v49 = vsub.f32 %v23450_v26, %v3297_v58  ;;  %v3289_v36 = vand.u32 4294901760, %v3288_v62  ;;  %v3318_v56 = vsub.f32 %v23465_v5, %v3317_v8 }
  0xa3   :  { %20802 = vmatpush3.bf16.msra.mxu1 %v22850_v31 }
  0xa4   :  { %20804 = vmatprep.subr.bf16.mxu1 %v22928_v2  ;;  %v3299_v22 = vand.u32 4294901760, %v3298_v49  ;;  %v3319_v4 = vand.u32 4294901760, %v3318_v56 }
  0xa7   :  { %20806 = vmatpush3.bf16.msra.mxu1 %v22928_v2 }
  0xa8   :  { %20808 = vmatprep.subr.bf16.mxu1 %v22934_v3 }
  0xab   :  { %20810 = vmatpush3.bf16.msra.mxu1 %v22934_v3 }
  0xac   :  { %20812 = vmatprep.subr.bf16.mxu1 %v26816_v53 }
  0xae   :  { %18010 = vmatmul.mubr.f32.vlgmr.msra.gmra.mrb[6].mxu1 %v3279_v40 }
  0xaf   :  { %20814 = vmatpush3.bf16.msra.mxu1 %v26816_v53  ;;  %18012 = vmatprep.mubr.f32.mxu1 %v3289_v36 }
  0xb0   :  { %20816 = vmatprep.subr.bf16.mxu1 %v26817_v17 }
  0xb2   :  { %18013 = vmatmul.mubr.f32.gmra.mrb[8].mxu1 %v3299_v22 }
  0xb3   :  { %20818 = vmatpush3.bf16.msra.mxu1 %v26817_v17  ;;  %18015 = vmatprep.mubr.f32.mxu1 %v3309_v11 }
  0xb4   :  { %20820 = vmatprep.subr.bf16.mxu1 %v26818_v38 }
  0xb6   :  { %18016 = vmatmul.mubr.f32.gmra.mrb[10].mxu1 %v3319_v4 }
  0xb7   :  { %20822 = vmatpush3.bf16.msra.mxu1 %v26818_v38  ;;  %18042 = vmatprep.mubr.f32.mxu1 %v23380_v23 }
  0xb8   :  { %20824 = vmatprep.subr.bf16.mxu1 %v23128_v47 }
  0xbb   :  { %20826 = vmatpush3.bf16.msra.mxu1 %v23128_v47  ;;  %v15785_v47 = vld [vmem:[%s26701_s3 + $0x20] sm:$0xff] }
  0xbc   :  { %20828 = vmatprep.subr.bf16.mxu1 %v23144_v28 }
  0xbf   :  { %20830 = vmatpush3.bf16.msra.mxu1 %v23144_v28  ;;  %v15786_v28 = vld [vmem:[%s26701_s3 + $0x28] sm:$0xff] }
  0xc0   :  { %20832 = vmatprep.subr.bf16.mxu1 %v23194_v55 }
  0xc3   :  { %20834 = vmatpush3.bf16.msra.mxu1 %v23194_v55  ;;  %v1743_v55 = vand.u32 4294901760, %v15785_v47 }
  0xc4   :  { %20836 = vmatprep.subr.bf16.mxu1 %v23204_v7 }
  0xc5   :  { %v1873_v42 = vsub.f32 %v15785_v47, %v1743_v55 }
  0xc6   :  { %18043 = vmatmul.mubr.f32.vlgmr.msra.gmra.mrb[6].mxu1 %v23420_v30 }
  0xc7   :  { %20838 = vmatpush3.bf16.msra.mxu1 %v23204_v7  ;;  %18045 = vmatprep.mubr.f32.mxu1 %v23424_v61  ;;  %v1746_v7 = vand.u32 4294901760, %v15786_v28  ;;  %v1874_v1 = vand.u32 4294901760, %v1873_v42 }
  0xc8   :  { %20840 = vmatprep.subr.bf16.mxu1 %v23212_v20 }
  0xc9   :  { %v1880_v43 = vsub.f32 %v15786_v28, %v1746_v7  ;;  %v1875_v14 = vsub.f32 %v1873_v42, %v1874_v1 }
  0xca   :  { %18046 = vmatmul.mubr.f32.gmra.mrb[8].mxu1 %v23438_v6 }
  0xcb   :  { %20842 = vmatpush3.bf16.msra.mxu1 %v23212_v20  ;;  %18048 = vmatprep.mubr.f32.mxu1 %v23444_v63  ;;  %v23537_v20 = vpack.c.bf16 %v1746_v7, %v1743_v55  ;;  %v1881_v57 = vand.u32 4294901760, %v1880_v43  ;;  %v1876_v51 = vand.u32 4294901760, %v1875_v14 }
  0xcc   :  { %20844 = vmatprep.subr.bf16.mxu1 %v23222_v29 }
  0xcd   :  { %20692 = vmatprep.subr.bf16.mxu0 %v23537_v20  ;;  %v1882_v44 = vsub.f32 %v1880_v43, %v1881_v57 }
  0xce   :  { %18049 = vmatmul.mubr.f32.gmra.mrb[10].mxu1 %v23452_v19  ;;  %20694 = vmatpush3.bf16.msra.mxu0 %v23537_v20 }
  0xcf   :  { %20846 = vmatpush3.bf16.msra.mxu1 %v23222_v29  ;;  %18075 = vmatprep.mubr.f32.mxu1 %v23387_v18  ;;  %v15788_v29 = vld [vmem:[%s26701_s3 + $0x38] sm:$0x3f]  ;;  %v1883_v13 = vand.u32 4294901760, %v1882_v44 }
  0xd0   :  { %20848 = vmatprep.subr.bf16.mxu1 %v23234_v34 }
  0xd3   :  { %20850 = vmatpush3.bf16.msra.mxu1 %v23234_v34  ;;  %v15787_v34 = vld [vmem:[%s26701_s3 + $0x30] sm:$0xff] }
  0xd4   :  { %20852 = vmatprep.subr.bf16.mxu1 %v23246_v46 }
  0xd7   :  { %20854 = vmatpush3.bf16.msra.mxu1 %v23246_v46  ;;  %v1740_v46 = vsel %vm1738_vm2, %v15788_v29, 0 }
  0xd8   :  { %20856 = vmatprep.subr.bf16.mxu1 %v23256_v50  ;;  %v1752_v18 = vand.u32 4294901760, %v1740_v46 }
  0xda   :  { %v1894_v59 = vsub.f32 %v1740_v46, %v1752_v18 }
  0xdb   :  { %20858 = vmatpush3.bf16.msra.mxu1 %v23256_v50  ;;  %v1749_v50 = vand.u32 4294901760, %v15787_v34 }
  0xdc   :  { %20860 = vmatprep.subr.bf16.mxu1 %v22800_v15 }
  0xdd   :  { %v1887_v45 = vsub.f32 %v15787_v34, %v1749_v50 }
  0xde   :  { %18076 = vmatmul.mubr.f32.vlgmr.msra.gmra.mrb[6].mxu1 %v23436_v48  ;;  %v1895_v48 = vand.u32 4294901760, %v1894_v59 }
  0xdf   :  { %20862 = vmatpush3.bf16.msra.mxu1 %v22800_v15  ;;  %18078 = vmatprep.mubr.f32.mxu1 %v23442_v60  ;;  %v1888_v37 = vand.u32 4294901760, %v1887_v45 }
  0xe0   :  { %20864 = vmatprep.subr.bf16.mxu1 %v22817_v21  ;;  %v1896_v32 = vsub.f32 %v1894_v59, %v1895_v48 }
  0xe1   :  { %v1889_v60 = vsub.f32 %v1887_v45, %v1888_v37 }
  0xe2   :  { %18079 = vmatmul.mubr.f32.gmra.mrb[8].mxu1 %v23450_v26  ;;  %v1897_v26 = vand.u32 4294901760, %v1896_v32  ;;  %v884_v32 = vld [vmem:[%s26701_s3 + $0x18] sm:$0x3f] }
  0xe3   :  { %20866 = vmatpush3.bf16.msra.mxu1 %v22817_v21  ;;  %18081 = vmatprep.mubr.f32.mxu1 %v23457_v16  ;;  %v23585_v16 = vpack.c.bf16 %v1894_v59, %v1887_v45 }
  0xe4   :  { %20868 = vmatprep.subr.bf16.mxu1 %v22832_v25 }
  0xe6   :  { %18082 = vmatmul.mubr.f32.gmra.mrb[10].mxu1 %v23465_v5 }
  0xe7   :  { %20870 = vmatpush3.bf16.msra.mxu1 %v22832_v25  ;;  %18108 = vmatprep.mubr.f32.mxu1 %v3267_v33  ;;  %v23551_v33 = vpack.c.bf16 %v1752_v18, %v1749_v50 }
  0xe8   :  { %20872 = vmatprep.subr.bf16.mxu1 %v22850_v31 }
  0xe9   :  { %20696 = vmatprep.subr.bf16.mxu0 %v23551_v33 }
  0xea   :  { %20698 = vmatpush3.bf16.msra.mxu0 %v23551_v33 }
  0xeb   :  { %20874 = vmatpush3.bf16.msra.mxu1 %v22850_v31 }
  0xec   :  { %20876 = vmatprep.subr.bf16.mxu1 %v22928_v2 }
  0xef   :  { %20878 = vmatpush3.bf16.msra.mxu1 %v22928_v2 }
  0xf0   :  { %20880 = vmatprep.subr.bf16.mxu1 %v22934_v3 }
  0xf3   :  { %20882 = vmatpush3.bf16.msra.mxu1 %v22934_v3 }
  0xf4   :  { %20884 = vmatprep.subr.bf16.mxu1 %v23154_v12 }
  0xf6   :  { %18109 = vmatmul.mubr.f32.vlgmr.msra.gmra.mrb[6].mxu1 %v3277_v41  ;;  %v1890_v41 = vand.u32 4294901760, %v1889_v60 }
  0xf7   :  { %20886 = vmatpush3.bf16.msra.mxu1 %v23154_v12  ;;  %18111 = vmatprep.mubr.f32.mxu1 %v3287_v35  ;;  %v23568_v12 = vpack.c.bf16 %v1883_v13, %v1876_v51  ;;  %v23580_v35 = vpack.c.bf16 %v1880_v43, %v1873_v42  ;;  %v881_v51 = vld [vmem:[%s26701_s3] sm:$0xff]  ;;  %v882_v13 = vld [vmem:[%s26701_s3 + $0x8] sm:$0xff] }
  0xf8   :  { %20888 = vmatprep.subr.bf16.mxu1 %v26807_v10 }
  0xf9   :  { %20700 = vmatprep.subr.bf16.mxu0 %v23568_v12 }
  0xfa   :  { %18112 = vmatmul.mubr.f32.gmra.mrb[8].mxu1 %v3297_v58 }
  0xfb   :  { %20890 = vmatpush3.bf16.msra.mxu1 %v26807_v10  ;;  %18114 = vmatprep.mubr.f32.mxu1 %v3307_v9  ;;  %v23576_v10 = vpack.c.bf16 %v1897_v26, %v1890_v41  ;;  %v883_v26 = vld [vmem:[%s26701_s3 + $0x10] sm:$0xff] }
  0xfc   :  { %20892 = vmatprep.subr.bf16.mxu1 %v23174_v0 }
  0xfe   :  { %18115 = vmatmul.mubr.f32.gmra.mrb[10].mxu1 %v3317_v8 }
  0xff   :  { %20894 = vmatpush3.bf16.msra.mxu1 %v23174_v0  ;;  %18141 = vmatprep.mubr.f32.mxu1 %v23380_v23 }
 0x100   :  { %20896 = vmatprep.subr.bf16.mxu1 %v23180_v39 }
 0x103   :  { %20898 = vmatpush3.bf16.msra.mxu1 %v23180_v39 }
 0x104   :  { %20900 = vmatprep.subr.bf16.mxu1 %v23186_v24 }
 0x107   :  { %20902 = vmatpush3.bf16.msra.mxu1 %v23186_v24 }
 0x108   :  { %20904 = vmatprep.subr.bf16.mxu1 %v23188_v54 }
 0x10b   :  { %20906 = vmatpush3.bf16.msra.mxu1 %v23188_v54 }
 0x10c   :  { %20908 = vmatprep.subr.bf16.mxu1 %v22800_v15 }
 0x10e   :  { %18142 = vmatmul.mubr.f32.vlgmr.msra.gmra.mrb[6].mxu1 %v23420_v30 }
 0x10f   :  { %20910 = vmatpush3.bf16.msra.mxu1 %v22800_v15  ;;  %18144 = vmatprep.mubr.f32.mxu1 %v23424_v61  ;;  %v23602_v15 = vpack.c.bf16 %v1881_v57, %v1874_v1 }
 0x110   :  { %20912 = vmatprep.subr.bf16.mxu1 %v22817_v21 }
 0x112   :  { %18145 = vmatmul.mubr.f32.gmra.mrb[8].mxu1 %v23438_v6 }
 0x113   :  { %20914 = vmatpush3.bf16.msra.mxu1 %v22817_v21  ;;  %18147 = vmatprep.mubr.f32.mxu1 %v23444_v63  ;;  %v23607_v21 = vpack.c.bf16 %v1895_v48, %v1888_v37  ;;  %v2464_v37 = vand.u32 4294901760, %v881_v51  ;;  %v2467_v48 = vand.u32 4294901760, %v882_v13 }
 0x114   :  { %20916 = vmatprep.subr.bf16.mxu1 %v22832_v25 }
 0x115   :  { %v23696_v60 = vsub.f32 %v882_v13, %v2467_v48 }
 0x116   :  { %18148 = vmatmul.mubr.f32.gmra.mrb[10].mxu1 %v23452_v19 }
 0x117   :  { %20918 = vmatpush3.bf16.msra.mxu1 %v22832_v25  ;;  %18174 = vmatprep.mubr.f32.mxu1 %v23380_v23 }
 0x118   :  { %20920 = vmatprep.subr.bf16.mxu1 %v22850_v31 }
 0x11b   :  { %20922 = vmatpush3.bf16.msra.mxu1 %v22850_v31 }
 0x11c   :  { %20924 = vmatprep.subr.bf16.mxu1 %v22928_v2 }
 0x11f   :  { %20926 = vmatpush3.bf16.msra.mxu1 %v22928_v2 }
 0x120   :  { %20928 = vmatprep.subr.bf16.mxu1 %v22934_v3 }
 0x123   :  { %20930 = vmatpush3.bf16.msra.mxu1 %v22934_v3 }
 0x126   :  { %18175 = vmatmul.mubr.f32.vlgmr.msra.gmra.mrb[6].mxu1 %v23420_v30 }
 0x127   :  { %18177 = vmatprep.mubr.f32.mxu1 %v23424_v61 }
 0x12a   :  { %18178 = vmatmul.mubr.f32.gmra.mrb[8].mxu1 %v23438_v6 }
 0x12b   :  { %18180 = vmatprep.mubr.f32.mxu1 %v23444_v63 }
 0x12e   :  { %18181 = vmatmul.mubr.f32.gmra.mrb[10].mxu1 %v23452_v19 }
 0x169   :  { %v23614_v25 = vpop.f32.mrb[0].mxu0  ;;  %v17774_v31 = vpop.f32.mrb[0].mxu1 }
 0x16a   :  { %v1724_v2 = vsel %vm1719_vm3, %v17774_v31, 0  ;;  %v23617_v24 = vpop.f32.mrb[1].mxu0  ;;  %v1680_v3 = vpop.f32.mrb[1].mxu1 }
 0x16b   :  { %v23619_v0 = vand.u32 4294901760, %v1724_v2  ;;  %v1721_v54 = vsel %vm1719_vm3, %v1680_v3, 0  ;;  %v2443_v41 = vsel %vm1719_vm3, %v23617_v24, 0 }
 0x16c   :  { %v23622_v39 = vand.u32 4294901760, %v1721_v54  ;;  %v23717_v31 = vand.u32 4294901760, %v2443_v41 }
 0x16d   :  { %v23625_v23 = vsub.f32 %v1724_v2, %v23619_v0  ;;  %v23627_v30 = vpop.f32.mrb[2].mxu0  ;;  %v17777_v61 = vpop.f32.mrb[2].mxu1  ;;  %v2470_v2 = vand.u32 4294901760, %v883_v26 }
 0x16e   :  { %v23630_v6 = vsub.f32 %v1721_v54, %v23622_v39  ;;  %v1730_v63 = vsel %vm1719_vm3, %v17777_v61, 0  ;;  %v23633_v19 = vpop.f32.mrb[3].mxu0  ;;  %v1692_v27 = vpop.f32.mrb[3].mxu1 }
 0x16f   :  { %v23635_v58 = vand.u32 4294901760, %v1730_v63  ;;  %v1823_v5 = vand.u32 4294901760, %v23625_v23  ;;  %v1727_v62 = vsel %vm1719_vm3, %v1692_v27, 0  ;;  %v2449_v24 = vsel %vm1719_vm3, %v23633_v19, 0 }
 0x170   :  { %v1813_v9 = vand.u32 4294901760, %v23630_v6  ;;  %v23645_v36 = vand.u32 4294901760, %v1727_v62  ;;  %v23730_v54 = vsub.f32 %v883_v26, %v2470_v2 }
 0x171   :  { %v23641_v40 = vsub.f32 %v1730_v63, %v23635_v58  ;;  %v23643_v49 = vpop.f32.mrb[4].mxu0  ;;  %v17780_v8 = vpop.f32.mrb[4].mxu1  ;;  %v1824_v56 = vsub.f32 %v23625_v23, %v1823_v5  ;;  %v23742_v63 = vand.u32 4294901760, %v2449_v24 }
 0x172   :  { %v1736_v52 = vsel %vm1719_vm3, %v17780_v8, 0  ;;  %v23648_v53 = vpop.f32.mrb[5].mxu0  ;;  %v1704_v22 = vpop.f32.mrb[5].mxu1  ;;  %v1832_v17 = vsub.f32 %v1727_v62, %v23645_v36  ;;  %v1814_v47 = vsub.f32 %v23630_v6, %v1813_v9  ;;  %v2609_v62 = vand.u32 4294901760, %v23730_v54 }
 0x173   :  { %v1843_v11 = vand.u32 4294901760, %v23641_v40  ;;  %v23653_v4 = vand.u32 4294901760, %v1736_v52  ;;  %v1733_v38 = vsel %vm1719_vm3, %v1704_v22, 0  ;;  %v1825_v34 = vand.u32 4294901760, %v1824_v56 }
 0x174   :  { %v1833_v28 = vand.u32 4294901760, %v1832_v17  ;;  %v23658_v7 = vand.u32 4294901760, %v1733_v38  ;;  %v1815_v29 = vand.u32 4294901760, %v1814_v47  ;;  %v2455_v19 = vsel %vm1719_vm3, %v23648_v53, 0 }
 0x175   :  { %v1862_v55 = vsub.f32 %v1736_v52, %v23653_v4  ;;  %v1844_v18 = vsub.f32 %v23641_v40, %v1843_v11  ;;  %v23759_v53 = vsub.f32 %v2449_v24, %v23742_v63  ;;  %v23763_v22 = vand.u32 4294901760, %v2455_v19 }
 0x176   :  { %v1834_v50 = vsub.f32 %v1832_v17, %v1833_v28  ;;  %v1852_v42 = vsub.f32 %v1733_v38, %v23658_v7  ;;  %17789 = vmatprep.mubr.f32.mxu0 %v1815_v29 }
 0x177   :  { %v1863_v46 = vand.u32 4294901760, %v1862_v55  ;;  %17790 = vmatmul.mubr.f32.vlgmr.msra.gmra.mrb[6].mxu0 %v1825_v34  ;;  %v1845_v57 = vand.u32 4294901760, %v1844_v18 }
 0x178   :  { %v1835_v43 = vand.u32 4294901760, %v1834_v50  ;;  %v1853_v1 = vand.u32 4294901760, %v1852_v42  ;;  %20702 = vmatpush3.bf16.msra.mxu0 %v23568_v12  ;;  %v23694_v12 = vsub.f32 %v881_v51, %v2464_v37 }
 0x179   :  { %20704 = vmatprep.subr.bf16.mxu0 %v23576_v10  ;;  %v1864_v14 = vsub.f32 %v1862_v55, %v1863_v46 }
 0x17a   :  { %17792 = vmatprep.mubr.f32.mxu0 %v1835_v43  ;;  %v1854_v44 = vsub.f32 %v1852_v42, %v1853_v1  ;;  %v20755_v51 = vpack.c.bf16 %v23696_v60, %v23694_v12 }
 0x17b   :  { %17793 = vmatmul.mubr.f32.gmra.mrb[8].mxu0 %v1845_v57  ;;  %v1865_v59 = vand.u32 4294901760, %v1864_v14 }
 0x17c   :  { %v1855_v45 = vand.u32 4294901760, %v1854_v44  ;;  %20706 = vmatpush3.bf16.msra.mxu0 %v23576_v10  ;;  %v2461_v10 = vsel %vm1738_vm2, %v884_v32, 0 }
 0x17d   :  { %20708 = vmatprep.subr.bf16.mxu0 %v23580_v35 }
 0x17e   :  { %17795 = vmatprep.mubr.f32.mxu0 %v1855_v45 }
 0x17f   :  { %17796 = vmatmul.mubr.f32.gmra.mrb[10].mxu0 %v1865_v59 }
 0x180   :  { %17806 = vmatprep.mubr.f32.mxu0 %v23622_v39 }
 0x183   :  { %17807 = vmatmul.mubr.f32.vlgmr.msra.gmra.mrb[6].mxu0 %v23619_v0 }
 0x184   :  { %17809 = vmatprep.mubr.f32.mxu0 %v23645_v36  ;;  %20710 = vmatpush3.bf16.msra.mxu0 %v23580_v35  ;;  %v2595_v35 = vand.u32 4294901760, %v23694_v12 }
 0x185   :  { %20712 = vmatprep.subr.bf16.mxu0 %v23585_v16 }
 0x186   :  { %v2596_v3 = vsub.f32 %v23694_v12, %v2595_v35  ;;  %v15795_v12 = vld [vmem:[%s26701_s3 + $0x40] sm:$0xff] }
 0x187   :  { %17810 = vmatmul.mubr.f32.gmra.mrb[8].mxu0 %v23635_v58 }
 0x188   :  { %17812 = vmatprep.mubr.f32.mxu0 %v23658_v7  ;;  %20714 = vmatpush3.bf16.msra.mxu0 %v23585_v16  ;;  %v2602_v16 = vand.u32 4294901760, %v23696_v60  ;;  %v2597_v27 = vand.u32 4294901760, %v2596_v3 }
 0x189   :  { %20716 = vmatprep.subr.bf16.mxu0 %v23537_v20 }
 0x18b   :  { %17813 = vmatmul.mubr.f32.gmra.mrb[10].mxu0 %v23653_v4 }
 0x18c   :  { %17823 = vmatprep.mubr.f32.mxu0 %v23630_v6  ;;  %v23738_v6 = vsub.f32 %v2443_v41, %v23717_v31  ;;  %v4019_v41 = vand.u32 4294901760, %v15795_v12 }
 0x18e   :  { %v2534_v52 = vand.u32 4294901760, %v23738_v6 }
 0x18f   :  { %17824 = vmatmul.mubr.f32.vlgmr.msra.gmra.mrb[6].mxu0 %v23625_v23 }
 0x190   :  { %17826 = vmatprep.mubr.f32.mxu0 %v1832_v17  ;;  %20718 = vmatpush3.bf16.msra.mxu0 %v23537_v20 }
 0x191   :  { %20720 = vmatprep.subr.bf16.mxu0 %v23551_v33 }
 0x193   :  { %17827 = vmatmul.mubr.f32.gmra.mrb[8].mxu0 %v23641_v40 }
 0x194   :  { %17829 = vmatprep.mubr.f32.mxu0 %v1852_v42  ;;  %20722 = vmatpush3.bf16.msra.mxu0 %v23551_v33 }
 0x195   :  { %20724 = vmatprep.subr.bf16.mxu0 %v23602_v15 }
 0x197   :  { %17830 = vmatmul.mubr.f32.gmra.mrb[10].mxu0 %v1862_v55 }
 0x198   :  { %17840 = vmatprep.mubr.f32.mxu0 %v1813_v9 }
 0x19b   :  { %17841 = vmatmul.mubr.f32.vlgmr.msra.gmra.mrb[6].mxu0 %v1823_v5 }
 0x19c   :  { %17843 = vmatprep.mubr.f32.mxu0 %v1833_v28  ;;  %20726 = vmatpush3.bf16.msra.mxu0 %v23602_v15  ;;  %v23713_v15 = vpack.c.bf16 %v2467_v48, %v2464_v37  ;;  %v2535_v28 = vsub.f32 %v23738_v6, %v2534_v52  ;;  %v20771_v48 = vpack.c.bf16 %v2602_v16, %v2595_v35 }
 0x19d   :  { %20728 = vmatprep.subr.bf16.mxu0 %v23607_v21  ;;  %v23843_v35 = vsub.f32 %v15795_v12, %v4019_v41 }
 0x19e   :  { %v2536_v42 = vand.u32 4294901760, %v2535_v28 }
 0x19f   :  { %17844 = vmatmul.mubr.f32.gmra.mrb[8].mxu0 %v1843_v11  ;;  %v2610_v11 = vsub.f32 %v23730_v54, %v2609_v62  ;;  %v4150_v3 = vand.u32 4294901760, %v23843_v35 }
 0x1a0   :  { %17846 = vmatprep.mubr.f32.mxu0 %v1853_v1  ;;  %20730 = vmatpush3.bf16.msra.mxu0 %v23607_v21  ;;  %v2446_v21 = vsel %vm1719_vm3, %v23614_v25, 0  ;;  %v2603_v25 = vsub.f32 %v23696_v60, %v2602_v16  ;;  %v15796_v60 = vld [vmem:[%s26701_s3 + $0x48] sm:$0xff] }
 0x1a1   :  { %20732 = vmatprep.subr.bf16.mxu0 %v23537_v20  ;;  %v23732_v23 = vand.u32 4294901760, %v2446_v21  ;;  %v2611_v55 = vand.u32 4294901760, %v2610_v11  ;;  %v4022_v26 = vand.u32 4294901760, %v15796_v60 }
 0x1a2   :  { %v2604_v5 = vand.u32 4294901760, %v2603_v25 }
 0x1a3   :  { %17847 = vmatmul.mubr.f32.gmra.mrb[10].mxu0 %v1863_v46  ;;  %v23750_v9 = vsub.f32 %v2446_v21, %v23732_v23  ;;  %v23845_v16 = vsub.f32 %v15796_v60, %v4022_v26  ;;  %v15797_v21 = vld [vmem:[%s26701_s3 + $0x50] sm:$0xff]  ;;  %v23855_v24 = vpack.c.bf16 %v4022_v26, %v4019_v41 }
 0x1a4   :  { %17857 = vmatprep.mubr.f32.mxu0 %v23622_v39  ;;  %v20747_v56 = vpack.c.bf16 %v2604_v5, %v2597_v27 }
 0x1a5   :  { %v2544_v17 = vand.u32 4294901760, %v23750_v9  ;;  %v4157_v25 = vand.u32 4294901760, %v23845_v16 }
 0x1a7   :  { %17858 = vmatmul.mubr.f32.vlgmr.msra.gmra.mrb[6].mxu0 %v23619_v0  ;;  %v2545_v29 = vsub.f32 %v23750_v9, %v2544_v17 }
 0x1a8   :  { %17860 = vmatprep.mubr.f32.mxu0 %v23645_v36  ;;  %20734 = vmatpush3.bf16.msra.mxu0 %v23537_v20  ;;  %v2473_v20 = vand.u32 4294901760, %v2461_v10 }
 0x1a9   :  { %20736 = vmatprep.subr.bf16.mxu0 %v23551_v33 }
 0x1aa   :  { %v23735_v61 = vsub.f32 %v2461_v10, %v2473_v20  ;;  %v23754_v8 = vpack.c.bf16 %v2473_v20, %v2470_v2  ;;  %v15798_v10 = vld [vmem:[%s26701_s3 + $0x58] sm:$0x3f]  ;;  %v4025_v20 = vand.u32 4294901760, %v15797_v21  ;;  %s22704_s3 = smov 127  }
 0x1ab   :  { %17861 = vmatmul.mubr.f32.gmra.mrb[8].mxu0 %v23635_v58  ;;  %v4016_v2 = vsel %vm1738_vm2, %v15798_v10, 0 }
 0x1ac   :  { %17863 = vmatprep.mubr.f32.mxu0 %v23658_v7  ;;  %20738 = vmatpush3.bf16.msra.mxu0 %v23551_v33  ;;  %v2452_v33 = vsel %vm1719_vm3, %v23627_v30, 0  ;;  %v2616_v30 = vand.u32 4294901760, %v23735_v61  ;;  %v20759_v37 = vpack.c.bf16 %v23735_v61, %v23730_v54  ;;  %v4028_v54 = vand.u32 4294901760, %v4016_v2 }
 0x1ad   :  { %20740 = vmatprep.subr.bf16.mxu0 %v23713_v15  ;;  %v23752_v40 = vand.u32 4294901760, %v2452_v33 }
 0x1ae   :  { %v20775_v32 = vpack.c.bf16 %v2616_v30, %v2609_v62 }
 0x1af   :  { %17864 = vmatmul.mubr.f32.gmra.mrb[10].mxu0 %v23653_v4  ;;  %v23773_v38 = vsub.f32 %v2452_v33, %v23752_v40  ;;  %v4158_v33 = vsub.f32 %v23845_v16, %v4157_v25 }
 0x1b0   :  { %17874 = vmatprep.mubr.f32.mxu0 %v23622_v39  ;;  %v2458_v39 = vsel %vm1719_vm3, %v23643_v49, 0  ;;  %v2554_v49 = vand.u32 4294901760, %v23759_v53 }
 0x1b1   :  { %v23775_v47 = vand.u32 4294901760, %v2458_v39  ;;  %v2564_v34 = vand.u32 4294901760, %v23773_v38 }
 0x1b3   :  { %17875 = vmatmul.mubr.f32.vlgmr.msra.gmra.mrb[6].mxu0 %v23619_v0  ;;  %v2617_v0 = vsub.f32 %v23735_v61, %v2616_v30  ;;  %v2583_v46 = vsub.f32 %v2458_v39, %v23775_v47  ;;  %v2565_v1 = vsub.f32 %v23773_v38, %v2564_v34  ;;  %v23860_v61 = vsub.f32 %v15797_v21, %v4025_v20 }
 0x1b4   :  { %17877 = vmatprep.mubr.f32.mxu0 %v23645_v36  ;;  %20742 = vmatpush3.bf16.msra.mxu0 %v23713_v15  ;;  %v23783_v36 = vsub.f32 %v2455_v19, %v23763_v22 }
 0x1b5   :  { %20744 = vmatprep.subr.bf16.mxu0 %v23754_v8  ;;  %v2618_v50 = vand.u32 4294901760, %v2617_v0  ;;  %v2584_v43 = vand.u32 4294901760, %v2583_v46  ;;  %v2566_v45 = vand.u32 4294901760, %v2565_v1  ;;  %v4164_v62 = vand.u32 4294901760, %v23860_v61 }
 0x1b6   :  { %v2574_v18 = vand.u32 4294901760, %v23783_v36 }
 0x1b7   :  { %17878 = vmatmul.mubr.f32.gmra.mrb[8].mxu0 %v23635_v58  ;;  %v2555_v58 = vsub.f32 %v23759_v53, %v2554_v49  ;;  %v20751_v57 = vpack.c.bf16 %v2618_v50, %v2611_v55  ;;  %v2585_v59 = vsub.f32 %v2583_v46, %v2584_v43 }
 0x1b8   :  { %17880 = vmatprep.mubr.f32.mxu0 %v23658_v7  ;;  %20746 = vmatpush3.bf16.msra.mxu0 %v23754_v8  ;;  %v2546_v7 = vand.u32 4294901760, %v2545_v29  ;;  %v2575_v44 = vsub.f32 %v23783_v36, %v2574_v18 }
 0x1b9   :  { %20748 = vmatprep.subr.bf16.mxu0 %v20747_v56  ;;  %v2556_v14 = vand.u32 4294901760, %v2555_v58 }
 0x1ba   :  { %v2576_v13 = vand.u32 4294901760, %v2575_v44 }
 0x1bb   :  { %17881 = vmatmul.mubr.f32.gmra.mrb[10].mxu0 %v23653_v4  ;;  %v2586_v4 = vand.u32 4294901760, %v2585_v59 }
 0x1bc   :  { %17891 = vmatprep.mubr.f32.mxu0 %v2536_v42 }
 0x1bf   :  { %17892 = vmatmul.mubr.f32.vlgmr.msra.gmra.mrb[6].mxu0 %v2546_v7 }
 0x1c0   :  { %17894 = vmatprep.mubr.f32.mxu0 %v2556_v14  ;;  %20750 = vmatpush3.bf16.msra.mxu0 %v20747_v56  ;;  %v4159_v56 = vand.u32 4294901760, %v4158_v33 }
 0x1c1   :  { %20752 = vmatprep.subr.bf16.mxu0 %v20751_v57 }
 0x1c3   :  { %17895 = vmatmul.mubr.f32.gmra.mrb[8].mxu0 %v2566_v45 }
 0x1c4   :  { %17897 = vmatprep.mubr.f32.mxu0 %v2576_v13  ;;  %20754 = vmatpush3.bf16.msra.mxu0 %v20751_v57 }
 0x1c5   :  { %20756 = vmatprep.subr.bf16.mxu0 %v20755_v51 }
 0x1c7   :  { %17898 = vmatmul.mubr.f32.gmra.mrb[10].mxu0 %v2586_v4 }
 0x1c8   :  { %17908 = vmatprep.mubr.f32.mxu0 %v23717_v31 }
 0x1cb   :  { %17909 = vmatmul.mubr.f32.vlgmr.msra.gmra.mrb[6].mxu0 %v23732_v23 }
 0x1cc   :  { %17911 = vmatprep.mubr.f32.mxu0 %v23742_v63  ;;  %20758 = vmatpush3.bf16.msra.mxu0 %v20755_v51 }
 0x1cd   :  { %20760 = vmatprep.subr.bf16.mxu0 %v20759_v37 }
 0x1cf   :  { %17912 = vmatmul.mubr.f32.gmra.mrb[8].mxu0 %v23752_v40 }
 0x1d0   :  { %17914 = vmatprep.mubr.f32.mxu0 %v23763_v22  ;;  %20762 = vmatpush3.bf16.msra.mxu0 %v20759_v37 }
 0x1d1   :  { %20764 = vmatprep.subr.bf16.mxu0 %v23713_v15 }
 0x1d3   :  { %17915 = vmatmul.mubr.f32.gmra.mrb[10].mxu0 %v23775_v47 }
 0x1d4   :  { %17925 = vmatprep.mubr.f32.mxu0 %v23738_v6  ;;  %v23864_v6 = vsub.f32 %v4016_v2, %v4028_v54 }
 0x1d6   :  { %v4171_v30 = vand.u32 4294901760, %v23864_v6 }
 0x1d7   :  { %17926 = vmatmul.mubr.f32.vlgmr.msra.gmra.mrb[6].mxu0 %v23750_v9 }
 0x1d8   :  { %17928 = vmatprep.mubr.f32.mxu0 %v23759_v53  ;;  %20766 = vmatpush3.bf16.msra.mxu0 %v23713_v15  ;;  %v23883_v53 = vpack.c.bf16 %v4028_v54, %v4025_v20  ;;  %v20951_v54 = vpack.c.bf16 %v23864_v6, %v23860_v61  ;;  %v20967_v33 = vpack.c.bf16 %v4171_v30, %v4164_v62 }
 0x1d9   :  { %20768 = vmatprep.subr.bf16.mxu0 %v23754_v8 }
 0x1db   :  { %17929 = vmatmul.mubr.f32.gmra.mrb[8].mxu0 %v23773_v38 }
 0x1dc   :  { %17931 = vmatprep.mubr.f32.mxu0 %v23783_v36  ;;  %20770 = vmatpush3.bf16.msra.mxu0 %v23754_v8 }
 0x1dd   :  { %20772 = vmatprep.subr.bf16.mxu0 %v20771_v48 }
 0x1df   :  { %17932 = vmatmul.mubr.f32.gmra.mrb[10].mxu0 %v2583_v46 }
 0x1e0   :  { %17942 = vmatprep.mubr.f32.mxu0 %v2534_v52 }
 0x1e3   :  { %17943 = vmatmul.mubr.f32.vlgmr.msra.gmra.mrb[6].mxu0 %v2544_v17 }
 0x1e4   :  { %17945 = vmatprep.mubr.f32.mxu0 %v2554_v49  ;;  %20774 = vmatpush3.bf16.msra.mxu0 %v20771_v48  ;;  %v4165_v49 = vsub.f32 %v23860_v61, %v4164_v62  ;;  %v15799_v62 = vld [vmem:[%s26705_s7] ss:$0 sm:$0xff] }
 0x1e5   :  { %20776 = vmatprep.subr.bf16.mxu0 %v20775_v32 }
 0x1e7   :  { %17946 = vmatmul.mubr.f32.gmra.mrb[8].mxu0 %v2564_v34 }
 0x1e8   :  { %17948 = vmatprep.mubr.f32.mxu0 %v2574_v18  ;;  %20778 = vmatpush3.bf16.msra.mxu0 %v20775_v32 }
 0x1e9   :  { %20780 = vmatprep.subr.bf16.mxu0 %v23713_v15 }
 0x1eb   :  { %17949 = vmatmul.mubr.f32.gmra.mrb[10].mxu0 %v2584_v43  ;;  %v4166_v43 = vand.u32 4294901760, %v4165_v49 }
 0x1ec   :  { %17959 = vmatprep.mubr.f32.mxu0 %v23717_v31 }
 0x1ef   :  { %17960 = vmatmul.mubr.f32.vlgmr.msra.gmra.mrb[6].mxu0 %v23732_v23 }
 0x1f0   :  { %17962 = vmatprep.mubr.f32.mxu0 %v23742_v63  ;;  %20782 = vmatpush3.bf16.msra.mxu0 %v23713_v15  ;;  %v4151_v15 = vsub.f32 %v23843_v35, %v4150_v3 }
 0x1f1   :  { %20784 = vmatprep.subr.bf16.mxu0 %v23754_v8 }
 0x1f2   :  { %v4152_v39 = vand.u32 4294901760, %v4151_v15  ;;  %v20963_v15 = vpack.c.bf16 %v4157_v25, %v4150_v3  ;;  %v4742_v25 = vld [vmem:[%s26700_s2 + $0x8] sm:$0xff] }
 0x1f3   :  { %17963 = vmatmul.mubr.f32.gmra.mrb[8].mxu0 %v23752_v40 }
 0x1f4   :  { %17965 = vmatprep.mubr.f32.mxu0 %v23763_v22  ;;  %20786 = vmatpush3.bf16.msra.mxu0 %v23754_v8  ;;  %v20939_v46 = vpack.c.bf16 %v4159_v56, %v4152_v39 }
 0x1f5   :  { %20932 = vmatprep.subr.bf16.mxu0 %v23855_v24 }
 0x1f7   :  { %17966 = vmatmul.mubr.f32.gmra.mrb[10].mxu0 %v23775_v47 }
 0x1f8   :  { %17976 = vmatprep.mubr.f32.mxu0 %v23717_v31 }
 0x1f9   :  { %v18176_v19 = vpop.f32.mrb[6].mxu1 }
 0x1fa   :  { %v4001_v27 = vsel %vm1719_vm3, %v18176_v19, 0  ;;  %v3958_v5 = vpop.f32.mrb[7].mxu1 }
 0x1fb   :  { %v23877_v9 = vand.u32 4294901760, %v4001_v27  ;;  %v3998_v8 = vsel %vm1719_vm3, %v3958_v5, 0  ;;  %17977 = vmatmul.mubr.f32.vlgmr.msra.gmra.mrb[6].mxu0 %v23732_v23  ;;  %v4172_v23 = vsub.f32 %v23864_v6, %v4171_v30  ;;  %v4749_v6 = vsel %vm4744_vm5, %v4742_v25, 0  ;;  %v4743_v5 = vld [vmem:[%s26700_s2 + $0x10] sm:$0xf] }
 0x1fc   :  { %v23881_v52 = vand.u32 4294901760, %v3998_v8  ;;  %17979 = vmatprep.mubr.f32.mxu0 %v23742_v63  ;;  %20934 = vmatpush3.bf16.msra.mxu0 %v23855_v24 }
 0x1fd   :  { %v23886_v11 = vsub.f32 %v4001_v27, %v23877_v9  ;;  %v18179_v17 = vpop.f32.mrb[8].mxu1  ;;  %20936 = vmatprep.subr.bf16.mxu0 %v23883_v53  ;;  %v24002_v27 = vand.u32 4294901760, %v4749_v6 }
 0x1fe   :  { %v23889_v38 = vsub.f32 %v3998_v8, %v23881_v52  ;;  %v4007_v31 = vsel %vm1719_vm3, %v18179_v17, 0  ;;  %v3970_v0 = vpop.f32.mrb[9].mxu1  ;;  %v15800_v17 = vld [vmem:[%s26700_s2 + $0x18] sm:$0xff] }
 0x1ff   :  { %v4099_v36 = vand.u32 4294901760, %v23886_v11  ;;  %v23899_v28 = vand.u32 4294901760, %v4007_v31  ;;  %v4004_v55 = vsel %vm1719_vm3, %v3970_v0, 0  ;;  %17980 = vmatmul.mubr.f32.gmra.mrb[8].mxu0 %v23752_v40  ;;  %v4173_v40 = vand.u32 4294901760, %v4172_v23 }
 0x200   :  { %v4089_v29 = vand.u32 4294901760, %v23889_v38  ;;  %v23906_v34 = vand.u32 4294901760, %v4004_v55  ;;  %17982 = vmatprep.mubr.f32.mxu0 %v23763_v22  ;;  %20938 = vmatpush3.bf16.msra.mxu0 %v23883_v53  ;;  %v24013_v30 = vsub.f32 %v4749_v6, %v24002_v27  ;;  %v15802_v6 = vld [vmem:[%s26700_s2 + $0x28] sm:$0xf] }
 0x201   :  { %v23910_v50 = vsub.f32 %v4007_v31, %v23899_v28  ;;  %v18182_v63 = vpop.f32.mrb[10].mxu1  ;;  %v4100_v1 = vsub.f32 %v23886_v11, %v4099_v36  ;;  %20940 = vmatprep.subr.bf16.mxu0 %v20939_v46  ;;  %v20943_v48 = vpack.c.bf16 %v4173_v40, %v4166_v43  ;;  %v15801_v40 = vld [vmem:[%s26700_s2 + $0x20] sm:$0xff] }
 0x202   :  { %v23913_v18 = vsub.f32 %v4004_v55, %v23906_v34  ;;  %v4013_v42 = vsel %vm1719_vm3, %v18182_v63, 0  ;;  %v3982_v58 = vpop.f32.mrb[11].mxu1  ;;  %v4090_v7 = vsub.f32 %v23889_v38, %v4089_v29  ;;  %v4841_v0 = vand.u32 4294901760, %v24013_v30 }
 0x203   :  { %v23924_v57 = vand.u32 4294901760, %v4013_v42  ;;  %v4010_v14 = vsel %vm1719_vm3, %v3982_v58, 0  ;;  %v4119_v44 = vand.u32 4294901760, %v23910_v50  ;;  %17983 = vmatmul.mubr.f32.gmra.mrb[10].mxu0 %v23775_v47  ;;  %v4101_v37 = vand.u32 4294901760, %v4100_v1 }
 0x204   :  { %v4109_v45 = vand.u32 4294901760, %v23913_v18  ;;  %v23930_v59 = vand.u32 4294901760, %v4010_v14  ;;  %v4091_v51 = vand.u32 4294901760, %v4090_v7  ;;  %v20947_v47 = vpack.c.bf16 %v23845_v16, %v23843_v35 }
 0x205   :  { %v4138_v13 = vsub.f32 %v4013_v42, %v23924_v57  ;;  %v4120_v41 = vsub.f32 %v23910_v50, %v4119_v44  ;;  %v26737_v35 = vmov 0.0|0.0   ;;  %v26739_v16 = vmov 0.0  }
 0x206   :  { %v4128_v4 = vsub.f32 %v4010_v14, %v23930_v59  ;;  %v4110_v22 = vsub.f32 %v23913_v18, %v4109_v45  ;;  %18191 = vmatprep.mubr.f32.mxu0 %v4091_v51  ;;  %20988 = vmatprep.subr.bf16.mxu1 %v26737_v35  ;;  %v24034_v58 = vsub.f32 %v24013_v30, %v4841_v0 }
 0x207   :  { %v4139_v32 = vand.u32 4294901760, %v4138_v13  ;;  %18192 = vmatmul.mubr.f32.vlgmr.msra.gmra.mrb[6].mxu0 %v4101_v37  ;;  %v4121_v10 = vand.u32 4294901760, %v4120_v41  ;;  %18318 = vmatprep.mubr.msk.f32.mxu1 %vm22701_vm4, %v26739_v16  ;;  %v5377_v41 = vsel %vm4744_vm5, %v15801_v40, 0 }
 0x208   :  { %v4129_v12 = vand.u32 4294901760, %v4128_v4  ;;  %v4111_v60 = vand.u32 4294901760, %v4110_v22  ;;  %20942 = vmatpush3.bf16.msra.mxu0 %v20939_v46 }
 0x209   :  { %20944 = vmatprep.subr.bf16.mxu0 %v20943_v48  ;;  %v4140_v2 = vsub.f32 %v4138_v13, %v4139_v32 }
 0x20a   :  { %v4130_v26 = vsub.f32 %v4128_v4, %v4129_v12  ;;  %18194 = vmatprep.mubr.f32.mxu0 %v4111_v60 }
 0x20b   :  { %18195 = vmatmul.mubr.f32.gmra.mrb[8].mxu0 %v4121_v10  ;;  %v4141_v20 = vand.u32 4294901760, %v4140_v2 }
 0x20c   :  { %v4131_v21 = vand.u32 4294901760, %v4130_v26  ;;  %20946 = vmatpush3.bf16.msra.mxu0 %v20943_v48 }
 0x20d   :  { %20948 = vmatprep.subr.bf16.mxu0 %v20947_v47 }
 0x20e   :  { %18197 = vmatprep.mubr.f32.mxu0 %v4131_v21 }
 0x20f   :  { %18198 = vmatmul.mubr.f32.gmra.mrb[10].mxu0 %v4141_v20 }
 0x210   :  { %18208 = vmatprep.mubr.f32.mxu0 %v23881_v52 }
 0x213   :  { %18209 = vmatmul.mubr.f32.vlgmr.msra.gmra.mrb[6].mxu0 %v23877_v9 }
 0x214   :  { %18211 = vmatprep.mubr.f32.mxu0 %v23906_v34  ;;  %20950 = vmatpush3.bf16.msra.mxu0 %v20947_v47 }
 0x215   :  { %20952 = vmatprep.subr.bf16.mxu0 %v20951_v54 }
 0x217   :  { %18212 = vmatmul.mubr.f32.gmra.mrb[8].mxu0 %v23899_v28 }
 0x218   :  { %18214 = vmatprep.mubr.f32.mxu0 %v23930_v59  ;;  %20954 = vmatpush3.bf16.msra.mxu0 %v20951_v54 }
 0x219   :  { %20956 = vmatprep.subr.bf16.mxu0 %v23855_v24 }
 0x21b   :  { %18215 = vmatmul.mubr.f32.gmra.mrb[10].mxu0 %v23924_v57 }
 0x21c   :  { %18225 = vmatprep.mubr.f32.mxu0 %v23889_v38 }
 0x21f   :  { %18226 = vmatmul.mubr.f32.vlgmr.msra.gmra.mrb[6].mxu0 %v23886_v11 }
 0x220   :  { %18228 = vmatprep.mubr.f32.mxu0 %v23913_v18  ;;  %20958 = vmatpush3.bf16.msra.mxu0 %v23855_v24 }
 0x221   :  { %20960 = vmatprep.subr.bf16.mxu0 %v23883_v53 }
 0x223   :  { %18229 = vmatmul.mubr.f32.gmra.mrb[8].mxu0 %v23910_v50 }
 0x224   :  { %18231 = vmatprep.mubr.f32.mxu0 %v4128_v4  ;;  %20962 = vmatpush3.bf16.msra.mxu0 %v23883_v53 }
 0x225   :  { %20964 = vmatprep.subr.bf16.mxu0 %v20963_v15 }
 0x227   :  { %18232 = vmatmul.mubr.f32.gmra.mrb[10].mxu0 %v4138_v13 }
 0x228   :  { %18242 = vmatprep.mubr.f32.mxu0 %v4089_v29 }
 0x22b   :  { %18243 = vmatmul.mubr.f32.vlgmr.msra.gmra.mrb[6].mxu0 %v4099_v36 }
 0x22c   :  { %18245 = vmatprep.mubr.f32.mxu0 %v4109_v45  ;;  %20966 = vmatpush3.bf16.msra.mxu0 %v20963_v15 }
 0x22d   :  { %20968 = vmatprep.subr.bf16.mxu0 %v20967_v33 }
 0x22f   :  { %18246 = vmatmul.mubr.f32.gmra.mrb[8].mxu0 %v4119_v44 }
 0x230   :  { %18248 = vmatprep.mubr.f32.mxu0 %v4129_v12  ;;  %20970 = vmatpush3.bf16.msra.mxu0 %v20967_v33 }
 0x231   :  { %20972 = vmatprep.subr.bf16.mxu0 %v23855_v24 }
 0x233   :  { %18249 = vmatmul.mubr.f32.gmra.mrb[10].mxu0 %v4139_v32 }
 0x234   :  { %18259 = vmatprep.mubr.f32.mxu0 %v23881_v52 }
 0x237   :  { %18260 = vmatmul.mubr.f32.vlgmr.msra.gmra.mrb[6].mxu0 %v23877_v9 }
 0x238   :  { %18262 = vmatprep.mubr.f32.mxu0 %v23906_v34  ;;  %20974 = vmatpush3.bf16.msra.mxu0 %v23855_v24  ;;  %v4741_v24 = vld [vmem:[%s26700_s2] sm:$0xff] }
 0x239   :  { %20976 = vmatprep.subr.bf16.mxu0 %v23883_v53  ;;  %v4746_v3 = vsel %vm4744_vm5, %v4741_v24, 0 }
 0x23a   :  { %v23996_v61 = vand.u32 4294901760, %v4746_v3 }
 0x23b   :  { %18263 = vmatmul.mubr.f32.gmra.mrb[8].mxu0 %v23899_v28 }
 0x23c   :  { %18265 = vmatprep.mubr.f32.mxu0 %v23930_v59  ;;  %20978 = vmatpush3.bf16.msra.mxu0 %v23883_v53  ;;  %v24000_v19 = vsub.f32 %v4746_v3, %v23996_v61 }
 0x23d   :  { %20979 = vmatprep.subr.bf16.mxu0 %v26737_v35 }
 0x23e   :  { %v4831_v8 = vand.u32 4294901760, %v24000_v19 }
 0x23f   :  { %18266 = vmatmul.mubr.f32.gmra.mrb[10].mxu0 %v23924_v57 }
 0x240   :  { %18276 = vmatprep.mubr.f32.mxu0 %v23881_v52  ;;  %v24023_v31 = vsub.f32 %v24000_v19, %v4831_v8 }
 0x242   :  { %v4833_v42 = vand.u32 4294901760, %v24023_v31 }
 0x243   :  { %18277 = vmatmul.mubr.f32.vlgmr.msra.gmra.mrb[6].mxu0 %v23877_v9  ;;  %v4752_v9 = vsel %vm4744_vm5, %v4743_v5, 0 }
 0x244   :  { %18279 = vmatprep.mubr.f32.mxu0 %v23906_v34  ;;  %v24015_v56 = vand.u32 4294901760, %v4752_v9  ;;  %v5374_v34 = vsel %vm4744_vm5, %v15800_v17, 0 }
 0x245   :  { %v24038_v14 = vand.u32 4294901760, %v5374_v34 }
 0x246   :  { %v24027_v29 = vsub.f32 %v4752_v9, %v24015_v56 }
 0x247   :  { %18280 = vmatmul.mubr.f32.gmra.mrb[8].mxu0 %v23899_v28 }
 0x248   :  { %18282 = vmatprep.mubr.f32.mxu0 %v23930_v59  ;;  %v4851_v13 = vand.u32 4294901760, %v24027_v29 }
 0x24b   :  { %18283 = vmatmul.mubr.f32.gmra.mrb[10].mxu0 %v23924_v57 }
 0x24c   :  { %18297 = vmatprep.mubr.msk.f32.mxu0 %vm22701_vm4, %v26739_v16 }
 0x316   :  { %v18278_v52 = vpop.f32.mrb[6].mxu0 }
 0x317   :  { %v4730_v53 = vadd.f32 %v18278_v52, %v15799_v62  ;;  %v4684_v39 = vpop.f32.mrb[7].mxu0  ;;  %v24064_v52 = vand.u32 4294901760, %v5377_v41 }
 0x318   :  { %v4729_v11 = vadd.f32 %v15799_v62, %v4684_v39 }
 0x319   :  { %v4736_v38 = vmax.f32 %v4730_v53, 0.0 }
 0x31a   :  { %v4735_v49 = vmax.f32 %v4729_v11, 0.0  ;;  %v18281_v36 = vpop.f32.mrb[8].mxu0 }
 0x31b   :  { %v4762_v28 = vand.u32 4294901760, %v4736_v38  ;;  %v4732_v55 = vadd.f32 %v18281_v36, %v15799_v62  ;;  %v4696_v23 = vpop.f32.mrb[9].mxu0  ;;  %v5380_v36 = vsel %vm4744_vm5, %v15802_v6, 0 }
 0x31c   :  { %v4759_v46 = vand.u32 4294901760, %v4735_v49  ;;  %v4731_v50 = vadd.f32 %v15799_v62, %v4696_v23 }
 0x31d   :  { %v4868_v63 = vsub.f32 %v4736_v38, %v4762_v28  ;;  %v4738_v18 = vmax.f32 %v4732_v55, 0.0 }
 0x31e   :  { %v24036_v7 = vpack.c.bf16 %v4762_v28, %v4759_v46  ;;  %v4861_v43 = vsub.f32 %v4735_v49, %v4759_v46  ;;  %v4737_v1 = vmax.f32 %v4731_v50, 0.0  ;;  %v18284_v57 = vpop.f32.mrb[10].mxu0  ;;  %v4843_v50 = vand.u32 4294901760, %v24034_v58 }
 0x31f   :  { %v4869_v44 = vand.u32 4294901760, %v4868_v63  ;;  %v4768_v45 = vand.u32 4294901760, %v4738_v18  ;;  %v4734_v59 = vadd.f32 %v18284_v57, %v15799_v62  ;;  %v4708_v51 = vpop.f32.mrb[11].mxu0  ;;  %v4852_v57 = vsub.f32 %v24027_v29, %v4851_v13 }
 0x320   :  { %26819 = vst [vmem:[#allocation8_spill] sm:$0xff] %v24036_v7  ;;  %v4862_v4 = vand.u32 4294901760, %v4861_v43  ;;  %v4765_v22 = vand.u32 4294901760, %v4737_v1  ;;  %v4733_v37 = vadd.f32 %v15799_v62, %v4708_v51  ;;  %20981 = vmatpush3.bf16.msra.mxu0 %v24036_v7  ;;  %v24045_v48 = vpack.c.bf16 %v4868_v63, %v4861_v43 }
 0x321   :  { %v4870_v32 = vsub.f32 %v4868_v63, %v4869_v44  ;;  %v4882_v12 = vsub.f32 %v4738_v18, %v4768_v45  ;;  %v4740_v60 = vmax.f32 %v4734_v59, 0.0  ;;  %20982 = vmatprep.subr.bf16.mxu0 %v26737_v35  ;;  %v24060_v62 = vsub.f32 %v5374_v34, %v24038_v14 }
 0x322   :  { %26820 = vst [vmem:[#allocation5_spill] sm:$0xff] %v24045_v48  ;;  %v4863_v26 = vsub.f32 %v4861_v43, %v4862_v4  ;;  %v24049_v10 = vpack.c.bf16 %v4768_v45, %v4765_v22  ;;  %v4875_v21 = vsub.f32 %v4737_v1, %v4765_v22  ;;  %v4739_v2 = vmax.f32 %v4733_v37, 0.0 }
 0x323   :  { %v4871_v47 = vand.u32 4294901760, %v4870_v32  ;;  %v4883_v20 = vand.u32 4294901760, %v4882_v12  ;;  %v4756_v54 = vsel %vm4754_vm6, %v4740_v60, 0  ;;  %v24052_v15 = vpack.c.bf16 %v4869_v44, %v4862_v4 }
 0x324   :  { %26821 = vst [vmem:[#allocation6_spill] sm:$0xff] %v24049_v10  ;;  %v4864_v33 = vand.u32 4294901760, %v4863_v26  ;;  %v4876_v24 = vand.u32 4294901760, %v4875_v21  ;;  %v4774_v3 = vand.u32 4294901760, %v4756_v54  ;;  %v4771_v25 = vand.u32 4294901760, %v4739_v2  ;;  %20984 = vmatpush3.bf16.msra.mxu0 %v24049_v10 }
 0x325   :  { %26822 = vst [vmem:[#allocation7_spill] sm:$0xff] %v24052_v15  ;;  %v4884_v5 = vsub.f32 %v4882_v12, %v4883_v20  ;;  %20985 = vmatprep.subr.bf16.mxu0 %v26737_v35  ;;  %v24062_v9 = vpack.c.bf16 %v4882_v12, %v4875_v21  ;;  %v5455_v40 = vand.u32 4294901760, %v24060_v62  ;;  %v24091_v44 = vsub.f32 %v5377_v41, %v24064_v52 }
 0x326   :  { %v4877_v53 = vsub.f32 %v4875_v21, %v4876_v24  ;;  %v4896_v39 = vsub.f32 %v4756_v54, %v4774_v3  ;;  %v24066_v11 = vpack.c.bf16 %v4774_v3, %v4771_v25  ;;  %v4889_v17 = vsub.f32 %v4739_v2, %v4771_v25  ;;  %v15809_v3 = vld [vmem:[%s26702_s4 + $0xa0] sm:$0xff]  ;;  %v15810_v25 = vld [vmem:[%s26702_s4 + $0xa8] sm:$0xff] }
 0x327   :  { %26823 = vst [vmem:[#allocation9_spill] sm:$0xff] %v24062_v9  ;;  %v4885_v38 = vand.u32 4294901760, %v4884_v5  ;;  %v24068_v49 = vpack.c.bf16 %v4871_v47, %v4864_v33  ;;  %v24071_v28 = vpack.c.bf16 %v4883_v20, %v4876_v24  ;;  %v24093_v58 = vand.u32 4294901760, %v5380_v36  ;;  %v15807_v47 = vld [vmem:[%s26702_s4 + $0x90] sm:$0xff]  ;;  %v15808_v20 = vld [vmem:[%s26702_s4 + $0x98] sm:$0xff] }
 0x328   :  { %26824 = vst [vmem:[#allocation10_spill] sm:$0xff] %v24066_v11  ;;  %v4878_v55 = vand.u32 4294901760, %v4877_v53  ;;  %v4897_v23 = vand.u32 4294901760, %v4896_v39  ;;  %v4890_v34 = vand.u32 4294901760, %v4889_v17  ;;  %20987 = vmatpush3.bf16.msra.mxu0 %v24066_v11  ;;  %v24074_v46 = vpack.c.bf16 %v4896_v39, %v4889_v17  ;;  %v15812_v53 = vld [vmem:[%s26702_s4 + $0xb8] sm:$0xff] }
 0x329   :  { %26825 = vst [vmem:[#allocation11_spill] sm:$0xff] %v24068_v49  ;;  %26826 = vst [vmem:[#allocation12_spill] sm:$0xff] %v24071_v28  ;;  %20990 = vmatpush3.bf16.msra.mxu1 %v24068_v49  ;;  %21033 = vmatprep.subr.bf16.mxu0 %v26737_v35  ;;  %v5456_v51 = vsub.f32 %v24060_v62, %v5455_v40  ;;  %v5465_v4 = vand.u32 4294901760, %v24091_v44  ;;  %v24108_v22 = vsub.f32 %v5380_v36, %v24093_v58 }
 0x32a   :  { %26827 = vst [vmem:[#allocation13_spill] sm:$0xff] %v24074_v46  ;;  %v4898_v63 = vsub.f32 %v4896_v39, %v4897_v23  ;;  %v4891_v18 = vsub.f32 %v4889_v17, %v4890_v34  ;;  %20991 = vmatprep.subr.bf16.mxu1 %v26737_v35  ;;  %v24080_v43 = vpack.c.bf16 %v4885_v38, %v4878_v55  ;;  %v6017_v54 = vand.u32 4294901760, %v15807_v47 }
 0x32b   :  { %v24082_v1 = vpack.c.bf16 %v4897_v23, %v4890_v34  ;;  %18298 = vmatmul.mubr.f32.vlgmr.msra.gmra.mrb[12].mxu0 %v4833_v42  ;;  %v4853_v42 = vand.u32 4294901760, %v4852_v57  ;;  %v5457_v37 = vand.u32 4294901760, %v5456_v51  ;;  %v5466_v32 = vsub.f32 %v24091_v44, %v5465_v4  ;;  %v15816_v51 = vld [vmem:[%s26702_s4 + $0xd8] sm:$0xff] }
 0x32c   :  { %26828 = vst [vmem:[#allocation14_spill] sm:$0xff] %v24080_v43  ;;  %v4899_v45 = vand.u32 4294901760, %v4898_v63  ;;  %v4892_v59 = vand.u32 4294901760, %v4891_v18  ;;  %21035 = vmatpush3.bf16.msra.mxu0 %v24036_v7  ;;  %18300 = vmatprep.mubr.msk.f32.mxu0 %vm22701_vm4, %v26739_v16  ;;  %v5475_v12 = vand.u32 4294901760, %v24108_v22  ;;  %v6020_v33 = vand.u32 4294901760, %v15808_v20  ;;  %v15814_v63 = vld [vmem:[%s26702_s4 + $0xc8] sm:$0xff] }
 0x32d   :  { %26829 = vst [vmem:[#allocation15_spill] sm:$0xff] %v24082_v1  ;;  %20993 = vmatpush3.bf16.msra.mxu1 %v24080_v43  ;;  %21036 = vmatprep.subr.bf16.mxu0 %v26737_v35  ;;  %v5467_v60 = vand.u32 4294901760, %v5466_v32  ;;  %v6023_v6 = vand.u32 4294901760, %v15809_v3  ;;  %v6026_v5 = vand.u32 4294901760, %v15810_v25  ;;  %v6032_v17 = vand.u32 4294901760, %v15812_v53 }
 0x32e   :  { %20994 = vmatprep.subr.bf16.mxu1 %v26737_v35  ;;  %v24101_v31 = vpack.c.bf16 %v4899_v45, %v4892_v59  ;;  %v5476_v41 = vsub.f32 %v24108_v22, %v5475_v12  ;;  %v24317_v24 = vpack.c.bf16 %v6020_v33, %v6017_v54  ;;  %v24345_v55 = vsub.f32 %v15807_v47, %v6017_v54 }
 0x32f   :  { %18301 = vmatmul.mubr.f32.gmra.mrb[14].mxu0 %v4843_v50  ;;  %v24347_v23 = vsub.f32 %v15808_v20, %v6020_v33  ;;  %v15813_v50 = vld [vmem:[%s26702_s4 + $0xc0] sm:$0xff]  ;;  %v24357_v18 = vsub.f32 %v15809_v3, %v6023_v6  ;;  %v24359_v57 = vsub.f32 %v15810_v25, %v6026_v5  ;;  %v6038_v45 = vand.u32 4294901760, %v15814_v63 }
 0x330   :  { %26830 = vst [vmem:[#allocation16_spill] sm:$0xff] %v24101_v31  ;;  %21038 = vmatpush3.bf16.msra.mxu0 %v24049_v10  ;;  %18303 = vmatprep.mubr.msk.f32.mxu0 %vm22701_vm4, %v26739_v16  ;;  %v5477_v26 = vand.u32 4294901760, %v5476_v41  ;;  %v6144_v3 = vand.u32 4294901760, %v24345_v55 }
 0x331   :  { %20996 = vmatpush3.bf16.msra.mxu1 %v24101_v31  ;;  %21039 = vmatprep.subr.bf16.mxu0 %v26737_v35  ;;  %v6151_v25 = vand.u32 4294901760, %v24347_v23 }
 0x332   :  { %20997 = vmatprep.subr.bf16.mxu1 %v26737_v35 }
 0x333   :  { %18304 = vmatmul.mubr.f32.gmra.mrb[16].mxu0 %v4853_v42  ;;  %v15815_v42 = vld [vmem:[%s26702_s4 + $0xd0] sm:$0xff] }
 0x334   :  { %18319 = vmatmul.mubr.f32.vlgmr.msra.gmra.mrb[12].mxu1 %v23996_v61  ;;  %21041 = vmatpush3.bf16.msra.mxu0 %v24066_v11 }
 0x335   :  { %20999 = vmatpush3.bf16.msra.mxu1 %v24045_v48  ;;  %18321 = vmatprep.mubr.msk.f32.mxu1 %vm22701_vm4, %v26739_v16 }
 0x336   :  { %18423 = vmatprep.mubr.msk.f32.mxu0 %vm22701_vm4, %v26739_v16  ;;  %21000 = vmatprep.subr.bf16.mxu1 %v26737_v35 }
 0x337   :  { %18424 = vmatmul.mubr.f32.vlgmr.msra.gmra.mrb[18].mxu0 %v5457_v37  ;;  %21042 = vmatprep.subr.bf16.mxu0 %v26737_v35 }
 0x338   :  { %18322 = vmatmul.mubr.f32.gmra.mrb[14].mxu1 %v24002_v27  ;;  %21044 = vmatpush3.bf16.msra.mxu0 %v24068_v49 }
 0x339   :  { %21002 = vmatpush3.bf16.msra.mxu1 %v24062_v9  ;;  %18324 = vmatprep.mubr.msk.f32.mxu1 %vm22701_vm4, %v26739_v16 }
 0x33a   :  { %18426 = vmatprep.mubr.msk.f32.mxu0 %vm22701_vm4, %v26739_v16  ;;  %21003 = vmatprep.subr.bf16.mxu1 %v26737_v35 }
 0x33b   :  { %18427 = vmatmul.mubr.f32.gmra.mrb[20].mxu0 %v5467_v60  ;;  %21045 = vmatprep.subr.bf16.mxu0 %v26737_v35 }
 0x33c   :  { %18325 = vmatmul.mubr.f32.gmra.mrb[16].mxu1 %v24015_v56  ;;  %21047 = vmatpush3.bf16.msra.mxu0 %v24080_v43 }
 0x33d   :  { %21005 = vmatpush3.bf16.msra.mxu1 %v24074_v46  ;;  %18339 = vmatprep.mubr.msk.f32.mxu1 %vm22701_vm4, %v26739_v16 }
 0x33e   :  { %18429 = vmatprep.mubr.msk.f32.mxu0 %vm22701_vm4, %v26739_v16  ;;  %21006 = vmatprep.subr.bf16.mxu1 %v26737_v35 }
 0x33f   :  { %18430 = vmatmul.mubr.f32.gmra.mrb[22].mxu0 %v5477_v26  ;;  %21048 = vmatprep.subr.bf16.mxu0 %v26737_v35 }
 0x340   :  { %18340 = vmatmul.mubr.f32.vlgmr.msra.gmra.mrb[12].mxu1 %v24000_v19  ;;  %21050 = vmatpush3.bf16.msra.mxu0 %v24101_v31  ;;  %v15804_v19 = vld [vmem:[%s26702_s4 + $0x78] sm:$0xff]  ;;  %v24627_v31 = vld [vmem:[%s26702_s4 + $0x48] sm:$0xff] }
 0x341   :  { %21008 = vmatpush3.bf16.msra.mxu1 %v24036_v7  ;;  %18342 = vmatprep.mubr.msk.f32.mxu1 %vm22701_vm4, %v26739_v16 }
 0x342   :  { %18444 = vmatprep.mubr.msk.f32.mxu0 %vm22701_vm4, %v26739_v16  ;;  %21009 = vmatprep.subr.bf16.mxu1 %v26737_v35 }
 0x343   :  { %18445 = vmatmul.mubr.f32.vlgmr.msra.gmra.mrb[18].mxu0 %v24038_v14  ;;  %21051 = vmatprep.subr.bf16.mxu0 %v26737_v35 }
 0x344   :  { %18343 = vmatmul.mubr.f32.gmra.mrb[14].mxu1 %v24013_v30  ;;  %21053 = vmatpush3.bf16.msra.mxu0 %v24045_v48 }
 0x345   :  { %21011 = vmatpush3.bf16.msra.mxu1 %v24049_v10  ;;  %18345 = vmatprep.mubr.msk.f32.mxu1 %vm22701_vm4, %v26739_v16 }
 0x346   :  { %18447 = vmatprep.mubr.msk.f32.mxu0 %vm22701_vm4, %v26739_v16  ;;  %21012 = vmatprep.subr.bf16.mxu1 %v26737_v35 }
 0x347   :  { %18448 = vmatmul.mubr.f32.gmra.mrb[20].mxu0 %v24064_v52  ;;  %21054 = vmatprep.subr.bf16.mxu0 %v26737_v35 }
 0x348   :  { %18346 = vmatmul.mubr.f32.gmra.mrb[16].mxu1 %v24027_v29  ;;  %21056 = vmatpush3.bf16.msra.mxu0 %v24062_v9  ;;  %v15805_v29 = vld [vmem:[%s26702_s4 + $0x80] sm:$0xff] }
 0x349   :  { %21014 = vmatpush3.bf16.msra.mxu1 %v24066_v11  ;;  %18360 = vmatprep.mubr.msk.f32.mxu1 %vm22701_vm4, %v26739_v16 }
 0x34a   :  { %18450 = vmatprep.mubr.msk.f32.mxu0 %vm22701_vm4, %v26739_v16  ;;  %21015 = vmatprep.subr.bf16.mxu1 %v26737_v35 }
 0x34b   :  { %18451 = vmatmul.mubr.f32.gmra.mrb[22].mxu0 %v24093_v58  ;;  %21057 = vmatprep.subr.bf16.mxu0 %v26737_v35 }
 0x34c   :  { %18361 = vmatmul.mubr.f32.vlgmr.msra.gmra.mrb[12].mxu1 %v4831_v8  ;;  %21059 = vmatpush3.bf16.msra.mxu0 %v24074_v46  ;;  %v6008_v8 = vand.u32 4294901760, %v15804_v19 }
 0x34d   :  { %21017 = vmatpush3.bf16.msra.mxu1 %v24052_v15  ;;  %18363 = vmatprep.mubr.msk.f32.mxu1 %vm22701_vm4, %v26739_v16 }
 0x34e   :  { %18465 = vmatprep.mubr.msk.f32.mxu0 %vm22701_vm4, %v26739_v16  ;;  %21018 = vmatprep.subr.bf16.mxu1 %v26737_v35 }
 0x34f   :  { %18466 = vmatmul.mubr.f32.vlgmr.msra.gmra.mrb[18].mxu0 %v24060_v62  ;;  %21060 = vmatprep.subr.bf16.mxu0 %v26737_v35  ;;  %v24329_v62 = vpack.c.bf16 %v6026_v5, %v6023_v6  ;;  %v6145_v5 = vsub.f32 %v24345_v55, %v6144_v3 }
 0x350   :  { %18364 = vmatmul.mubr.f32.gmra.mrb[14].mxu1 %v4841_v0  ;;  %21062 = vmatpush3.bf16.msra.mxu0 %v24036_v7  ;;  %v24293_v0 = vsub.f32 %v15804_v19, %v6008_v8 }
 0x351   :  { %21020 = vmatpush3.bf16.msra.mxu1 %v24071_v28  ;;  %18366 = vmatprep.mubr.msk.f32.mxu1 %vm22701_vm4, %v26739_v16 }
 0x352   :  { %18468 = vmatprep.mubr.msk.f32.mxu0 %vm22701_vm4, %v26739_v16  ;;  %21021 = vmatprep.subr.bf16.mxu1 %v26737_v35 }
 0x353   :  { %18469 = vmatmul.mubr.f32.gmra.mrb[20].mxu0 %v24091_v44  ;;  %21063 = vmatprep.subr.bf16.mxu0 %v26737_v35  ;;  %v24363_v44 = vsub.f32 %v15812_v53, %v6032_v17  ;;  %v6146_v53 = vand.u32 4294901760, %v6145_v5 }
 0x354   :  { %18367 = vmatmul.mubr.f32.gmra.mrb[16].mxu1 %v4851_v13  ;;  %21065 = vmatpush3.bf16.msra.mxu0 %v24049_v10  ;;  %v6011_v13 = vand.u32 4294901760, %v15805_v29 }
 0x355   :  { %21023 = vmatpush3.bf16.msra.mxu1 %v24082_v1  ;;  %18381 = vmatprep.mubr.msk.f32.mxu1 %vm22701_vm4, %v26739_v16 }
 0x356   :  { %18471 = vmatprep.mubr.msk.f32.mxu0 %vm22701_vm4, %v26739_v16  ;;  %21024 = vmatprep.subr.bf16.mxu1 %v26737_v35  ;;  %v24341_v38 = vsub.f32 %v15805_v29, %v6011_v13 }
 0x357   :  { %18472 = vmatmul.mubr.f32.gmra.mrb[22].mxu0 %v24108_v22  ;;  %21066 = vmatprep.subr.bf16.mxu0 %v26737_v35  ;;  %v6044_v22 = vand.u32 4294901760, %v15816_v51 }
 0x358   :  { %18382 = vmatmul.mubr.f32.vlgmr.msra.gmra.mrb[12].mxu1 %v23996_v61  ;;  %21068 = vmatpush3.bf16.msra.mxu0 %v24066_v11 }
 0x359   :  { %21026 = vmatpush3.bf16.msra.mxu1 %v24036_v7  ;;  %18384 = vmatprep.mubr.msk.f32.mxu1 %vm22701_vm4, %v26739_v16 }
 0x35a   :  { %18486 = vmatprep.mubr.msk.f32.mxu0 %vm22701_vm4, %v26739_v16  ;;  %21027 = vmatprep.subr.bf16.mxu1 %v26737_v35 }
 0x35b   :  { %18487 = vmatmul.mubr.f32.vlgmr.msra.gmra.mrb[18].mxu0 %v5455_v40  ;;  %21069 = vmatprep.subr.bf16.mxu0 %v26737_v35 }
 0x35c   :  { %18385 = vmatmul.mubr.f32.gmra.mrb[14].mxu1 %v24002_v27  ;;  %21071 = vmatpush3.bf16.msra.mxu0 %v24052_v15 }
 0x35d   :  { %21029 = vmatpush3.bf16.msra.mxu1 %v24049_v10  ;;  %18387 = vmatprep.mubr.msk.f32.mxu1 %vm22701_vm4, %v26739_v16 }
 0x35e   :  { %18489 = vmatprep.mubr.msk.f32.mxu0 %vm22701_vm4, %v26739_v16  ;;  %21030 = vmatprep.subr.bf16.mxu1 %v26737_v35 }
 0x35f   :  { %18490 = vmatmul.mubr.f32.gmra.mrb[20].mxu0 %v5465_v4  ;;  %21072 = vmatprep.subr.bf16.mxu0 %v26737_v35  ;;  %v6041_v4 = vand.u32 4294901760, %v15815_v42 }
 0x360   :  { %18388 = vmatmul.mubr.f32.gmra.mrb[16].mxu1 %v24015_v56  ;;  %21074 = vmatpush3.bf16.msra.mxu0 %v24071_v28 }
 0x361   :  { %21032 = vmatpush3.bf16.msra.mxu1 %v24066_v11  ;;  %18402 = vmatprep.mubr.msk.f32.mxu1 %vm22701_vm4, %v26739_v16  ;;  %v24380_v37 = vpack.c.bf16 %v6044_v22, %v6041_v4  ;;  %v24399_v19 = vsub.f32 %v15815_v42, %v6041_v4 }
 0x362   :  { %18492 = vmatprep.mubr.msk.f32.mxu0 %vm22701_vm4, %v26739_v16  ;;  %21075 = vmatprep.subr.bf16.mxu0 %v26737_v35 }
 0x363   :  { %18493 = vmatmul.mubr.f32.gmra.mrb[22].mxu0 %v5475_v12  ;;  %21087 = vmatprep.subr.bf16.mxu1 %v26737_v35  ;;  %v26741_v12 = vand.u32 4294901760, %v24293_v0 }
 0x364   :  { %18403 = vmatmul.mubr.f32.vlgmr.msra.gmra.mrb[12].mxu1 %v23996_v61  ;;  %21077 = vmatpush3.bf16.msra.mxu0 %v24082_v1  ;;  %v15803_v61 = vld [vmem:[%s26702_s4 + $0x70] sm:$0xff] }
 0x365   :  { %18405 = vmatprep.mubr.msk.f32.mxu1 %vm22701_vm4, %v26739_v16  ;;  %18507 = vmatprep.mubr.msk.f32.mxu0 %vm22701_vm4, %v26739_v16  ;;  %v6124_v41 = vsub.f32 %v24293_v0, %v26741_v12 }
 0x366   :  { %21078 = vmatprep.subr.bf16.mxu0 %v26737_v35 }
 0x367   :  { %18508 = vmatmul.mubr.f32.vlgmr.msra.gmra.mrb[18].mxu0 %v24038_v14  ;;  %v6125_v29 = vand.u32 4294901760, %v6124_v41 }
 0x368   :  { %18406 = vmatmul.mubr.f32.gmra.mrb[14].mxu1 %v24002_v27  ;;  %21080 = vmatpush3.bf16.msra.mxu0 %v24036_v7  ;;  %v6005_v27 = vand.u32 4294901760, %v15803_v61 }
 0x369   :  { %18408 = vmatprep.mubr.msk.f32.mxu1 %vm22701_vm4, %v26739_v16  ;;  %18510 = vmatprep.mubr.msk.f32.mxu0 %vm22701_vm4, %v26739_v16 }
 0x36a   :  { %21081 = vmatprep.subr.bf16.mxu0 %v26737_v35  ;;  %v24289_v30 = vpack.c.bf16 %v6008_v8, %v6005_v27 }
 0x36b   :  { %18511 = vmatmul.mubr.f32.gmra.mrb[20].mxu0 %v24064_v52 }
 0x36c   :  { %18409 = vmatmul.mubr.f32.gmra.mrb[16].mxu1 %v24015_v56  ;;  %21083 = vmatpush3.bf16.msra.mxu0 %v24049_v10  ;;  %v24291_v56 = vsub.f32 %v15803_v61, %v6005_v27  ;;  %v24397_v61 = vsub.f32 %v15814_v63, %v6038_v45  ;;  %v24401_v27 = vsub.f32 %v15816_v51, %v6044_v22  ;;  %v6179_v22 = vand.u32 4294901760, %v24363_v44 }
 0x36d   :  { %18513 = vmatprep.mubr.msk.f32.mxu0 %vm22701_vm4, %v26739_v16  ;;  %21084 = vmatprep.subr.bf16.mxu0 %v26737_v35 }
 0x36e   :  { %18565 = vmatprep.mubr.msk.f32.mxu1 %vm22701_vm4, %v26739_v16  ;;  %21089 = vmatpush3.bf16.msra.mxu1 %v24289_v30  ;;  %v6116_v32 = vand.u32 4294901760, %v24291_v56 }
 0x36f   :  { %18514 = vmatmul.mubr.f32.gmra.mrb[22].mxu0 %v24093_v58  ;;  %21090 = vmatprep.subr.bf16.mxu1 %v26737_v35 }
 0x370   :  { %21086 = vmatpush3.bf16.msra.mxu0 %v24066_v11  ;;  %18528 = vmatprep.mubr.msk.f32.mxu0 %vm22701_vm4, %v26739_v16  ;;  %v6117_v60 = vsub.f32 %v24291_v56, %v6116_v32 }
 0x371   :  { %21150 = vmatprep.subr.bf16.mxu0 %v26737_v35 }
 0x372   :  { %v6118_v8 = vand.u32 4294901760, %v6117_v60 }
 0x373   :  { %18529 = vmatmul.mubr.f32.vlgmr.msra.gmra.mrb[18].mxu0 %v24038_v14  ;;  %v15806_v14 = vld [vmem:[%s26702_s4 + $0x88] sm:$0xff] }
 0x374   :  { %18531 = vmatprep.mubr.msk.f32.mxu0 %vm22701_vm4, %v26739_v16  ;;  %21152 = vmatpush3.bf16.msra.mxu0 %v24289_v30  ;;  %v6014_v21 = vand.u32 4294901760, %v15806_v14 }
 0x375   :  { %21153 = vmatprep.subr.bf16.mxu0 %v26737_v35 }
 0x376   :  { %v24305_v2 = vpack.c.bf16 %v6014_v21, %v6011_v13  ;;  %v24343_v36 = vsub.f32 %v15806_v14, %v6014_v21  ;;  %v6130_v14 = vand.u32 4294901760, %v24341_v38  ;;  %v24405_v21 = vpack.c.bf16 %v6125_v29, %v6118_v8 }
 0x377   :  { %18532 = vmatmul.mubr.f32.gmra.mrb[20].mxu0 %v24064_v52  ;;  %v15811_v52 = vld [vmem:[%s26702_s4 + $0xb0] sm:$0xff]  ;;  %v6180_v8 = vsub.f32 %v24363_v44, %v6179_v22 }
 0x378   :  { %18534 = vmatprep.mubr.msk.f32.mxu0 %vm22701_vm4, %v26739_v16  ;;  %21155 = vmatpush3.bf16.msra.mxu0 %v24305_v2  ;;  %v6029_v39 = vand.u32 4294901760, %v15811_v52  ;;  %v6137_v13 = vand.u32 4294901760, %v24343_v36  ;;  %v6131_v47 = vsub.f32 %v24341_v38, %v6130_v14 }
 0x379   :  { %21092 = vmatpush3.bf16.msra.mxu1 %v24305_v2  ;;  %21156 = vmatprep.subr.bf16.mxu0 %v26737_v35 }
 0x37a   :  { %21093 = vmatprep.subr.bf16.mxu1 %v26737_v35  ;;  %v24349_v34 = vpack.c.bf16 %v6032_v17, %v6029_v39  ;;  %v24361_v40 = vsub.f32 %v15811_v52, %v6029_v39  ;;  %v6138_v20 = vsub.f32 %v24343_v36, %v6137_v13  ;;  %v6132_v54 = vand.u32 4294901760, %v6131_v47 }
 0x37b   :  { %18535 = vmatmul.mubr.f32.gmra.mrb[22].mxu0 %v24093_v58  ;;  %v6035_v58 = vand.u32 4294901760, %v15813_v50  ;;  %v6152_v52 = vsub.f32 %v24347_v23, %v6151_v25  ;;  %v6158_v17 = vand.u32 4294901760, %v24357_v18  ;;  %v6181_v47 = vand.u32 4294901760, %v6180_v8 }
 0x37c   :  { %18676 = vmatprep.mubr.msk.f32.mxu0 %vm22701_vm4, %v26739_v16  ;;  %21158 = vmatpush3.bf16.msra.mxu0 %v24317_v24  ;;  %v6139_v33 = vand.u32 4294901760, %v6138_v20  ;;  %v6172_v4 = vand.u32 4294901760, %v24361_v40  ;;  %v24461_v1 = vpack.c.bf16 %v6137_v13, %v6130_v14 }
 0x37d   :  { %21095 = vmatpush3.bf16.msra.mxu1 %v24317_v24  ;;  %21159 = vmatprep.subr.bf16.mxu0 %v26737_v35  ;;  %v24369_v59 = vpack.c.bf16 %v6038_v45, %v6035_v58  ;;  %v24395_v26 = vsub.f32 %v15813_v50, %v6035_v58  ;;  %v6153_v39 = vand.u32 4294901760, %v6152_v52  ;;  %v6165_v50 = vand.u32 4294901760, %v24359_v57 }
 0x37e   :  { %21096 = vmatprep.subr.bf16.mxu1 %v26737_v35  ;;  %v24411_v6 = vpack.c.bf16 %v6139_v33, %v6132_v54  ;;  %v6159_v58 = vsub.f32 %v24357_v18, %v6158_v17  ;;  %v6173_v41 = vsub.f32 %v24361_v40, %v6172_v4  ;;  %v6193_v54 = vand.u32 4294901760, %v24397_v61 }
 0x37f   :  { %v24417_v63 = vpack.c.bf16 %v6153_v39, %v6146_v53  ;;  %v6166_v45 = vsub.f32 %v24359_v57, %v6165_v50  ;;  %v6186_v20 = vand.u32 4294901760, %v24395_v26 }
 0x380   :  { %21161 = vmatpush3.bf16.msra.mxu0 %v24329_v62  ;;  %v6160_v42 = vand.u32 4294901760, %v6159_v58  ;;  %v6174_v29 = vand.u32 4294901760, %v6173_v41  ;;  %v6194_v52 = vsub.f32 %v24397_v61, %v6193_v54  ;;  %v6200_v58 = vand.u32 4294901760, %v24399_v19 }
 0x381   :  { %21098 = vmatpush3.bf16.msra.mxu1 %v24329_v62  ;;  %21162 = vmatprep.subr.bf16.mxu0 %v26737_v35  ;;  %v6167_v51 = vand.u32 4294901760, %v6166_v45  ;;  %v6187_v5 = vsub.f32 %v24395_v26, %v6186_v20  ;;  %v6207_v45 = vand.u32 4294901760, %v24401_v27 }
 0x382   :  { %21099 = vmatprep.subr.bf16.mxu1 %v26737_v35  ;;  %v24429_v33 = vpack.c.bf16 %v6181_v47, %v6174_v29  ;;  %v6195_v39 = vand.u32 4294901760, %v6194_v52  ;;  %v26831_v52 = vand.u32 4294901760, %v24293_v0 }
 0x383   :  { %v24423_v60 = vpack.c.bf16 %v6167_v51, %v6160_v42  ;;  %v6188_v53 = vand.u32 4294901760, %v6187_v5  ;;  %v6201_v51 = vsub.f32 %v24399_v19, %v6200_v58  ;;  %v6208_v41 = vsub.f32 %v24401_v27, %v6207_v45 }
 0x384   :  { %21164 = vmatpush3.bf16.msra.mxu0 %v24349_v34  ;;  %v24471_v28 = vpack.c.bf16 %v6207_v45, %v6200_v58 }
 0x385   :  { %21101 = vmatpush3.bf16.msra.mxu1 %v24349_v34  ;;  %21165 = vmatprep.subr.bf16.mxu0 %v26737_v35  ;;  %v24435_v42 = vpack.c.bf16 %v6195_v39, %v6188_v53  ;;  %v6202_v8 = vand.u32 4294901760, %v6201_v51  ;;  %v24459_v53 = vpack.c.bf16 %v26831_v52, %v6116_v32  ;;  %v24463_v39 = vpack.c.bf16 %v6151_v25, %v6144_v3 }
 0x386   :  { %21102 = vmatprep.subr.bf16.mxu1 %v26737_v35  ;;  %26832 = vst [vmem:[#allocation17_spill] sm:$0xff] %v24471_v28 }
 0x388   :  { %21167 = vmatpush3.bf16.msra.mxu0 %v24369_v59 }
 0x389   :  { %21104 = vmatpush3.bf16.msra.mxu1 %v24369_v59  ;;  %21168 = vmatprep.subr.bf16.mxu0 %v26737_v35 }
 0x38a   :  { %21105 = vmatprep.subr.bf16.mxu1 %v26737_v35 }
 0x38c   :  { %21170 = vmatpush3.bf16.msra.mxu0 %v24380_v37 }
 0x38d   :  { %21107 = vmatpush3.bf16.msra.mxu1 %v24380_v37  ;;  %21192 = vmatprep.subr.bf16.mxu0 %v26737_v35 }
 0x38e   :  { %21108 = vmatprep.subr.bf16.mxu1 %v26737_v35  ;;  %v6209_v35 = vand.u32 4294901760, %v6208_v41 }
 0x390   :  { %v24439_v29 = vpack.c.bf16 %v6209_v35, %v6202_v8  ;;  %v24467_v35 = vpack.c.bf16 %v6179_v22, %v6172_v4 }
 0x3fe   :  { %v4835_v16 = vpop.f32.mrb[12].mxu0 }
 0x3ff   :  { %v18299_v51 = vpop.f32.mrb[13].mxu0 }
 0x400   :  { %v24465_v51 = vpack.c.bf16 %v6165_v50, %v6158_v17 }
 0x402   :  { %v4845_v41 = vpop.f32.mrb[14].mxu0 }
 0x403   :  { %v18302_v8 = vpop.f32.mrb[15].mxu0 }
 0x404   :  { %v24469_v8 = vpack.c.bf16 %v6193_v54, %v6186_v20 }
 0x406   :  { %v4855_v47 = vpop.f32.mrb[16].mxu0 }
 0x407   :  { %v18305_v12 = vpop.f32.mrb[17].mxu0 }
 0x437   :  { %v5339_v5 = vpop.f32.mrb[12].mxu1 }
 0x438   :  { %v24473_v12 = vadd.f32 %v5339_v5, %v4835_v16  ;;  %v18404_v15 = vpop.f32.mrb[13].mxu1 }
 0x43b   :  { %v5345_v46 = vpop.f32.mrb[14].mxu1 }
 0x43c   :  { %v24475_v9 = vadd.f32 %v5345_v46, %v4845_v41  ;;  %v18407_v32 = vpop.f32.mrb[15].mxu1  ;;  %v26833_v41 = vmov 0.0  }
 0x43f   :  { %v5351_v14 = vpop.f32.mrb[16].mxu1 }
 0x440   :  { %v24477_v13 = vadd.f32 %v5351_v14, %v4855_v47  ;;  %v18410_v3 = vpop.f32.mrb[17].mxu1 }
 0x441   :  { %v26834_v3 = vmov 0.0|0.0  }
 0x446   :  { %v5963_v25 = vpop.f32.mrb[18].mxu0 }
 0x447   :  { %v5996_v17 = vsel %vm5994_vm7, %v5963_v25, 0  ;;  %v18530_v50 = vpop.f32.mrb[19].mxu0 }
 0x448   :  { %v24480_v4 = vand.u32 4294901760, %v5996_v17 }
 0x44a   :  { %v24483_v22 = vsub.f32 %v5996_v17, %v24480_v4  ;;  %v5969_v16 = vpop.f32.mrb[20].mxu0  ;;  %v24504_v17 = vld [vmem:[%s26702_s4] sm:$0xff] }
 0x44b   :  { %v5999_v15 = vsel %vm5994_vm7, %v5969_v16, 0  ;;  %v18533_v46 = vpop.f32.mrb[21].mxu0 }
 0x44c   :  { %v6085_v20 = vand.u32 4294901760, %v24483_v22  ;;  %v24487_v54 = vand.u32 4294901760, %v5999_v15  ;;  %v24523_v46 = vld [vmem:[%s26702_s4 + $0x18] sm:$0xff] }
 0x44e   :  { %v6086_v58 = vsub.f32 %v24483_v22, %v6085_v20  ;;  %v24491_v45 = vsub.f32 %v5999_v15, %v24487_v54  ;;  %v5975_v47 = vpop.f32.mrb[22].mxu0  ;;  %18677 = vmatmul.mubr.f32.vlgmr.msra.gmra.mrb[24].mxu0 %v6085_v20  ;;  %v24518_v15 = vld [vmem:[%s26702_s4 + $0x10] sm:$0xff]  ;;  %v26748_v20 = vand.u32 4294901760, %v24504_v17 }
 0x44f   :  { %v6002_v5 = vsel %vm5994_vm7, %v5975_v47, 0  ;;  %21194 = vmatpush3.bf16.msra.mxu0 %v24289_v30  ;;  %v18536_v52 = vpop.f32.mrb[23].mxu0  ;;  %18679 = vmatprep.mubr.msk.f32.mxu0 %vm22701_vm4, %v26833_v41  ;;  %v24509_v30 = vld [vmem:[%s26702_s4 + $0x8] sm:$0xff] }
 0x450   :  { %v6087_v32 = vand.u32 4294901760, %v6086_v58  ;;  %v24497_v14 = vand.u32 4294901760, %v6002_v5  ;;  %21195 = vmatprep.subr.bf16.mxu0 %v26834_v3  ;;  %v6095_v25 = vand.u32 4294901760, %v24491_v45  ;;  %v26747_v58 = vand.u32 4294901760, %v24509_v30 }
 0x452   :  { %v24512_v50 = vsub.f32 %v6002_v5, %v24497_v14  ;;  %18566 = vmatmul.mubr.f32.vlgmr.msra.gmra.mrb[18].mxu1 %v6087_v32  ;;  %18680 = vmatmul.mubr.f32.gmra.mrb[26].mxu0 %v6095_v25  ;;  %v6096_v16 = vsub.f32 %v24491_v45, %v6095_v25  ;;  %v24542_v32 = vld [vmem:[%s26702_s4 + $0x20] sm:$0xff]  ;;  %v24547_v25 = vld [vmem:[%s26702_s4 + $0x28] sm:$0xff] }
 0x453   :  { %21110 = vmatpush3.bf16.msra.mxu1 %v24405_v21  ;;  %21197 = vmatpush3.bf16.msra.mxu0 %v24305_v2  ;;  %v26750_v21 = vand.u32 4294901760, %v24518_v15  ;;  %v26751_v2 = vand.u32 4294901760, %v24523_v46 }
 0x454   :  { %18568 = vmatprep.mubr.msk.f32.mxu1 %vm22701_vm4, %v26833_v41  ;;  %21111 = vmatprep.subr.bf16.mxu1 %v26834_v3  ;;  %v6097_v47 = vand.u32 4294901760, %v6096_v16  ;;  %v6105_v5 = vand.u32 4294901760, %v24512_v50  ;;  %v24554_v16 = vsub.f32 %v24504_v17, %v26748_v20  ;;  %v26755_v20 = vand.u32 4294901760, %v24547_v25 }
 0x455   :  { %18682 = vmatprep.mubr.msk.f32.mxu0 %vm22701_vm4, %v26833_v41  ;;  %21198 = vmatprep.subr.bf16.mxu0 %v26834_v3 }
 0x456   :  { %18569 = vmatmul.mubr.f32.gmra.mrb[20].mxu1 %v6097_v47  ;;  %18683 = vmatmul.mubr.f32.gmra.mrb[28].mxu0 %v6105_v5  ;;  %v6106_v52 = vsub.f32 %v24512_v50, %v6105_v5  ;;  %26835 = vst [vmem:[#allocation18_spill] sm:$0xff] %v24554_v16  ;;  %v24559_v47 = vsub.f32 %v24509_v30, %v26747_v58  ;;  %v26753_v58 = vand.u32 4294901760, %v24542_v32 }
 0x457   :  { %21113 = vmatpush3.bf16.msra.mxu1 %v24411_v6  ;;  %21200 = vmatpush3.bf16.msra.mxu0 %v24317_v24  ;;  %v24570_v24 = vsub.f32 %v24518_v15, %v26750_v21  ;;  %v24575_v6 = vsub.f32 %v24523_v46, %v26751_v2  ;;  %v24586_v21 = vld [vmem:[%s26702_s4 + $0x30] sm:$0xff]  ;;  %v24591_v2 = vld [vmem:[%s26702_s4 + $0x38] sm:$0xff]  ;;  %v24607_v48 = vsub.f32 %v24547_v25, %v26755_v20  ;;  %v24622_v20 = vld [vmem:[%s26702_s4 + $0x40] sm:$0xff] }
 0x458   :  { %26836 = vst [vmem:[#allocation19_spill] sm:$0xff] %v24559_v47  ;;  %18571 = vmatprep.mubr.msk.f32.mxu1 %vm22701_vm4, %v26833_v41  ;;  %21114 = vmatprep.subr.bf16.mxu1 %v26834_v3  ;;  %v6107_v5 = vand.u32 4294901760, %v6106_v52  ;;  %v26845_v11 = vand.u32 4294901760, %v24586_v21  ;;  %v26846_v7 = vand.u32 4294901760, %v24591_v2 }
 0x459   :  { %21201 = vmatprep.subr.bf16.mxu0 %v26834_v3  ;;  %18750 = vmatprep.mubr.msk.f32.mxu0 %vm22701_vm4, %v26833_v41  ;;  %26837 = vst [vmem:[#allocation20_spill] sm:$0xff] %v24570_v24  ;;  %26838 = vst [vmem:[#allocation21_spill] sm:$0xff] %v24575_v6 }
 0x45a   :  { %18572 = vmatmul.mubr.f32.gmra.mrb[22].mxu1 %v6107_v5  ;;  %v24602_v5 = vsub.f32 %v24542_v32, %v26753_v58  ;;  %26840 = vst [vmem:[#allocation23_spill] sm:$0xff] %v24607_v48  ;;  %v26842_v58 = vand.u32 4294901760, %v24559_v47  ;;  %v24642_v10 = vsub.f32 %v24586_v21, %v26845_v11  ;;  %v24658_v11 = vld [vmem:[%s26702_s4 + $0x50] sm:$0xff] }
 0x45b   :  { %21116 = vmatpush3.bf16.msra.mxu1 %v24417_v63  ;;  %21203 = vmatpush3.bf16.msra.mxu0 %v24329_v62  ;;  %v26841_v63 = vand.u32 4294901760, %v24554_v16 }
 0x45c   :  { %21117 = vmatprep.subr.bf16.mxu1 %v26834_v3  ;;  %21204 = vmatprep.subr.bf16.mxu0 %v26834_v3  ;;  %26839 = vst [vmem:[#allocation22_spill] sm:$0xff] %v24602_v5  ;;  %v6834_v43 = vsub.f32 %v24559_v47, %v26842_v58  ;;  %v26844_v58 = vand.u32 4294901760, %v24575_v6  ;;  %v26771_v52 = vand.u32 4294901760, %v24602_v5  ;;  %v24647_v47 = vsub.f32 %v24591_v2, %v26846_v7  ;;  %v24663_v7 = vld [vmem:[%s26702_s4 + $0x58] sm:$0xff] }
 0x45d   :  { %18602 = vmatprep.mubr.msk.f32.mxu1 %vm22701_vm4, %v26833_v41  ;;  %v6827_v62 = vsub.f32 %v24554_v16, %v26841_v63  ;;  %v26848_v16 = vand.u32 4294901760, %v24622_v20 }
 0x45e   :  { %v6848_v63 = vsub.f32 %v24575_v6, %v26844_v58  ;;  %v6835_v49 = vand.u32 4294901760, %v6834_v43  ;;  %v6855_v43 = vsub.f32 %v24602_v5, %v26771_v52  ;;  %v26776_v6 = vand.u32 4294901760, %v24647_v47 }
 0x45f   :  { %21119 = vmatpush3.bf16.msra.mxu1 %v24423_v60  ;;  %21206 = vmatpush3.bf16.msra.mxu0 %v24349_v34  ;;  %v26843_v34 = vand.u32 4294901760, %v24570_v24  ;;  %v6828_v58 = vand.u32 4294901760, %v6827_v62  ;;  %v24676_v28 = vsub.f32 %v24622_v20, %v26848_v16  ;;  %v24692_v16 = vld [vmem:[%s26702_s4 + $0x60] sm:$0xff] }
 0x460   :  { %21120 = vmatprep.subr.bf16.mxu1 %v26834_v3  ;;  %21207 = vmatprep.subr.bf16.mxu0 %v26834_v3 }
 0x461   :  { %v6841_v60 = vsub.f32 %v24570_v24, %v26843_v34  ;;  %26849 = vst [vmem:[#allocation24_spill] sm:$0xff] %v24676_v28  ;;  %v21235_v52 = vpack.c.bf16 %v6835_v49, %v6828_v58  ;;  %v6856_v49 = vand.u32 4294901760, %v6855_v43  ;;  %v26854_v43 = vand.u32 4294901760, %v24663_v7 }
 0x463   :  { %21122 = vmatpush3.bf16.msra.mxu1 %v24429_v33  ;;  %21209 = vmatpush3.bf16.msra.mxu0 %v24369_v59  ;;  %v6842_v24 = vand.u32 4294901760, %v6841_v60  ;;  %v6849_v33 = vand.u32 4294901760, %v6848_v63  ;;  %v26847_v59 = vand.u32 4294901760, %v24607_v48  ;;  %v26850_v60 = vand.u32 4294901760, %v24627_v31 }
 0x464   :  { %21123 = vmatprep.subr.bf16.mxu1 %v26834_v3  ;;  %21210 = vmatprep.subr.bf16.mxu0 %v26834_v3 }
 0x465   :  { %v6862_v62 = vsub.f32 %v24607_v48, %v26847_v59  ;;  %v24681_v63 = vsub.f32 %v24627_v31, %v26850_v60  ;;  %v26852_v60 = vand.u32 4294901760, %v24642_v10  ;;  %v6876_v59 = vsub.f32 %v24647_v47, %v26776_v6 }
 0x466   :  { %v26777_v48 = vand.u32 4294901760, %v24676_v28 }
 0x467   :  { %26851 = vst [vmem:[#allocation25_spill] sm:$0xff] %v24681_v63  ;;  %21125 = vmatpush3.bf16.msra.mxu1 %v24435_v42  ;;  %21212 = vmatpush3.bf16.msra.mxu0 %v24380_v37  ;;  %v24697_v42 = vld [vmem:[%s26702_s4 + $0x68] sm:$0xff]  ;;  %v21238_v37 = vpack.c.bf16 %v6849_v33, %v6842_v24  ;;  %v6863_v58 = vand.u32 4294901760, %v6862_v62  ;;  %v6869_v34 = vsub.f32 %v24642_v10, %v26852_v60  ;;  %v26780_v5 = vand.u32 4294901760, %v24681_v63 }
 0x468   :  { %21126 = vmatprep.subr.bf16.mxu1 %v26834_v3  ;;  %21234 = vmatprep.subr.bf16.mxu0 %v26834_v3  ;;  %v26853_v24 = vand.u32 4294901760, %v24658_v11  ;;  %v24717_v62 = vsub.f32 %v24663_v7, %v26854_v43  ;;  %v6883_v43 = vsub.f32 %v24676_v28, %v26777_v48  ;;  %v26855_v60 = vpack.c.bf16 %v24293_v0, %v24291_v56 }
 0x469   :  { %v6890_v6 = vsub.f32 %v24681_v63, %v26780_v5  ;;  %v26857_v48 = vand.u32 4294901760, %v24697_v42 }
 0x46a   :  { %18751 = vmatmul.mubr.f32.vlgmr.msra.gmra.mrb[30].mxu0 %v24480_v4  ;;  %v24712_v33 = vsub.f32 %v24658_v11, %v26853_v24  ;;  %v6877_v24 = vand.u32 4294901760, %v6876_v59  ;;  %v6884_v0 = vand.u32 4294901760, %v6883_v43 }
 0x46b   :  { %21128 = vmatpush3.bf16.msra.mxu1 %v24439_v29  ;;  %21236 = vmatpush3.bf16.msra.mxu0 %v21235_v52  ;;  %v21241_v29 = vpack.c.bf16 %v6863_v58, %v6856_v49  ;;  %v6870_v52 = vand.u32 4294901760, %v6869_v34  ;;  %v6903_v58 = vand.u32 4294901760, %v24717_v62  ;;  %v26856_v34 = vand.u32 4294901760, %v24692_v16 }
 0x46c   :  { %18753 = vmatprep.mubr.msk.f32.mxu0 %vm22701_vm4, %v26833_v41  ;;  %21129 = vmatprep.subr.bf16.mxu1 %v26834_v3  ;;  %v6896_v49 = vand.u32 4294901760, %v24712_v33  ;;  %v24746_v28 = vsub.f32 %v24697_v42, %v26857_v48  ;;  %v26858_v48 = vpack.c.bf16 %v24343_v36, %v24341_v38  ;;  %v26859_v36 = vpack.c.bf16 %v24347_v23, %v24345_v55 }
 0x46d   :  { %21237 = vmatprep.subr.bf16.mxu0 %v26834_v3  ;;  %v24741_v59 = vsub.f32 %v24692_v16, %v26856_v34  ;;  %v21244_v56 = vpack.c.bf16 %v6877_v24, %v6870_v52  ;;  %v6904_v34 = vsub.f32 %v24717_v62, %v6903_v58  ;;  %v26860_v55 = vpack.c.bf16 %v24359_v57, %v24357_v18 }
 0x46e   :  { %18603 = vmatmul.mubr.f32.vlgmr.msra.gmra.mrb[24].mxu1 %v24480_v4  ;;  %18754 = vmatmul.mubr.f32.gmra.mrb[32].mxu0 %v24487_v54  ;;  %v6917_v63 = vand.u32 4294901760, %v24746_v28  ;;  %v6706_v18 = vsel %vm5994_vm7, %v24473_v12, 0  ;;  %v26862_v57 = vpack.c.bf16 %v24397_v61, %v24395_v26  ;;  %v6709_v12 = vsel %vm5994_vm7, %v24475_v9, 0 }
 0x46f   :  { %21131 = vmatpush3.bf16.msra.mxu1 %v26855_v60  ;;  %21239 = vmatpush3.bf16.msra.mxu0 %v21238_v37  ;;  %v6891_v37 = vand.u32 4294901760, %v6890_v6  ;;  %v6897_v60 = vsub.f32 %v24712_v33, %v6896_v49  ;;  %v6910_v5 = vand.u32 4294901760, %v24741_v59  ;;  %v26865_v26 = vpack.c.bf16 %v24401_v27, %v24399_v19 }
 0x470   :  { %18605 = vmatprep.mubr.msk.f32.mxu1 %vm22701_vm4, %v26833_v41  ;;  %18756 = vmatprep.mubr.msk.f32.mxu0 %vm22701_vm4, %v26833_v41  ;;  %v6918_v24 = vsub.f32 %v24746_v28, %v6917_v63  ;;  %v26866_v61 = vand.u32 4294901760, %v24518_v15  ;;  %v6712_v9 = vsel %vm5994_vm7, %v24477_v13, 0  ;;  %v26868_v19 = vand.u32 4294901760, %v24542_v32 }
 0x471   :  { %21132 = vmatprep.subr.bf16.mxu1 %v26834_v3  ;;  %21240 = vmatprep.subr.bf16.mxu0 %v26834_v3  ;;  %v21247_v38 = vpack.c.bf16 %v6891_v37, %v6884_v0  ;;  %v6898_v6 = vand.u32 4294901760, %v6897_v60  ;;  %v6911_v52 = vsub.f32 %v24741_v59, %v6910_v5  ;;  %v26861_v0 = vpack.c.bf16 %v24363_v44, %v24361_v40 }
 0x472   :  { %18606 = vmatmul.mubr.f32.gmra.mrb[26].mxu1 %v24487_v54  ;;  %18757 = vmatmul.mubr.f32.gmra.mrb[34].mxu0 %v24497_v14  ;;  %v26864_v60 = vand.u32 4294901760, %v24509_v30  ;;  %v24808_v44 = vand.u32 4294901760, %v6706_v18  ;;  %v26869_v27 = vand.u32 4294901760, %v24547_v25  ;;  %v26871_v13 = vand.u32 4294901760, %v24591_v2 }
 0x473   :  { %21134 = vmatpush3.bf16.msra.mxu1 %v26858_v48  ;;  %21242 = vmatpush3.bf16.msra.mxu0 %v21241_v29  ;;  %v6905_v29 = vand.u32 4294901760, %v6904_v34  ;;  %v6912_v43 = vand.u32 4294901760, %v6911_v52  ;;  %v26863_v48 = vand.u32 4294901760, %v24504_v17  ;;  %v26867_v17 = vand.u32 4294901760, %v24523_v46 }
 0x474   :  { %18608 = vmatprep.mubr.msk.f32.mxu1 %vm22701_vm4, %v26833_v41  ;;  %21135 = vmatprep.subr.bf16.mxu1 %v26834_v3  ;;  %v24825_v34 = vand.u32 4294901760, %v6709_v12  ;;  %v24841_v15 = vpack.c.bf16 %v26869_v27, %v26868_v19  ;;  %v24843_v46 = vand.u32 4294901760, %v6712_v9 }
 0x475   :  { %21243 = vmatprep.subr.bf16.mxu0 %v26834_v3  ;;  %18824 = vmatprep.mubr.msk.f32.mxu0 %vm22701_vm4, %v26833_v41  ;;  %v21250_v23 = vpack.c.bf16 %v6905_v29, %v6898_v6  ;;  %v24806_v40 = vpack.c.bf16 %v26864_v60, %v26863_v48  ;;  %v24823_v30 = vpack.c.bf16 %v26867_v17, %v26866_v61  ;;  %v26881_v6 = vld [vmem:[#allocation20_spill] sm:$0xff]  ;;  %v26882_v29 = vld [vmem:[#allocation21_spill] sm:$0xff] }
 0x476   :  { %18609 = vmatmul.mubr.f32.gmra.mrb[28].mxu1 %v24497_v14  ;;  %v21259_v52 = vpack.c.bf16 %v26882_v29, %v26881_v6  ;;  %v21271_v60 = vpack.c.bf16 %v24717_v62, %v24712_v33  ;;  %v26889_v17 = vand.u32 4294901760, %v26881_v6  ;;  %v15819_v62 = vld [vmem:[%s26700_s2 + $0x40] sm:$0xf] }
 0x477   :  { %21137 = vmatpush3.bf16.msra.mxu1 %v26859_v36  ;;  %21245 = vmatpush3.bf16.msra.mxu0 %v21244_v56  ;;  %v6919_v56 = vand.u32 4294901760, %v6918_v24 }
 0x478   :  { %21138 = vmatprep.subr.bf16.mxu1 %v26834_v3  ;;  %21246 = vmatprep.subr.bf16.mxu0 %v26834_v3 }
 0x479   :  { %18639 = vmatprep.mubr.msk.f32.mxu1 %vm22701_vm4, %v26833_v41  ;;  %v21253_v37 = vpack.c.bf16 %v6919_v56, %v6912_v43  ;;  %v26884_v43 = vld [vmem:[#allocation23_spill] sm:$0xff] }
 0x47a   :  { %v26892_v27 = vand.u32 4294901760, %v26884_v43 }
 0x47b   :  { %21140 = vmatpush3.bf16.msra.mxu1 %v26860_v55  ;;  %21248 = vmatpush3.bf16.msra.mxu0 %v21247_v38 }
 0x47c   :  { %21141 = vmatprep.subr.bf16.mxu1 %v26834_v3  ;;  %21249 = vmatprep.subr.bf16.mxu0 %v26834_v3 }
 0x47f   :  { %21143 = vmatpush3.bf16.msra.mxu1 %v26861_v0  ;;  %21251 = vmatpush3.bf16.msra.mxu0 %v21250_v23  ;;  %v26883_v23 = vld [vmem:[#allocation22_spill] sm:$0xff] }
 0x480   :  { %21144 = vmatprep.subr.bf16.mxu1 %v26834_v3  ;;  %21252 = vmatprep.subr.bf16.mxu0 %v26834_v3  ;;  %v21262_v56 = vpack.c.bf16 %v26884_v43, %v26883_v23  ;;  %v26891_v19 = vand.u32 4294901760, %v26883_v23 }
 0x483   :  { %21146 = vmatpush3.bf16.msra.mxu1 %v26862_v57  ;;  %21254 = vmatpush3.bf16.msra.mxu0 %v21253_v37  ;;  %v21265_v37 = vpack.c.bf16 %v24647_v47, %v24642_v10  ;;  %v26886_v57 = vld [vmem:[#allocation25_spill] sm:$0xff] }
 0x484   :  { %21147 = vmatprep.subr.bf16.mxu1 %v26834_v3  ;;  %21276 = vmatprep.subr.bf16.mxu0 %v26834_v3 }
 0x486   :  { %18825 = vmatmul.mubr.f32.vlgmr.msra.gmra.mrb[36].mxu0 %v24808_v44 }
 0x487   :  { %21149 = vmatpush3.bf16.msra.mxu1 %v26865_v26  ;;  %21278 = vmatpush3.bf16.msra.mxu0 %v24806_v40 }
 0x488   :  { %18827 = vmatprep.mubr.msk.f32.mxu0 %vm22701_vm4, %v26833_v41  ;;  %21171 = vmatprep.subr.bf16.mxu1 %v26834_v3 }
 0x489   :  { %21279 = vmatprep.subr.bf16.mxu0 %v26834_v3 }
 0x48a   :  { %18640 = vmatmul.mubr.f32.vlgmr.msra.gmra.mrb[30].mxu1 %v24483_v22  ;;  %18828 = vmatmul.mubr.f32.gmra.mrb[38].mxu0 %v24825_v34 }
 0x48b   :  { %21173 = vmatpush3.bf16.msra.mxu1 %v24459_v53  ;;  %21281 = vmatpush3.bf16.msra.mxu0 %v24823_v30  ;;  %v26870_v53 = vand.u32 4294901760, %v24586_v21 }
 0x48c   :  { %18642 = vmatprep.mubr.msk.f32.mxu1 %vm22701_vm4, %v26833_v41  ;;  %18830 = vmatprep.mubr.msk.f32.mxu0 %vm22701_vm4, %v26833_v41 }
 0x48d   :  { %21174 = vmatprep.subr.bf16.mxu1 %v26834_v3  ;;  %21282 = vmatprep.subr.bf16.mxu0 %v26834_v3  ;;  %v21223_v22 = vpack.c.bf16 %v26871_v13, %v26870_v53  ;;  %v26893_v53 = vand.u32 4294901760, %v24642_v10  ;;  %v26894_v13 = vand.u32 4294901760, %v24647_v47  ;;  %v15817_v10 = vld [vmem:[%s26700_s2 + $0x30] sm:$0xff]  ;;  %v21313_v47 = vpack.c.bf16 %v6903_v58, %v6896_v49 }
 0x48e   :  { %18643 = vmatmul.mubr.f32.gmra.mrb[32].mxu1 %v24491_v45  ;;  %18831 = vmatmul.mubr.f32.gmra.mrb[40].mxu0 %v24843_v46  ;;  %v26873_v45 = vand.u32 4294901760, %v24627_v31  ;;  %v26876_v31 = vand.u32 4294901760, %v24692_v16 }
 0x48f   :  { %21176 = vmatpush3.bf16.msra.mxu1 %v24461_v1  ;;  %21284 = vmatpush3.bf16.msra.mxu0 %v24841_v15  ;;  %v26872_v1 = vand.u32 4294901760, %v24622_v20  ;;  %v26877_v20 = vand.u32 4294901760, %v24697_v42 }
 0x490   :  { %18645 = vmatprep.mubr.msk.f32.mxu1 %vm22701_vm4, %v26833_v41  ;;  %21177 = vmatprep.subr.bf16.mxu1 %v26834_v3 }
 0x491   :  { %21285 = vmatprep.subr.bf16.mxu0 %v26834_v3  ;;  %18898 = vmatprep.mubr.msk.f32.mxu0 %vm22701_vm4, %v26833_v41  ;;  %v21226_v21 = vpack.c.bf16 %v26873_v45, %v26872_v1  ;;  %v21232_v32 = vpack.c.bf16 %v26877_v20, %v26876_v31  ;;  %v26896_v45 = vand.u32 4294901760, %v26886_v57  ;;  %v21316_v31 = vpack.c.bf16 %v6917_v63, %v6910_v5 }
 0x492   :  { %18646 = vmatmul.mubr.f32.gmra.mrb[34].mxu1 %v24512_v50  ;;  %v26874_v50 = vand.u32 4294901760, %v24658_v11  ;;  %v26878_v11 = vld [vmem:[#allocation17_spill] sm:$0xff]  ;;  %v7426_v20 = vsel %vm4744_vm5, %v15819_v62, 0 }
 0x493   :  { %21179 = vmatpush3.bf16.msra.mxu1 %v24463_v39  ;;  %21287 = vmatpush3.bf16.msra.mxu0 %v21223_v22  ;;  %v26875_v39 = vand.u32 4294901760, %v24663_v7  ;;  %v24902_v7 = vsub.f32 %v6712_v9, %v24843_v46  ;;  %v25048_v63 = vand.u32 4294901760, %v7426_v20 }
 0x494   :  { %21180 = vmatprep.subr.bf16.mxu1 %v26834_v3  ;;  %21288 = vmatprep.subr.bf16.mxu0 %v26834_v3 }
 0x495   :  { %18713 = vmatprep.mubr.msk.f32.mxu1 %vm22701_vm4, %v26833_v41  ;;  %v21229_v2 = vpack.c.bf16 %v26875_v39, %v26874_v50  ;;  %v6815_v16 = vand.u32 4294901760, %v24902_v7  ;;  %v7420_v50 = vsel %vm4744_vm5, %v15817_v10, 0  ;;  %v15818_v39 = vld [vmem:[%s26700_s2 + $0x38] sm:$0xff]  ;;  %v15820_v10 = vld [vmem:[%s26702_s4 + $0xe0] sm:$0xff] }
 0x496   :  { %v7423_v33 = vsel %vm4744_vm5, %v15818_v39, 0 }
 0x497   :  { %21182 = vmatpush3.bf16.msra.mxu1 %v24465_v51  ;;  %21290 = vmatpush3.bf16.msra.mxu0 %v21226_v21  ;;  %v24888_v51 = vsub.f32 %v6706_v18, %v24808_v44  ;;  %v6816_v55 = vsub.f32 %v24902_v7, %v6815_v16  ;;  %v26885_v18 = vld [vmem:[#allocation24_spill] sm:$0xff]  ;;  %v25039_v58 = vand.u32 4294901760, %v7423_v33 }
 0x498   :  { %21183 = vmatprep.subr.bf16.mxu1 %v26834_v3  ;;  %21291 = vmatprep.subr.bf16.mxu0 %v26834_v3  ;;  %v21268_v48 = vpack.c.bf16 %v26886_v57, %v26885_v18  ;;  %v26895_v1 = vand.u32 4294901760, %v26885_v18  ;;  %v26906_v18 = vld [vmem:[#allocation7_spill] sm:$0xff] }
 0x499   :  { %v6795_v25 = vand.u32 4294901760, %v24888_v51  ;;  %v6817_v0 = vand.u32 4294901760, %v6816_v55  ;;  %v25046_v5 = vsub.f32 %v7423_v33, %v25039_v58  ;;  %v15823_v33 = vld [vmem:[%s26702_s4 + $0xf8] sm:$0xff] }
 0x49b   :  { %21185 = vmatpush3.bf16.msra.mxu1 %v24467_v35  ;;  %21293 = vmatpush3.bf16.msra.mxu0 %v21229_v2  ;;  %v24895_v35 = vsub.f32 %v6709_v12, %v24825_v34 }
 0x49c   :  { %21186 = vmatprep.subr.bf16.mxu1 %v26834_v3  ;;  %21294 = vmatprep.subr.bf16.mxu0 %v26834_v3 }
 0x49f   :  { %21188 = vmatpush3.bf16.msra.mxu1 %v24469_v8  ;;  %21296 = vmatpush3.bf16.msra.mxu0 %v21232_v32  ;;  %v6805_v8 = vand.u32 4294901760, %v24895_v35 }
 0x4a0   :  { %21189 = vmatprep.subr.bf16.mxu1 %v26834_v3  ;;  %21318 = vmatprep.subr.bf16.mxu0 %v26834_v3 }
 0x4a1   :  { %v6806_v36 = vsub.f32 %v24895_v35, %v6805_v8 }
 0x4a2   :  { %18899 = vmatmul.mubr.f32.vlgmr.msra.gmra.mrb[42].mxu0 %v6795_v25 }
 0x4a3   :  { %21191 = vmatpush3.bf16.msra.mxu1 %v26878_v11  ;;  %21320 = vmatpush3.bf16.msra.mxu0 %v24806_v40  ;;  %v6807_v24 = vand.u32 4294901760, %v6806_v36  ;;  %v26905_v36 = vld [vmem:[#allocation13_spill] sm:$0xff] }
 0x4a4   :  { %18901 = vmatprep.mubr.msk.f32.mxu0 %vm22701_vm4, %v26833_v41  ;;  %21213 = vmatprep.subr.bf16.mxu1 %v26834_v3 }
 0x4a5   :  { %21321 = vmatprep.subr.bf16.mxu0 %v26834_v3 }
 0x4a6   :  { %18714 = vmatmul.mubr.f32.vlgmr.msra.gmra.mrb[36].mxu1 %v24480_v4  ;;  %18902 = vmatmul.mubr.f32.gmra.mrb[44].mxu0 %v6805_v8  ;;  %v6796_v4 = vsub.f32 %v24888_v51, %v6795_v25  ;;  %v26898_v25 = vld [vmem:[#allocation6_spill] sm:$0xff] }
 0x4a7   :  { %21215 = vmatpush3.bf16.msra.mxu1 %v24806_v40  ;;  %21323 = vmatpush3.bf16.msra.mxu0 %v24823_v30  ;;  %v21274_v40 = vpack.c.bf16 %v24746_v28, %v24741_v59  ;;  %v26897_v59 = vld [vmem:[#allocation8_spill] sm:$0xff] }
 0x4a8   :  { %18716 = vmatprep.mubr.msk.f32.mxu1 %vm22701_vm4, %v26833_v41  ;;  %18904 = vmatprep.mubr.msk.f32.mxu0 %vm22701_vm4, %v26833_v41  ;;  %v6797_v38 = vand.u32 4294901760, %v6796_v4  ;;  %v26900_v4 = vld [vmem:[#allocation11_spill] sm:$0xff] }
 0x4a9   :  { %21216 = vmatprep.subr.bf16.mxu1 %v26834_v3  ;;  %21324 = vmatprep.subr.bf16.mxu0 %v26834_v3 }
 0x4aa   :  { %18717 = vmatmul.mubr.f32.gmra.mrb[38].mxu1 %v24487_v54  ;;  %18905 = vmatmul.mubr.f32.gmra.mrb[46].mxu0 %v6815_v16  ;;  %v26879_v54 = vld [vmem:[#allocation18_spill] sm:$0xff] }
 0x4ab   :  { %21218 = vmatpush3.bf16.msra.mxu1 %v24823_v30  ;;  %21326 = vmatpush3.bf16.msra.mxu0 %v24841_v15  ;;  %v26887_v12 = vand.u32 4294901760, %v26879_v54  ;;  %v26890_v30 = vand.u32 4294901760, %v26882_v29 }
 0x4ac   :  { %18719 = vmatprep.mubr.msk.f32.mxu1 %vm22701_vm4, %v26833_v41  ;;  %21219 = vmatprep.subr.bf16.mxu1 %v26834_v3 }
 0x4ad   :  { %21327 = vmatprep.subr.bf16.mxu0 %v26834_v3  ;;  %18972 = vmatprep.mubr.msk.f32.mxu0 %vm22701_vm4, %v26833_v41  ;;  %v21301_v9 = vpack.c.bf16 %v26890_v30, %v26889_v17 }
 0x4ae   :  { %18720 = vmatmul.mubr.f32.gmra.mrb[40].mxu1 %v24497_v14  ;;  %v26880_v14 = vld [vmem:[#allocation19_spill] sm:$0xff] }
 0x4af   :  { %21221 = vmatpush3.bf16.msra.mxu1 %v24841_v15  ;;  %21329 = vmatpush3.bf16.msra.mxu0 %v21223_v22  ;;  %v21256_v42 = vpack.c.bf16 %v26880_v14, %v26879_v54  ;;  %v26888_v26 = vand.u32 4294901760, %v26880_v14  ;;  %v21304_v15 = vpack.c.bf16 %v26892_v27, %v26891_v19  ;;  %v26901_v54 = vld [vmem:[#allocation14_spill] sm:$0xff]  ;;  %v26902_v14 = vld [vmem:[#allocation16_spill] sm:$0xff] }
 0x4b0   :  { %21222 = vmatprep.subr.bf16.mxu1 %v26834_v3  ;;  %21330 = vmatprep.subr.bf16.mxu0 %v26834_v3 }
 0x4b1   :  { %18787 = vmatprep.mubr.msk.f32.mxu1 %vm22701_vm4, %v26833_v41  ;;  %v21298_v61 = vpack.c.bf16 %v26888_v26, %v26887_v12 }
 0x4b3   :  { %21224 = vmatpush3.bf16.msra.mxu1 %v21223_v22  ;;  %21332 = vmatpush3.bf16.msra.mxu0 %v21226_v21  ;;  %v21307_v22 = vpack.c.bf16 %v26894_v13, %v26893_v53 }
 0x4b4   :  { %21225 = vmatprep.subr.bf16.mxu1 %v26834_v3  ;;  %21333 = vmatprep.subr.bf16.mxu0 %v26834_v3 }
 0x4b7   :  { %21227 = vmatpush3.bf16.msra.mxu1 %v21226_v21  ;;  %21335 = vmatpush3.bf16.msra.mxu0 %v21229_v2  ;;  %v21310_v21 = vpack.c.bf16 %v26896_v45, %v26895_v1 }
 0x4b8   :  { %21228 = vmatprep.subr.bf16.mxu1 %v26834_v3  ;;  %21336 = vmatprep.subr.bf16.mxu0 %v26834_v3 }
 0x4bb   :  { %21230 = vmatpush3.bf16.msra.mxu1 %v21229_v2  ;;  %21338 = vmatpush3.bf16.msra.mxu0 %v21232_v32  ;;  %v25025_v2 = vand.u32 4294901760, %v7420_v50 }
 0x4bc   :  { %21231 = vmatprep.subr.bf16.mxu1 %v26834_v3  ;;  %21393 = vmatprep.subr.bf16.mxu0 %v26834_v3 }
 0x4bd   :  { %v25037_v49 = vsub.f32 %v7420_v50, %v25025_v2  ;;  %v15822_v50 = vld [vmem:[%s26702_s4 + $0xf0] sm:$0xff] }
 0x4be   :  { %18973 = vmatmul.mubr.f32.vlgmr.msra.gmra.mrb[48].mxu0 %v24808_v44  ;;  %v8056_v62 = vand.u32 4294901760, %v15822_v50 }
 0x4bf   :  { %21233 = vmatpush3.bf16.msra.mxu1 %v21232_v32  ;;  %18975 = vmatprep.mubr.msk.f32.mxu0 %vm22701_vm4, %v26833_v41  ;;  %v7501_v28 = vand.u32 4294901760, %v25037_v49  ;;  %v7511_v32 = vand.u32 4294901760, %v25046_v5 }
 0x4c0   :  { %21255 = vmatprep.subr.bf16.mxu1 %v26834_v3 }
 0x4c2   :  { %18788 = vmatmul.mubr.f32.vlgmr.msra.gmra.mrb[42].mxu1 %v6797_v38  ;;  %18976 = vmatmul.mubr.f32.gmra.mrb[50].mxu0 %v24825_v34  ;;  %v26904_v38 = vld [vmem:[#allocation9_spill] sm:$0xff] }
 0x4c3   :  { %21257 = vmatpush3.bf16.msra.mxu1 %v21256_v42  ;;  %18790 = vmatprep.mubr.msk.f32.mxu1 %vm22701_vm4, %v26833_v41  ;;  %v26903_v42 = vld [vmem:[#allocation5_spill] sm:$0xff] }
 0x4c4   :  { %18978 = vmatprep.mubr.msk.f32.mxu0 %vm22701_vm4, %v26833_v41  ;;  %21258 = vmatprep.subr.bf16.mxu1 %v26834_v3 }
 0x4c6   :  { %18791 = vmatmul.mubr.f32.gmra.mrb[44].mxu1 %v6807_v24  ;;  %18979 = vmatmul.mubr.f32.gmra.mrb[52].mxu0 %v24843_v46 }
 0x4c7   :  { %21260 = vmatpush3.bf16.msra.mxu1 %v21259_v52  ;;  %18793 = vmatprep.mubr.msk.f32.mxu1 %vm22701_vm4, %v26833_v41 }
 0x4c8   :  { %21261 = vmatprep.subr.bf16.mxu1 %v26834_v3  ;;  %19135 = vmatprep.mubr.msk.f32.mxu0 %vm22701_vm4, %v26833_v41 }
 0x4ca   :  { %18794 = vmatmul.mubr.f32.gmra.mrb[46].mxu1 %v6817_v0 }
 0x4cb   :  { %21263 = vmatpush3.bf16.msra.mxu1 %v21262_v56  ;;  %18861 = vmatprep.mubr.msk.f32.mxu1 %vm22701_vm4, %v26833_v41 }
 0x4cc   :  { %21264 = vmatprep.subr.bf16.mxu1 %v26834_v3 }
 0x4cf   :  { %21266 = vmatpush3.bf16.msra.mxu1 %v21265_v37 }
 0x4d0   :  { %21267 = vmatprep.subr.bf16.mxu1 %v26834_v3 }
 0x4d3   :  { %21269 = vmatpush3.bf16.msra.mxu1 %v21268_v48 }
 0x4d4   :  { %21270 = vmatprep.subr.bf16.mxu1 %v26834_v3 }
 0x4d7   :  { %21272 = vmatpush3.bf16.msra.mxu1 %v21271_v60  ;;  %v26907_v60 = vld [vmem:[#allocation12_spill] sm:$0xff] }
 0x4d8   :  { %21273 = vmatprep.subr.bf16.mxu1 %v26834_v3 }
 0x4db   :  { %21275 = vmatpush3.bf16.msra.mxu1 %v21274_v40  ;;  %v26908_v40 = vld [vmem:[#allocation15_spill] sm:$0xff] }
 0x4dc   :  { %21297 = vmatprep.subr.bf16.mxu1 %v26834_v3 }
 0x4de   :  { %18862 = vmatmul.mubr.f32.vlgmr.msra.gmra.mrb[48].mxu1 %v24888_v51  ;;  %v25060_v51 = vsub.f32 %v7426_v20, %v25048_v63  ;;  %v8059_v20 = vand.u32 4294901760, %v15823_v33 }
 0x4df   :  { %21299 = vmatpush3.bf16.msra.mxu1 %v21298_v61  ;;  %18864 = vmatprep.mubr.msk.f32.mxu1 %vm22701_vm4, %v26833_v41 }
 0x4e0   :  { %21300 = vmatprep.subr.bf16.mxu1 %v26834_v3  ;;  %v7521_v11 = vand.u32 4294901760, %v25060_v51 }
 0x4e2   :  { %18865 = vmatmul.mubr.f32.gmra.mrb[50].mxu1 %v24895_v35  ;;  %v7522_v16 = vsub.f32 %v25060_v51, %v7521_v11 }
 0x4e3   :  { %21302 = vmatpush3.bf16.msra.mxu1 %v21301_v9  ;;  %18867 = vmatprep.mubr.msk.f32.mxu1 %vm22701_vm4, %v26833_v41 }
 0x4e4   :  { %21303 = vmatprep.subr.bf16.mxu1 %v26834_v3 }
 0x4e6   :  { %18868 = vmatmul.mubr.f32.gmra.mrb[52].mxu1 %v24902_v7  ;;  %v26899_v7 = vld [vmem:[#allocation10_spill] sm:$0xff] }
 0x4e7   :  { %21305 = vmatpush3.bf16.msra.mxu1 %v21304_v15  ;;  %18935 = vmatprep.mubr.msk.f32.mxu1 %vm22701_vm4, %v26833_v41 }
 0x4e8   :  { %21306 = vmatprep.subr.bf16.mxu1 %v26834_v3 }
 0x4eb   :  { %21308 = vmatpush3.bf16.msra.mxu1 %v21307_v22 }
 0x4ec   :  { %21309 = vmatprep.subr.bf16.mxu1 %v26834_v3 }
 0x4ef   :  { %21311 = vmatpush3.bf16.msra.mxu1 %v21310_v21 }
 0x4f0   :  { %21312 = vmatprep.subr.bf16.mxu1 %v26834_v3 }
 0x4f3   :  { %21314 = vmatpush3.bf16.msra.mxu1 %v21313_v47  ;;  %v15821_v47 = vld [vmem:[%s26702_s4 + $0xe8] sm:$0xff] }
 0x4f4   :  { %21315 = vmatprep.subr.bf16.mxu1 %v26834_v3 }
 0x4f7   :  { %21317 = vmatpush3.bf16.msra.mxu1 %v21316_v31  ;;  %v8053_v31 = vand.u32 4294901760, %v15821_v47 }
 0x4f8   :  { %21339 = vmatprep.subr.bf16.mxu1 %v26834_v3 }
 0x4fa   :  { %18936 = vmatmul.mubr.f32.vlgmr.msra.gmra.mrb[54].mxu1 %v24808_v44  ;;  %v7502_v44 = vsub.f32 %v25037_v49, %v7501_v28 }
 0x4fb   :  { %21341 = vmatpush3.bf16.msra.mxu1 %v26897_v59  ;;  %18938 = vmatprep.mubr.msk.f32.mxu1 %vm22701_vm4, %v26833_v41 }
 0x4fc   :  { %21342 = vmatprep.subr.bf16.mxu1 %v26834_v3  ;;  %v7503_v35 = vand.u32 4294901760, %v7502_v44 }
 0x4fe   :  { %18939 = vmatmul.mubr.f32.gmra.mrb[56].mxu1 %v24825_v34  ;;  %v7512_v34 = vsub.f32 %v25046_v5, %v7511_v32 }
 0x4ff   :  { %21344 = vmatpush3.bf16.msra.mxu1 %v26898_v25  ;;  %18941 = vmatprep.mubr.msk.f32.mxu1 %vm22701_vm4, %v26833_v41 }
 0x500   :  { %21345 = vmatprep.subr.bf16.mxu1 %v26834_v3  ;;  %v7513_v8 = vand.u32 4294901760, %v7512_v34  ;;  %v15829_v34 = vld [vmem:[%s26702_s4 + $0x128] sm:$0xff] }
 0x502   :  { %18942 = vmatmul.mubr.f32.gmra.mrb[58].mxu1 %v24843_v46  ;;  %v7523_v46 = vand.u32 4294901760, %v7522_v16 }
 0x503   :  { %21347 = vmatpush3.bf16.msra.mxu1 %v26899_v7  ;;  %18993 = vmatprep.mubr.msk.f32.mxu1 %vm22701_vm4, %v26833_v41 }
 0x504   :  { %21348 = vmatprep.subr.bf16.mxu1 %v26834_v3 }
 0x506   :  { %18994 = vmatmul.mubr.f32.vlgmr.msra.gmra.mrb[60].mxu1 %v7503_v35  ;;  %v15828_v35 = vld [vmem:[%s26702_s4 + $0x120] sm:$0xff] }
 0x507   :  { %21350 = vmatpush3.bf16.msra.mxu1 %v26900_v4  ;;  %18996 = vmatprep.mubr.msk.f32.mxu1 %vm22701_vm4, %v26833_v41 }
 0x508   :  { %21351 = vmatprep.subr.bf16.mxu1 %v26834_v3 }
 0x50a   :  { %18997 = vmatmul.mubr.f32.gmra.mrb[62].mxu1 %v7513_v8 }
 0x50b   :  { %21353 = vmatpush3.bf16.msra.mxu1 %v26901_v54  ;;  %18999 = vmatprep.mubr.msk.f32.mxu1 %vm22701_vm4, %v26833_v41 }
 0x50c   :  { %21354 = vmatprep.subr.bf16.mxu1 %v26834_v3 }
 0x50e   :  { %19000 = vmatmul.mubr.f32.gmra.mrb[64].mxu1 %v7523_v46  ;;  %v25220_v46 = vpack.c.bf16 %v8059_v20, %v8056_v62 }
 0x50f   :  { %21356 = vmatpush3.bf16.msra.mxu1 %v26902_v14  ;;  %19014 = vmatprep.mubr.msk.f32.mxu1 %vm22701_vm4, %v26833_v41 }
 0x510   :  { %21357 = vmatprep.subr.bf16.mxu1 %v26834_v3 }
 0x512   :  { %19015 = vmatmul.mubr.f32.vlgmr.msra.gmra.mrb[60].mxu1 %v25025_v2 }
 0x513   :  { %21359 = vmatpush3.bf16.msra.mxu1 %v26903_v42  ;;  %19017 = vmatprep.mubr.msk.f32.mxu1 %vm22701_vm4, %v26833_v41 }
 0x514   :  { %21360 = vmatprep.subr.bf16.mxu1 %v26834_v3 }
 0x516   :  { %19018 = vmatmul.mubr.f32.gmra.mrb[62].mxu1 %v25039_v58 }
 0x517   :  { %21362 = vmatpush3.bf16.msra.mxu1 %v26904_v38  ;;  %19020 = vmatprep.mubr.msk.f32.mxu1 %vm22701_vm4, %v26833_v41 }
 0x518   :  { %21363 = vmatprep.subr.bf16.mxu1 %v26834_v3 }
 0x51a   :  { %19021 = vmatmul.mubr.f32.gmra.mrb[64].mxu1 %v25048_v63 }
 0x51b   :  { %21365 = vmatpush3.bf16.msra.mxu1 %v26905_v36  ;;  %19035 = vmatprep.mubr.msk.f32.mxu1 %vm22701_vm4, %v26833_v41 }
 0x51c   :  { %21366 = vmatprep.subr.bf16.mxu1 %v26834_v3 }
 0x51e   :  { %19036 = vmatmul.mubr.f32.vlgmr.msra.gmra.mrb[60].mxu1 %v25037_v49  ;;  %v15824_v49 = vld [vmem:[%s26702_s4 + $0x100] sm:$0xff] }
 0x51f   :  { %21368 = vmatpush3.bf16.msra.mxu1 %v26897_v59  ;;  %19038 = vmatprep.mubr.msk.f32.mxu1 %vm22701_vm4, %v26833_v41 }
 0x520   :  { %21369 = vmatprep.subr.bf16.mxu1 %v26834_v3 }
 0x521   :  { %v25108_v6 = vpop.f32.mrb[24].mxu0 }
 0x522   :  { %19039 = vmatmul.mubr.f32.gmra.mrb[62].mxu1 %v25046_v5  ;;  %v18678_v29 = vpop.f32.mrb[25].mxu0  ;;  %v8062_v5 = vand.u32 4294901760, %v15824_v49 }
 0x523   :  { %21371 = vmatpush3.bf16.msra.mxu1 %v26898_v25  ;;  %19041 = vmatprep.mubr.msk.f32.mxu1 %vm22701_vm4, %v26833_v41 }
 0x524   :  { %21372 = vmatprep.subr.bf16.mxu1 %v26834_v3  ;;  %v25214_v8 = vsub.f32 %v15824_v49, %v8062_v5 }
 0x525   :  { %v6089_v52 = vpop.f32.mrb[18].mxu1  ;;  %v25115_v24 = vpop.f32.mrb[26].mxu0 }
 0x526   :  { %19042 = vmatmul.mubr.f32.gmra.mrb[64].mxu1 %v25060_v51  ;;  %v18567_v55 = vpop.f32.mrb[19].mxu1  ;;  %v18681_v23 = vpop.f32.mrb[27].mxu0  ;;  %v25202_v51 = vsub.f32 %v15821_v47, %v8053_v31 }
 0x527   :  { %21374 = vmatpush3.bf16.msra.mxu1 %v26899_v7  ;;  %19056 = vmatprep.mubr.msk.f32.mxu1 %vm22701_vm4, %v26833_v41  ;;  %v8077_v55 = vand.u32 4294901760, %v15829_v34 }
 0x528   :  { %21375 = vmatprep.subr.bf16.mxu1 %v26834_v3 }
 0x529   :  { %v6099_v43 = vpop.f32.mrb[20].mxu1  ;;  %v25122_v56 = vpop.f32.mrb[28].mxu0 }
 0x52a   :  { %19057 = vmatmul.mubr.f32.vlgmr.msra.gmra.mrb[60].mxu1 %v7501_v28  ;;  %v18570_v0 = vpop.f32.mrb[21].mxu1  ;;  %v18684_v37 = vpop.f32.mrb[29].mxu0  ;;  %v15825_v28 = vld [vmem:[%s26702_s4 + $0x108] sm:$0xff] }
 0x52b   :  { %21377 = vmatpush3.bf16.msra.mxu1 %v26906_v18  ;;  %19059 = vmatprep.mubr.msk.f32.mxu1 %vm22701_vm4, %v26833_v41  ;;  %v25233_v18 = vsub.f32 %v15829_v34, %v8077_v55 }
 0x52c   :  { %21378 = vmatprep.subr.bf16.mxu1 %v26834_v3 }
 0x52d   :  { %v6109_v57 = vpop.f32.mrb[22].mxu1 }
 0x52e   :  { %19060 = vmatmul.mubr.f32.gmra.mrb[62].mxu1 %v7511_v32  ;;  %v18573_v48 = vpop.f32.mrb[23].mxu1 }
 0x52f   :  { %21380 = vmatpush3.bf16.msra.mxu1 %v26907_v60  ;;  %19062 = vmatprep.mubr.msk.f32.mxu1 %vm22701_vm4, %v26833_v41 }
 0x530   :  { %21381 = vmatprep.subr.bf16.mxu1 %v26834_v3 }
 0x532   :  { %19063 = vmatmul.mubr.f32.gmra.mrb[64].mxu1 %v7521_v11  ;;  %v25212_v11 = vsub.f32 %v15823_v33, %v8059_v20 }
 0x533   :  { %21383 = vmatpush3.bf16.msra.mxu1 %v26908_v40  ;;  %19077 = vmatprep.mubr.msk.f32.mxu1 %vm22701_vm4, %v26833_v41 }
 0x534   :  { %21384 = vmatprep.subr.bf16.mxu1 %v26834_v3 }
 0x536   :  { %19078 = vmatmul.mubr.f32.vlgmr.msra.gmra.mrb[60].mxu1 %v25025_v2 }
 0x537   :  { %21386 = vmatpush3.bf16.msra.mxu1 %v26897_v59  ;;  %19080 = vmatprep.mubr.msk.f32.mxu1 %vm22701_vm4, %v26833_v41  ;;  %v15827_v59 = vld [vmem:[%s26702_s4 + $0x118] sm:$0xff] }
 0x538   :  { %21387 = vmatprep.subr.bf16.mxu1 %v26834_v3  ;;  %v8071_v14 = vand.u32 4294901760, %v15827_v59 }
 0x53a   :  { %19081 = vmatmul.mubr.f32.gmra.mrb[62].mxu1 %v25039_v58 }
 0x53b   :  { %21389 = vmatpush3.bf16.msra.mxu1 %v26898_v25  ;;  %19083 = vmatprep.mubr.msk.f32.mxu1 %vm22701_vm4, %v26833_v41  ;;  %v25204_v25 = vsub.f32 %v15822_v50, %v8056_v62 }
 0x53c   :  { %21390 = vmatprep.subr.bf16.mxu1 %v26834_v3 }
 0x53d   :  { %v25150_v12 = vpop.f32.mrb[30].mxu0 }
 0x53e   :  { %v18752_v26 = vpop.f32.mrb[31].mxu0  ;;  %19084 = vmatmul.mubr.f32.gmra.mrb[64].mxu1 %v25048_v63 }
 0x53f   :  { %21392 = vmatpush3.bf16.msra.mxu1 %v26899_v7  ;;  %19098 = vmatprep.mubr.msk.f32.mxu1 %vm22701_vm4, %v26833_v41  ;;  %v8065_v7 = vand.u32 4294901760, %v15825_v28 }
 0x540   :  { %21456 = vmatprep.subr.bf16.mxu1 %v26834_v3 }
 0x541   :  { %v6250_v61 = vpop.f32.mrb[24].mxu1  ;;  %v25157_v17 = vpop.f32.mrb[32].mxu0  ;;  %v25224_v29 = vsub.f32 %v15825_v28, %v8065_v7  ;;  %v25239_v60 = vpack.c.bf16 %v8065_v7, %v8062_v5 }
 0x542   :  { %v6251_v30 = vadd.f32 %v6250_v61, %v6089_v52  ;;  %v18604_v9 = vpop.f32.mrb[25].mxu1  ;;  %v18755_v19 = vpop.f32.mrb[33].mxu0  ;;  %19099 = vmatmul.mubr.f32.vlgmr.msra.gmra.mrb[60].mxu1 %v25025_v2  ;;  %v8050_v2 = vand.u32 4294901760, %v15820_v10  ;;  %v8074_v52 = vand.u32 4294901760, %v15828_v35 }
 0x543   :  { %19101 = vmatprep.mubr.msk.f32.mxu1 %vm22701_vm4, %v26833_v41 }
 0x544   :  { %v25198_v44 = vpack.c.bf16 %v8053_v31, %v8050_v2  ;;  %v25200_v32 = vsub.f32 %v15820_v10, %v8050_v2  ;;  %v25231_v37 = vsub.f32 %v15828_v35, %v8074_v52  ;;  %v15831_v35 = vld [vmem:[%s26702_s4 + $0x138] sm:$0xff] }
 0x545   :  { %v6256_v27 = vpop.f32.mrb[26].mxu1  ;;  %v25162_v15 = vpop.f32.mrb[34].mxu0  ;;  %v8083_v7 = vand.u32 4294901760, %v15831_v35 }
 0x546   :  { %v6257_v53 = vadd.f32 %v6256_v27, %v6099_v43  ;;  %v18607_v13 = vpop.f32.mrb[27].mxu1  ;;  %v18758_v22 = vpop.f32.mrb[35].mxu0  ;;  %19102 = vmatmul.mubr.f32.gmra.mrb[62].mxu1 %v25039_v58  ;;  %21395 = vmatpush3.bf16.msra.mxu0 %v25198_v44  ;;  %v25228_v43 = vsub.f32 %v15827_v59, %v8071_v14 }
 0x547   :  { %19104 = vmatprep.mubr.msk.f32.mxu1 %vm22701_vm4, %v26833_v41  ;;  %21458 = vmatpush3.bf16.msra.mxu1 %v25198_v44 }
 0x548   :  { %21459 = vmatprep.subr.bf16.mxu1 %v26834_v3  ;;  %21396 = vmatprep.subr.bf16.mxu0 %v26834_v3 }
 0x549   :  { %v6262_v1 = vpop.f32.mrb[28].mxu1 }
 0x54a   :  { %v25167_v45 = vadd.f32 %v6262_v1, %v6109_v57  ;;  %v18610_v21 = vpop.f32.mrb[29].mxu1  ;;  %19105 = vmatmul.mubr.f32.gmra.mrb[64].mxu1 %v25048_v63  ;;  %v15826_v63 = vld [vmem:[%s26702_s4 + $0x110] sm:$0xff]  ;;  %21398 = vmatpush3.bf16.msra.mxu0 %v25220_v46 }
 0x54b   :  { %19246 = vmatprep.mubr.msk.f32.mxu1 %vm22701_vm4, %v26833_v41  ;;  %v8068_v54 = vand.u32 4294901760, %v15826_v63  ;;  %21461 = vmatpush3.bf16.msra.mxu1 %v25220_v46 }
 0x54c   :  { %21462 = vmatprep.subr.bf16.mxu1 %v26834_v3  ;;  %21399 = vmatprep.subr.bf16.mxu0 %v26834_v3 }
 0x54d   :  { %v25226_v23 = vsub.f32 %v15826_v63, %v8068_v54  ;;  %v25246_v9 = vpack.c.bf16 %v8071_v14, %v8068_v54 }
 0x54e   :  { %21401 = vmatpush3.bf16.msra.mxu0 %v25239_v60 }
 0x54f   :  { %21464 = vmatpush3.bf16.msra.mxu1 %v25239_v60  ;;  %21402 = vmatprep.subr.bf16.mxu0 %v26834_v3 }
 0x550   :  { %21465 = vmatprep.subr.bf16.mxu1 %v26834_v3 }
 0x552   :  { %21404 = vmatpush3.bf16.msra.mxu0 %v25246_v9 }
 0x553   :  { %21467 = vmatpush3.bf16.msra.mxu1 %v25246_v9  ;;  %21405 = vmatprep.subr.bf16.mxu0 %v26834_v3 }
 0x554   :  { %21468 = vmatprep.subr.bf16.mxu1 %v26834_v3 }
 0x559   :  { %v25181_v39 = vpop.f32.mrb[36].mxu0 }
 0x55a   :  { %v18826_v58 = vpop.f32.mrb[37].mxu0 }
 0x55d   :  { %v6362_v16 = vpop.f32.mrb[30].mxu1  ;;  %v25216_v4 = vpop.f32.mrb[38].mxu0 }
 0x55e   :  { %v6363_v42 = vadd.f32 %v6362_v16, %v6251_v30  ;;  %v18641_v38 = vpop.f32.mrb[31].mxu1  ;;  %v18829_v36 = vpop.f32.mrb[39].mxu0 }
 0x55f   :  { %v15832_v38 = vld [vmem:[%s26702_s4 + $0x140] sm:$0xff]  ;;  %v15833_v36 = vld [vmem:[%s26702_s4 + $0x148] sm:$0xff] }
 0x560   :  { %v6464_v0 = vadd.f32 %v25108_v6, %v6363_v42 }
 0x561   :  { %v6369_v57 = vpop.f32.mrb[32].mxu1  ;;  %v25235_v48 = vpop.f32.mrb[40].mxu0 }
 0x562   :  { %v6370_v40 = vadd.f32 %v6369_v57, %v6257_v53  ;;  %v18644_v26 = vpop.f32.mrb[33].mxu1  ;;  %v18832_v61 = vpop.f32.mrb[41].mxu0 }
 0x564   :  { %v6472_v6 = vadd.f32 %v25115_v24, %v6370_v40  ;;  %v25254_v24 = vpack.c.bf16 %v8077_v55, %v8074_v52  ;;  %v8086_v52 = vand.u32 4294901760, %v15832_v38  ;;  %v8089_v55 = vand.u32 4294901760, %v15833_v36 }
 0x565   :  { %v6376_v30 = vpop.f32.mrb[34].mxu1 }
 0x566   :  { %v6377_v19 = vadd.f32 %v6376_v30, %v25167_v45  ;;  %v18647_v27 = vpop.f32.mrb[35].mxu1  ;;  %21470 = vmatpush3.bf16.msra.mxu1 %v25254_v24  ;;  %21407 = vmatpush3.bf16.msra.mxu0 %v25254_v24  ;;  %v25296_v26 = vpack.c.bf16 %v8089_v55, %v8086_v52 }
 0x567   :  { %21471 = vmatprep.subr.bf16.mxu1 %v26834_v3  ;;  %21408 = vmatprep.subr.bf16.mxu0 %v26834_v3 }
 0x568   :  { %v6480_v53 = vadd.f32 %v25122_v56, %v6377_v19  ;;  %v8161_v19 = vand.u32 4294901760, %v25200_v32 }
 0x575   :  { %v25262_v13 = vpop.f32.mrb[42].mxu0 }
 0x576   :  { %v18900_v56 = vpop.f32.mrb[43].mxu0 }
 0x577   :  { %v8162_v56 = vsub.f32 %v25200_v32, %v8161_v19 }
 0x579   :  { %v6592_v22 = vpop.f32.mrb[36].mxu1  ;;  %v25264_v1 = vpop.f32.mrb[44].mxu0 }
 0x57a   :  { %v6593_v45 = vadd.f32 %v6592_v22, %v6464_v0  ;;  %v18715_v21 = vpop.f32.mrb[37].mxu1  ;;  %v18903_v10 = vpop.f32.mrb[45].mxu0 }
 0x57c   :  { %v6690_v47 = vadd.f32 %v25150_v12, %v6593_v45  ;;  %v15830_v12 = vld [vmem:[%s26702_s4 + $0x130] sm:$0xff] }
 0x57d   :  { %v6598_v50 = vpop.f32.mrb[38].mxu1  ;;  %v25267_v2 = vpop.f32.mrb[46].mxu0  ;;  %v8080_v34 = vand.u32 4294901760, %v15830_v12 }
 0x57e   :  { %v6599_v31 = vadd.f32 %v6598_v50, %v6472_v6  ;;  %v18718_v33 = vpop.f32.mrb[39].mxu1  ;;  %v18906_v62 = vpop.f32.mrb[47].mxu0  ;;  %v25317_v50 = vsub.f32 %v15833_v36, %v8089_v55 }
 0x57f   :  { %v25281_v54 = vpack.c.bf16 %v8083_v7, %v8080_v34  ;;  %v25311_v10 = vsub.f32 %v15830_v12, %v8080_v34  ;;  %v8163_v33 = vand.u32 4294901760, %v8162_v56 }
 0x580   :  { %v6696_v49 = vadd.f32 %v25157_v17, %v6599_v31 }
 0x581   :  { %v6604_v58 = vpop.f32.mrb[40].mxu1  ;;  %21473 = vmatpush3.bf16.msra.mxu1 %v25281_v54  ;;  %21410 = vmatpush3.bf16.msra.mxu0 %v25281_v54 }
 0x582   :  { %v6605_v20 = vadd.f32 %v6604_v58, %v6480_v53  ;;  %v18721_v28 = vpop.f32.mrb[41].mxu1  ;;  %21474 = vmatprep.subr.bf16.mxu1 %v26834_v3  ;;  %21411 = vmatprep.subr.bf16.mxu0 %v26834_v3  ;;  %v8182_v58 = vand.u32 4294901760, %v25212_v11 }
 0x584   :  { %v6702_v5 = vadd.f32 %v25162_v15, %v6605_v20 }
 0x585   :  { %21476 = vmatpush3.bf16.msra.mxu1 %v25296_v26  ;;  %21413 = vmatpush3.bf16.msra.mxu0 %v25296_v26 }
 0x586   :  { %21498 = vmatprep.subr.bf16.mxu1 %v26834_v3  ;;  %21414 = vmatprep.subr.bf16.mxu0 %v26834_v3 }
 0x591   :  { %v25271_v63 = vpop.f32.mrb[48].mxu0 }
 0x592   :  { %v18974_v59 = vpop.f32.mrb[49].mxu0 }
 0x593   :  { %v26785_v59 = vand.u32 4294901760, %v25214_v8 }
 0x595   :  { %v6799_v16 = vpop.f32.mrb[42].mxu1  ;;  %v25279_v17 = vpop.f32.mrb[50].mxu0  ;;  %v8190_v34 = vsub.f32 %v25214_v8, %v26785_v59 }
 0x596   :  { %v6800_v14 = vadd.f32 %v6799_v16, %v6690_v47  ;;  %v18789_v15 = vpop.f32.mrb[43].mxu1  ;;  %v18977_v42 = vpop.f32.mrb[51].mxu0  ;;  %v25313_v47 = vsub.f32 %v15831_v35, %v8083_v7 }
 0x597   :  { %v26783_v42 = vand.u32 4294901760, %v25226_v23 }
 0x598   :  { %v6961_v0 = vadd.f32 %v25181_v39, %v6800_v14  ;;  %v8168_v39 = vand.u32 4294901760, %v25202_v51  ;;  %v8191_v14 = vand.u32 4294901760, %v8190_v34 }
 0x599   :  { %v6809_v57 = vpop.f32.mrb[44].mxu1  ;;  %v25294_v40 = vpop.f32.mrb[52].mxu0 }
 0x59a   :  { %v6810_v61 = vadd.f32 %v6809_v57, %v6696_v49  ;;  %v18792_v6 = vpop.f32.mrb[45].mxu1  ;;  %v18980_v30 = vpop.f32.mrb[53].mxu0  ;;  %v8169_v22 = vsub.f32 %v25202_v51, %v8168_v39  ;;  %v8175_v49 = vand.u32 4294901760, %v25204_v25 }
 0x59b   :  { %v8224_v6 = vand.u32 4294901760, %v25233_v18 }
 0x59c   :  { %v6967_v27 = vadd.f32 %v25216_v4, %v6810_v61  ;;  %v25315_v4 = vsub.f32 %v15832_v38, %v8086_v52  ;;  %v8170_v62 = vand.u32 4294901760, %v8169_v22  ;;  %v8176_v28 = vsub.f32 %v25204_v25, %v8175_v49 }
 0x59d   :  { %v6819_v53 = vpop.f32.mrb[46].mxu1  ;;  %v8210_v38 = vand.u32 4294901760, %v25228_v43  ;;  %v8204_v52 = vsub.f32 %v25226_v23, %v26783_v42  ;;  %v8217_v61 = vand.u32 4294901760, %v25231_v37  ;;  %v8225_v56 = vsub.f32 %v25233_v18, %v8224_v6 }
 0x59e   :  { %v6820_v45 = vadd.f32 %v6819_v53, %v6702_v5  ;;  %v18795_v21 = vpop.f32.mrb[47].mxu1  ;;  %v25322_v20 = vpack.c.bf16 %v8170_v62, %v8163_v33  ;;  %v8183_v5 = vsub.f32 %v25212_v11, %v8182_v58  ;;  %v8177_v12 = vand.u32 4294901760, %v8176_v28 }
 0x59f   :  { %v8211_v55 = vsub.f32 %v25228_v43, %v8210_v38  ;;  %v8205_v57 = vand.u32 4294901760, %v8204_v52  ;;  %v8218_v53 = vsub.f32 %v25231_v37, %v8217_v61  ;;  %v8226_v21 = vand.u32 4294901760, %v8225_v56 }
 0x5a0   :  { %v6973_v31 = vadd.f32 %v25235_v48, %v6820_v45  ;;  %v26784_v48 = vand.u32 4294901760, %v25224_v29  ;;  %v8184_v35 = vand.u32 4294901760, %v8183_v5  ;;  %v8231_v33 = vand.u32 4294901760, %v25311_v10 }
 0x5a1   :  { %v8212_v30 = vand.u32 4294901760, %v8211_v55  ;;  %v8219_v45 = vand.u32 4294901760, %v8218_v53  ;;  %v8238_v62 = vand.u32 4294901760, %v25313_v47  ;;  %v8245_v52 = vand.u32 4294901760, %v25315_v4 }
 0x5a2   :  { %v8197_v7 = vsub.f32 %v25224_v29, %v26784_v48  ;;  %v25338_v16 = vpack.c.bf16 %v8184_v35, %v8177_v12  ;;  %v8232_v12 = vsub.f32 %v25311_v10, %v8231_v33  ;;  %v8252_v55 = vand.u32 4294901760, %v25317_v50 }
 0x5a3   :  { %v25352_v22 = vpack.c.bf16 %v8212_v30, %v8205_v57  ;;  %v25356_v5 = vpack.c.bf16 %v8226_v21, %v8219_v45  ;;  %v8239_v35 = vsub.f32 %v25313_v47, %v8238_v62  ;;  %v8246_v56 = vsub.f32 %v25315_v4, %v8245_v52 }
 0x5a4   :  { %v8198_v15 = vand.u32 4294901760, %v8197_v7  ;;  %v8253_v45 = vsub.f32 %v25317_v50, %v8252_v55 }
 0x5a5   :  { %v8247_v48 = vand.u32 4294901760, %v8246_v56 }
 0x5a6   :  { %v25342_v36 = vpack.c.bf16 %v8198_v15, %v8191_v14  ;;  %v8233_v14 = vand.u32 4294901760, %v8232_v12  ;;  %v8240_v15 = vand.u32 4294901760, %v8239_v35 }
 0x5a8   :  { %v25363_v53 = vpack.c.bf16 %v8240_v15, %v8233_v14  ;;  %v21439_v14 = vpack.c.bf16 %v25212_v11, %v25204_v25  ;;  %v15836_v25 = vld [vmem:[%s26703_s5 + $0x38] sm:$0xff] }
 0x5b1   :  { %v7072_v28 = vpop.f32.mrb[48].mxu1 }
 0x5b2   :  { %v7073_v34 = vadd.f32 %v7072_v28, %v6961_v0  ;;  %v18863_v7 = vpop.f32.mrb[49].mxu1  ;;  %v8254_v0 = vand.u32 4294901760, %v8253_v45 }
 0x5b4   :  { %v7174_v57 = vadd.f32 %v25262_v13, %v7073_v34  ;;  %v25368_v35 = vpack.c.bf16 %v8254_v0, %v8247_v48  ;;  %v21436_v34 = vpack.c.bf16 %v25202_v51, %v25200_v32  ;;  %v26912_v32 = vpack.c.bf16 %v25233_v18, %v25231_v37  ;;  %v15835_v51 = vld [vmem:[%s26703_s5 + $0x30] sm:$0xff] }
 0x5b5   :  { %v7079_v30 = vpop.f32.mrb[50].mxu1  ;;  %v8791_v11 = vand.u32 4294901760, %v15835_v51 }
 0x5b6   :  { %v7080_v21 = vadd.f32 %v7079_v30, %v6967_v27  ;;  %v18866_v42 = vpop.f32.mrb[51].mxu1  ;;  %v21442_v27 = vpack.c.bf16 %v25224_v29, %v25214_v8 }
 0x5b7   :  { %v21445_v42 = vpack.c.bf16 %v25228_v43, %v25226_v23  ;;  %v15838_v43 = vld [vmem:[%s26703_s5 + $0x48] sm:$0xff] }
 0x5b8   :  { %v7182_v28 = vadd.f32 %v25264_v1, %v7080_v21  ;;  %v21454_v21 = vpack.c.bf16 %v25317_v50, %v25315_v4  ;;  %v8800_v18 = vand.u32 4294901760, %v15838_v43 }
 0x5b9   :  { %v7086_v12 = vpop.f32.mrb[52].mxu1 }
 0x5ba   :  { %v7087_v7 = vadd.f32 %v7086_v12, %v6973_v31  ;;  %v18869_v59 = vpop.f32.mrb[53].mxu1 }
 0x5bc   :  { %v7190_v13 = vadd.f32 %v25267_v2, %v7087_v7  ;;  %v21451_v2 = vpack.c.bf16 %v25313_v47, %v25311_v10 }
 0x5cd   :  { %v7302_v48 = vpop.f32.mrb[54].mxu1 }
 0x5ce   :  { %v7303_v31 = vadd.f32 %v7302_v48, %v7174_v57  ;;  %v18937_v59 = vpop.f32.mrb[55].mxu1 }
 0x5d0   :  { %v25384_v15 = vadd.f32 %v25271_v63, %v7303_v31  ;;  %v25398_v63 = vpack.c.bf16 %v8168_v39, %v8161_v19  ;;  %v25416_v31 = vpack.c.bf16 %v8224_v6, %v8217_v61  ;;  %v25418_v19 = vpack.c.bf16 %v8238_v62, %v8231_v33 }
 0x5d1   :  { %v7308_v30 = vpop.f32.mrb[56].mxu1  ;;  %v25420_v39 = vpack.c.bf16 %v8252_v55, %v8245_v52 }
 0x5d2   :  { %v7309_v56 = vadd.f32 %v7308_v30, %v7182_v28  ;;  %v18940_v45 = vpop.f32.mrb[57].mxu1  ;;  %v25404_v28 = vpack.c.bf16 %v8182_v58, %v8175_v49 }
 0x5d4   :  { %v25389_v0 = vadd.f32 %v25279_v17, %v7309_v56  ;;  %v26909_v17 = vand.u32 4294901760, %v25214_v8  ;;  %v8794_v8 = vand.u32 4294901760, %v15836_v25 }
 0x5d5   :  { %v7314_v12 = vpop.f32.mrb[58].mxu1 }
 0x5d6   :  { %v7315_v7 = vadd.f32 %v7314_v12, %v7190_v13  ;;  %v18943_v1 = vpop.f32.mrb[59].mxu1  ;;  %v26910_v13 = vand.u32 4294901760, %v25224_v29  ;;  %v25564_v29 = vpack.c.bf16 %v8794_v8, %v8791_v11 }
 0x5d8   :  { %v25392_v57 = vadd.f32 %v25294_v40, %v7315_v7  ;;  %v25410_v1 = vpack.c.bf16 %v26910_v13, %v26909_v17  ;;  %v26911_v40 = vand.u32 4294901760, %v25226_v23  ;;  %v15837_v23 = vld [vmem:[%s26703_s5 + $0x40] sm:$0xff] }
 0x5d9   :  { %v8797_v37 = vand.u32 4294901760, %v15837_v23 }
 0x5da   :  { %v25414_v48 = vpack.c.bf16 %v8210_v38, %v26911_v40 }
 0x615   :  { %v8009_v59 = vpop.f32.mrb[60].mxu1 }
 0x616   :  { %v8041_v49 = vsel %vm5994_vm7, %v8009_v59, 0  ;;  %v19100_v58 = vpop.f32.mrb[61].mxu1 }
 0x617   :  { %v25423_v30 = vand.u32 4294901760, %v8041_v49 }
 0x619   :  { %v25426_v56 = vsub.f32 %v8041_v49, %v25423_v30  ;;  %v8015_v45 = vpop.f32.mrb[62].mxu1 }
 0x61a   :  { %v8044_v12 = vsel %vm5994_vm7, %v8015_v45, 0  ;;  %v19103_v38 = vpop.f32.mrb[63].mxu1 }
 0x61b   :  { %v8130_v61 = vand.u32 4294901760, %v25426_v56  ;;  %v25430_v6 = vand.u32 4294901760, %v8044_v12 }
 0x61d   :  { %v8131_v33 = vsub.f32 %v25426_v56, %v8130_v61  ;;  %v25434_v62 = vsub.f32 %v8044_v12, %v25430_v6  ;;  %v8021_v52 = vpop.f32.mrb[64].mxu1  ;;  %19247 = vmatmul.mubr.f32.vlgmr.msra.gmra.mrb[66].mxu1 %v8130_v61 }
 0x61e   :  { %v8047_v55 = vsel %vm5994_vm7, %v8021_v52, 0  ;;  %21500 = vmatpush3.bf16.msra.mxu1 %v25198_v44  ;;  %v19106_v7 = vpop.f32.mrb[65].mxu1  ;;  %19249 = vmatprep.mubr.msk.f32.mxu1 %vm22701_vm4, %v26833_v41 }
 0x61f   :  { %v8132_v17 = vand.u32 4294901760, %v8131_v33  ;;  %v25440_v13 = vand.u32 4294901760, %v8047_v55  ;;  %21501 = vmatprep.subr.bf16.mxu1 %v26834_v3  ;;  %v8140_v40 = vand.u32 4294901760, %v25434_v62 }
 0x621   :  { %v25445_v59 = vsub.f32 %v8047_v55, %v25440_v13  ;;  %19136 = vmatmul.mubr.f32.vlgmr.msra.gmra.mrb[54].mxu0 %v8132_v17  ;;  %19250 = vmatmul.mubr.f32.gmra.mrb[68].mxu1 %v8140_v40  ;;  %v8141_v49 = vsub.f32 %v25434_v62, %v8140_v40 }
 0x622   :  { %21416 = vmatpush3.bf16.msra.mxu0 %v25322_v20  ;;  %21503 = vmatpush3.bf16.msra.mxu1 %v25220_v46 }
 0x623   :  { %19138 = vmatprep.mubr.msk.f32.mxu0 %vm22701_vm4, %v26833_v41  ;;  %21417 = vmatprep.subr.bf16.mxu0 %v26834_v3  ;;  %v8142_v44 = vand.u32 4294901760, %v8141_v49  ;;  %v8150_v58 = vand.u32 4294901760, %v25445_v59 }
 0x624   :  { %19252 = vmatprep.mubr.msk.f32.mxu1 %vm22701_vm4, %v26833_v41  ;;  %21504 = vmatprep.subr.bf16.mxu1 %v26834_v3 }
 0x625   :  { %19139 = vmatmul.mubr.f32.gmra.mrb[56].mxu0 %v8142_v44  ;;  %19253 = vmatmul.mubr.f32.gmra.mrb[70].mxu1 %v8150_v58  ;;  %v8151_v45 = vsub.f32 %v25445_v59, %v8150_v58 }
 0x626   :  { %21419 = vmatpush3.bf16.msra.mxu0 %v25338_v16  ;;  %21506 = vmatpush3.bf16.msra.mxu1 %v25239_v60  ;;  %v25574_v60 = vpack.c.bf16 %v8800_v18, %v8797_v37 }
 0x627   :  { %19141 = vmatprep.mubr.msk.f32.mxu0 %vm22701_vm4, %v26833_v41  ;;  %21420 = vmatprep.subr.bf16.mxu0 %v26834_v3  ;;  %v8152_v46 = vand.u32 4294901760, %v8151_v45 }
 0x628   :  { %21507 = vmatprep.subr.bf16.mxu1 %v26834_v3  ;;  %19320 = vmatprep.mubr.msk.f32.mxu1 %vm22701_vm4, %v26833_v41 }
 0x629   :  { %19142 = vmatmul.mubr.f32.gmra.mrb[58].mxu0 %v8152_v46 }
 0x62a   :  { %21422 = vmatpush3.bf16.msra.mxu0 %v25342_v36  ;;  %21509 = vmatpush3.bf16.msra.mxu1 %v25246_v9  ;;  %v8883_v9 = vsub.f32 %v15835_v51, %v8791_v11 }
 0x62b   :  { %21423 = vmatprep.subr.bf16.mxu0 %v26834_v3  ;;  %21510 = vmatprep.subr.bf16.mxu1 %v26834_v3 }
 0x62c   :  { %19172 = vmatprep.mubr.msk.f32.mxu0 %vm22701_vm4, %v26833_v41  ;;  %v8884_v4 = vand.u32 4294901760, %v8883_v9 }
 0x62e   :  { %21425 = vmatpush3.bf16.msra.mxu0 %v25352_v22  ;;  %21512 = vmatpush3.bf16.msra.mxu1 %v25254_v24  ;;  %v8890_v24 = vsub.f32 %v15836_v25, %v8794_v8  ;;  %v8885_v16 = vsub.f32 %v8883_v9, %v8884_v4  ;;  %v8897_v22 = vsub.f32 %v15837_v23, %v8797_v37 }
 0x62f   :  { %21426 = vmatprep.subr.bf16.mxu0 %v26834_v3  ;;  %21513 = vmatprep.subr.bf16.mxu1 %v26834_v3 }
 0x630   :  { %v8891_v50 = vand.u32 4294901760, %v8890_v24  ;;  %v25595_v33 = vpack.c.bf16 %v8890_v24, %v8883_v9 }
 0x632   :  { %21428 = vmatpush3.bf16.msra.mxu0 %v25356_v5  ;;  %21515 = vmatpush3.bf16.msra.mxu1 %v25281_v54  ;;  %v15839_v54 = vld [vmem:[%s26703_s5 + $0x50] sm:$0xff]  ;;  %v8892_v36 = vsub.f32 %v8890_v24, %v8891_v50  ;;  %v8904_v5 = vsub.f32 %v15838_v43, %v8800_v18  ;;  %v25601_v46 = vpack.c.bf16 %v8891_v50, %v8884_v4 }
 0x633   :  { %21429 = vmatprep.subr.bf16.mxu0 %v26834_v3  ;;  %21516 = vmatprep.subr.bf16.mxu1 %v26834_v3  ;;  %v8803_v10 = vand.u32 4294901760, %v15839_v54 }
 0x634   :  { %v25597_v17 = vpack.c.bf16 %v8904_v5, %v8897_v22 }
 0x636   :  { %21431 = vmatpush3.bf16.msra.mxu0 %v25363_v53  ;;  %21518 = vmatpush3.bf16.msra.mxu1 %v25296_v26  ;;  %v15840_v26 = vld [vmem:[%s26703_s5 + $0x58] sm:$0xff]  ;;  %v8886_v53 = vand.u32 4294901760, %v8885_v16 }
 0x637   :  { %21432 = vmatprep.subr.bf16.mxu0 %v26834_v3  ;;  %v8806_v47 = vand.u32 4294901760, %v15840_v26 }
 0x639   :  { %19321 = vmatmul.mubr.f32.vlgmr.msra.gmra.mrb[72].mxu1 %v25423_v30  ;;  %v25584_v20 = vpack.c.bf16 %v8806_v47, %v8803_v10 }
 0x63a   :  { %21434 = vmatpush3.bf16.msra.mxu0 %v25368_v35  ;;  %19323 = vmatprep.mubr.msk.f32.mxu1 %vm22701_vm4, %v26833_v41  ;;  %v8893_v35 = vand.u32 4294901760, %v8892_v36 }
 0x63b   :  { %21435 = vmatprep.subr.bf16.mxu0 %v26834_v3 }
 0x63d   :  { %19173 = vmatmul.mubr.f32.vlgmr.msra.gmra.mrb[60].mxu0 %v25423_v30  ;;  %19324 = vmatmul.mubr.f32.gmra.mrb[74].mxu1 %v25430_v6 }
 0x63e   :  { %21437 = vmatpush3.bf16.msra.mxu0 %v21436_v34  ;;  %19175 = vmatprep.mubr.msk.f32.mxu0 %vm22701_vm4, %v26833_v41  ;;  %v8898_v34 = vand.u32 4294901760, %v8897_v22 }
 0x63f   :  { %19326 = vmatprep.mubr.msk.f32.mxu1 %vm22701_vm4, %v26833_v41  ;;  %21438 = vmatprep.subr.bf16.mxu0 %v26834_v3 }
 0x641   :  { %19176 = vmatmul.mubr.f32.gmra.mrb[62].mxu0 %v25430_v6  ;;  %19327 = vmatmul.mubr.f32.gmra.mrb[76].mxu1 %v25440_v13 }
 0x642   :  { %21440 = vmatpush3.bf16.msra.mxu0 %v21439_v14  ;;  %19178 = vmatprep.mubr.msk.f32.mxu0 %vm22701_vm4, %v26833_v41  ;;  %v8905_v14 = vand.u32 4294901760, %v8904_v5 }
 0x643   :  { %21441 = vmatprep.subr.bf16.mxu0 %v26834_v3 }
 0x644   :  { %v25603_v25 = vpack.c.bf16 %v8905_v14, %v8898_v34 }
 0x645   :  { %19179 = vmatmul.mubr.f32.gmra.mrb[64].mxu0 %v25440_v13 }
 0x646   :  { %21443 = vmatpush3.bf16.msra.mxu0 %v21442_v27  ;;  %19209 = vmatprep.mubr.msk.f32.mxu0 %vm22701_vm4, %v26833_v41  ;;  %v25588_v27 = vpack.c.bf16 %v8893_v35, %v8886_v53 }
 0x647   :  { %21444 = vmatprep.subr.bf16.mxu0 %v26834_v3 }
 0x64a   :  { %21446 = vmatpush3.bf16.msra.mxu0 %v21445_v42  ;;  %v8899_v42 = vsub.f32 %v8897_v22, %v8898_v34 }
 0x64b   :  { %21447 = vmatprep.subr.bf16.mxu0 %v26834_v3 }
 0x64e   :  { %21449 = vmatpush3.bf16.msra.mxu0 %v26912_v32 }
 0x64f   :  { %21450 = vmatprep.subr.bf16.mxu0 %v26834_v3 }
 0x652   :  { %21452 = vmatpush3.bf16.msra.mxu0 %v21451_v2  ;;  %v8911_v2 = vsub.f32 %v15839_v54, %v8803_v10 }
 0x653   :  { %21453 = vmatprep.subr.bf16.mxu0 %v26834_v3 }
 0x656   :  { %21455 = vmatpush3.bf16.msra.mxu0 %v21454_v21  ;;  %v8918_v21 = vsub.f32 %v15840_v26, %v8806_v47 }
 0x657   :  { %21477 = vmatprep.subr.bf16.mxu0 %v26834_v3 }
 0x658   :  { %v25599_v44 = vpack.c.bf16 %v8918_v21, %v8911_v2 }
 0x659   :  { %19210 = vmatmul.mubr.f32.vlgmr.msra.gmra.mrb[66].mxu0 %v25426_v56 }
 0x65a   :  { %21479 = vmatpush3.bf16.msra.mxu0 %v25398_v63  ;;  %19212 = vmatprep.mubr.msk.f32.mxu0 %vm22701_vm4, %v26833_v41  ;;  %v8906_v63 = vsub.f32 %v8904_v5, %v8905_v14 }
 0x65b   :  { %21480 = vmatprep.subr.bf16.mxu0 %v26834_v3 }
 0x65d   :  { %19213 = vmatmul.mubr.f32.gmra.mrb[68].mxu0 %v25434_v62 }
 0x65e   :  { %21482 = vmatpush3.bf16.msra.mxu0 %v25404_v28  ;;  %19215 = vmatprep.mubr.msk.f32.mxu0 %vm22701_vm4, %v26833_v41  ;;  %v8900_v28 = vand.u32 4294901760, %v8899_v42 }
 0x65f   :  { %21483 = vmatprep.subr.bf16.mxu0 %v26834_v3 }
 0x661   :  { %19216 = vmatmul.mubr.f32.gmra.mrb[70].mxu0 %v25445_v59 }
 0x662   :  { %21485 = vmatpush3.bf16.msra.mxu0 %v25410_v1  ;;  %19283 = vmatprep.mubr.msk.f32.mxu0 %vm22701_vm4, %v26833_v41  ;;  %v8912_v1 = vand.u32 4294901760, %v8911_v2 }
 0x663   :  { %21486 = vmatprep.subr.bf16.mxu0 %v26834_v3 }
 0x666   :  { %21488 = vmatpush3.bf16.msra.mxu0 %v25414_v48  ;;  %v8919_v48 = vand.u32 4294901760, %v8918_v21 }
 0x667   :  { %21489 = vmatprep.subr.bf16.mxu0 %v26834_v3 }
 0x668   :  { %v25605_v18 = vpack.c.bf16 %v8919_v48, %v8912_v1 }
 0x66a   :  { %21491 = vmatpush3.bf16.msra.mxu0 %v25416_v31  ;;  %v8907_v31 = vand.u32 4294901760, %v8906_v63 }
 0x66b   :  { %21492 = vmatprep.subr.bf16.mxu0 %v26834_v3 }
 0x66e   :  { %21494 = vmatpush3.bf16.msra.mxu0 %v25418_v19  ;;  %v8913_v19 = vsub.f32 %v8911_v2, %v8912_v1 }
 0x66f   :  { %21495 = vmatprep.subr.bf16.mxu0 %v26834_v3 }
 0x670   :  { %v8914_v56 = vand.u32 4294901760, %v8913_v19  ;;  %v15834_v19 = vld [vmem:[%s26705_s7 + $0x1] ss:$0 sm:$0xff] }
 0x672   :  { %21497 = vmatpush3.bf16.msra.mxu0 %v25420_v39  ;;  %v8920_v39 = vsub.f32 %v8918_v21, %v8919_v48 }
 0x673   :  { %21520 = vmatprep.subr.bf16.mxu0 %v25564_v29 }
 0x674   :  { %v8921_v12 = vand.u32 4294901760, %v8920_v39 }
 0x675   :  { %19284 = vmatmul.mubr.f32.vlgmr.msra.gmra.mrb[72].mxu0 %v25423_v30  ;;  %v25591_v30 = vpack.c.bf16 %v8907_v31, %v8900_v28 }
 0x676   :  { %19286 = vmatprep.mubr.msk.f32.mxu0 %vm22701_vm4, %v26833_v41  ;;  %21522 = vmatpush3.bf16.msra.mxu0 %v25564_v29  ;;  %v25593_v38 = vpack.c.bf16 %v8921_v12, %v8914_v56 }
 0x677   :  { %21524 = vmatprep.subr.bf16.mxu0 %v25574_v60 }
 0x679   :  { %19287 = vmatmul.mubr.f32.gmra.mrb[74].mxu0 %v25430_v6 }
 0x67a   :  { %19289 = vmatprep.mubr.msk.f32.mxu0 %vm22701_vm4, %v26833_v41  ;;  %21526 = vmatpush3.bf16.msra.mxu0 %v25574_v60 }
 0x67b   :  { %21528 = vmatprep.subr.bf16.mxu0 %v25584_v20 }
 0x67d   :  { %19290 = vmatmul.mubr.f32.gmra.mrb[76].mxu0 %v25440_v13 }
 0x67e   :  { %21530 = vmatpush3.bf16.msra.mxu0 %v25584_v20 }
 0x67f   :  { %21532 = vmatprep.subr.bf16.mxu0 %v25588_v27 }
 0x6f0   :  { %v8508_v61 = vpop.f32.mrb[66].mxu1 }
 0x6f1   :  { %v19248_v6 = vpop.f32.mrb[67].mxu1 }
 0x6f4   :  { %v8134_v62 = vpop.f32.mrb[54].mxu0  ;;  %v8516_v52 = vpop.f32.mrb[68].mxu1 }
 0x6f5   :  { %v19137_v55 = vpop.f32.mrb[55].mxu0  ;;  %v19251_v7 = vpop.f32.mrb[69].mxu1 }
 0x6f8   :  { %v8144_v13 = vpop.f32.mrb[56].mxu0  ;;  %v8524_v40 = vpop.f32.mrb[70].mxu1 }
 0x6f9   :  { %v19140_v59 = vpop.f32.mrb[57].mxu0  ;;  %v19254_v49 = vpop.f32.mrb[71].mxu1 }
 0x6fc   :  { %v8154_v58 = vpop.f32.mrb[58].mxu0 }
 0x6fd   :  { %v19143_v45 = vpop.f32.mrb[59].mxu0 }
 0x70c   :  { %v8734_v32 = vpop.f32.mrb[72].mxu1 }
 0x70d   :  { %v19322_v51 = vpop.f32.mrb[73].mxu1 }
 0x710   :  { %v8295_v11 = vpop.f32.mrb[60].mxu0  ;;  %v8740_v8 = vpop.f32.mrb[74].mxu1 }
 0x711   :  { %v8296_v23 = vadd.f32 %v8295_v11, %v8134_v62  ;;  %v19174_v43 = vpop.f32.mrb[61].mxu0  ;;  %v19325_v37 = vpop.f32.mrb[75].mxu1 }
 0x714   :  { %v8301_v9 = vpop.f32.mrb[62].mxu0  ;;  %v8746_v24 = vpop.f32.mrb[76].mxu1 }
 0x715   :  { %v8302_v54 = vadd.f32 %v8301_v9, %v8144_v13  ;;  %v19177_v26 = vpop.f32.mrb[63].mxu0  ;;  %v19328_v10 = vpop.f32.mrb[77].mxu1 }
 0x718   :  { %v8307_v47 = vpop.f32.mrb[64].mxu0 }
 0x719   :  { %v8308_v16 = vadd.f32 %v8307_v47, %v8154_v58  ;;  %v19180_v4 = vpop.f32.mrb[65].mxu0 }
 0x72c   :  { %v8407_v50 = vpop.f32.mrb[66].mxu0 }
 0x72d   :  { %v8408_v36 = vadd.f32 %v8407_v50, %v8296_v23  ;;  %v19211_v22 = vpop.f32.mrb[67].mxu0 }
 0x72f   :  { %v8509_v5 = vadd.f32 %v8508_v61, %v8408_v36 }
 0x730   :  { %v8414_v53 = vpop.f32.mrb[68].mxu0 }
 0x731   :  { %v8415_v35 = vadd.f32 %v8414_v53, %v8302_v54  ;;  %v19214_v34 = vpop.f32.mrb[69].mxu0 }
 0x733   :  { %v8517_v14 = vadd.f32 %v8516_v52, %v8415_v35 }
 0x734   :  { %v8421_v42 = vpop.f32.mrb[70].mxu0 }
 0x735   :  { %v8422_v2 = vadd.f32 %v8421_v42, %v8308_v16  ;;  %v19217_v21 = vpop.f32.mrb[71].mxu0 }
 0x737   :  { %v8525_v63 = vadd.f32 %v8524_v40, %v8422_v2 }
 0x748   :  { %v8637_v28 = vpop.f32.mrb[72].mxu0 }
 0x749   :  { %v8638_v1 = vadd.f32 %v8637_v28, %v8509_v5  ;;  %v19285_v48 = vpop.f32.mrb[73].mxu0 }
 0x74a   :  { %v8769_v48 = vld [vmem:[%s26703_s5 + $0x28] sm:$0xff] }
 0x74b   :  { %v8735_v31 = vadd.f32 %v8734_v32, %v8638_v1 }
 0x74c   :  { %v8643_v39 = vpop.f32.mrb[74].mxu0 }
 0x74d   :  { %v8750_v56 = vadd.f32 %v8735_v31, %v25384_v15  ;;  %v8644_v12 = vadd.f32 %v8643_v39, %v8517_v14  ;;  %v19288_v61 = vpop.f32.mrb[75].mxu0 }
 0x74f   :  { %v8758_v6 = vadd.f32 %v15834_v19, %v8750_v56  ;;  %v8741_v62 = vadd.f32 %v8740_v8, %v8644_v12 }
 0x750   :  { %v8649_v52 = vpop.f32.mrb[76].mxu0 }
 0x751   :  { %v8761_v55 = vmax.f32 %v8758_v6, 0.0  ;;  %v8751_v7 = vadd.f32 %v8741_v62, %v25389_v0  ;;  %v8650_v13 = vadd.f32 %v8649_v52, %v8525_v63  ;;  %v19291_v40 = vpop.f32.mrb[77].mxu0  ;;  %v9364_v62 = vand.u32 4294901760, %v8769_v48 }
 0x753   :  { %v8759_v59 = vadd.f32 %v15834_v19, %v8751_v7  ;;  %v8747_v49 = vadd.f32 %v8746_v24, %v8650_v13  ;;  %v25613_v58 = vsel %vm8785_vm8, %v8761_v55, 0  ;;  %v8780_v15 = vrot.slane %v8761_v55, 2 }
 0x754   :  { %v9909_v51 = vrot.slane %v8761_v55, 4 }
 0x755   :  { %v8762_v45 = vmax.f32 %v8759_v59, 0.0  ;;  %v8752_v32 = vadd.f32 %v8747_v49, %v25392_v57  ;;  %v25724_v49 = vsub.f32 %v8769_v48, %v9364_v62 }
 0x757   :  { %v8781_v11 = vrot.slane %v8762_v45, 2  ;;  %v25617_v8 = vsel %vm8785_vm8, %v8762_v45, 0  ;;  %v9910_v23 = vrot.slane %v8762_v45, 4  ;;  %v8760_v43 = vadd.f32 %v15834_v19, %v8752_v32 }
 0x758   :  { %v25698_v56 = vand.u32 4294901760, %v25617_v8 }
 0x759   :  { %v8763_v0 = vmax.f32 %v8760_v43, 0.0  ;;  %v8782_v37 = vsel %vm1738_vm2, %v8780_v15, %v8781_v11  ;;  %v9911_v9 = vsel %vm4754_vm6, %v9909_v51, %v9910_v23  ;;  %v9477_v43 = vand.u32 4294901760, %v25724_v49 }
 0x75a   :  { %v8786_v24 = vsel %vm8785_vm8, %v8782_v37, 0  ;;  %v25623_v57 = vsel %vm8785_vm8, %v9911_v9, 0  ;;  %v9430_v40 = vsub.f32 %v25617_v8, %v25698_v56 }
 0x75b   :  { %v8783_v54 = vrot.slane %v8763_v0, 2  ;;  %v9912_v26 = vrot.slane %v8763_v0, 4  ;;  %v8861_v10 = vand.u32 4294901760, %v8786_v24 }
 0x75d   :  { %v8784_v47 = vsel %vm1738_vm2, %v8781_v11, %v8783_v54  ;;  %v9913_v16 = vsel %vm4754_vm6, %v9910_v23, %v9912_v26  ;;  %v8862_v4 = vsub.f32 %v8786_v24, %v8861_v10  ;;  %v9431_v11 = vand.u32 4294901760, %v9430_v40 }
 0x75e   :  { %v8788_v50 = vsel %vm8785_vm8, %v8784_v47, 0  ;;  %v25631_v5 = vsel %vm8785_vm8, %v9913_v16, 0  ;;  %v9478_v26 = vsub.f32 %v25724_v49, %v9477_v43 }
 0x75f   :  { %v25628_v36 = vand.u32 4294901760, %v8788_v50  ;;  %v8863_v22 = vand.u32 4294901760, %v8862_v4  ;;  %v9432_v9 = vsub.f32 %v9430_v40, %v9431_v11 }
 0x761   :  { %v8872_v53 = vsub.f32 %v8788_v50, %v25628_v36  ;;  %v8864_v35 = vsub.f32 %v8862_v4, %v8863_v22 }
 0x763   :  { %v8865_v34 = vand.u32 4294901760, %v8864_v35  ;;  %v8873_v14 = vand.u32 4294901760, %v8872_v53 }
 0x765   :  { %19341 = vmatprep.mubr.f32.mxu0 %v8865_v34  ;;  %v8874_v42 = vsub.f32 %v8872_v53, %v8873_v14 }
 0x767   :  { %v8875_v2 = vand.u32 4294901760, %v8874_v42  ;;  %v25763_v42 = vand.u32 4294901760, %v25623_v57 }
 0x769   :  { %19342 = vmatmul.mubr.f32.vlgmr.msra.gmra.mrb[78].mxu0 %v8875_v2  ;;  %v15841_v2 = vld [vmem:[%s26703_s5 + $0x60] sm:$0xff] }
 0x76a   :  { %21534 = vmatpush3.bf16.msra.mxu0 %v25588_v27  ;;  %19356 = vmatprep.mubr.f32.mxu0 %v8861_v10  ;;  %v25658_v27 = vand.u32 4294901760, %v25613_v58 }
 0x76b   :  { %21536 = vmatprep.subr.bf16.mxu0 %v25591_v30 }
 0x76e   :  { %21538 = vmatpush3.bf16.msra.mxu0 %v25591_v30  ;;  %v8764_v30 = vld [vmem:[%s26703_s5] sm:$0xff] }
 0x76f   :  { %21540 = vmatprep.subr.bf16.mxu0 %v25593_v38 }
 0x772   :  { %21542 = vmatpush3.bf16.msra.mxu0 %v25593_v38  ;;  %v8765_v38 = vld [vmem:[%s26703_s5 + $0x8] sm:$0xff] }
 0x773   :  { %21544 = vmatprep.subr.bf16.mxu0 %v25595_v33 }
 0x775   :  { %19357 = vmatmul.mubr.f32.vlgmr.msra.gmra.mrb[78].mxu0 %v25628_v36 }
 0x776   :  { %21546 = vmatpush3.bf16.msra.mxu0 %v25595_v33  ;;  %19371 = vmatprep.mubr.f32.mxu0 %v8862_v4  ;;  %v9349_v33 = vand.u32 4294901760, %v8764_v30  ;;  %v9479_v4 = vand.u32 4294901760, %v9478_v26 }
 0x777   :  { %21548 = vmatprep.subr.bf16.mxu0 %v25597_v17 }
 0x77a   :  { %21550 = vmatpush3.bf16.msra.mxu0 %v25597_v17  ;;  %v9352_v17 = vand.u32 4294901760, %v8765_v38 }
 0x77b   :  { %21552 = vmatprep.subr.bf16.mxu0 %v25599_v44 }
 0x77c   :  { %v25682_v21 = vsub.f32 %v8765_v38, %v9352_v17  ;;  %v9919_v38 = vand.u32 4294901760, %v15841_v2 }
 0x77e   :  { %21554 = vmatpush3.bf16.msra.mxu0 %v25599_v44  ;;  %v25670_v44 = vsub.f32 %v25613_v58, %v25658_v27  ;;  %v9449_v19 = vand.u32 4294901760, %v25682_v21 }
 0x77f   :  { %21556 = vmatprep.subr.bf16.mxu0 %v25564_v29 }
 0x780   :  { %v9421_v63 = vand.u32 4294901760, %v25670_v44  ;;  %v9450_v7 = vsub.f32 %v25682_v21, %v9449_v19 }
 0x781   :  { %19372 = vmatmul.mubr.f32.vlgmr.msra.gmra.mrb[78].mxu0 %v8872_v53 }
 0x782   :  { %21558 = vmatpush3.bf16.msra.mxu0 %v25564_v29  ;;  %19386 = vmatprep.mubr.f32.mxu0 %v8863_v22  ;;  %v9422_v61 = vsub.f32 %v25670_v44, %v9421_v63  ;;  %v9451_v15 = vand.u32 4294901760, %v9450_v7 }
 0x783   :  { %21560 = vmatprep.subr.bf16.mxu0 %v25574_v60 }
 0x784   :  { %v9423_v58 = vand.u32 4294901760, %v9422_v61 }
 0x786   :  { %21562 = vmatpush3.bf16.msra.mxu0 %v25574_v60 }
 0x787   :  { %21564 = vmatprep.subr.bf16.mxu0 %v25584_v20 }
 0x78a   :  { %21566 = vmatpush3.bf16.msra.mxu0 %v25584_v20 }
 0x78b   :  { %21568 = vmatprep.subr.bf16.mxu0 %v25601_v46 }
 0x78d   :  { %19387 = vmatmul.mubr.f32.vlgmr.msra.gmra.mrb[78].mxu0 %v8873_v14 }
 0x78e   :  { %21570 = vmatpush3.bf16.msra.mxu0 %v25601_v46  ;;  %19401 = vmatprep.mubr.f32.mxu0 %v8861_v10  ;;  %v8766_v46 = vld [vmem:[%s26703_s5 + $0x10] sm:$0xff] }
 0x78f   :  { %21572 = vmatprep.subr.bf16.mxu0 %v25603_v25  ;;  %v9355_v28 = vand.u32 4294901760, %v8766_v46 }
 0x791   :  { %v25695_v39 = vsub.f32 %v8766_v46, %v9355_v28  ;;  %v15844_v46 = vld [vmem:[%s26703_s5 + $0x78] sm:$0xff] }
 0x792   :  { %21574 = vmatpush3.bf16.msra.mxu0 %v25603_v25  ;;  %v8767_v25 = vld [vmem:[%s26703_s5 + $0x18] sm:$0xff] }
 0x793   :  { %21576 = vmatprep.subr.bf16.mxu0 %v25605_v18  ;;  %v9358_v1 = vand.u32 4294901760, %v8767_v25  ;;  %v9456_v13 = vand.u32 4294901760, %v25695_v39 }
 0x795   :  { %v25703_v12 = vsub.f32 %v8767_v25, %v9358_v1  ;;  %v25709_v52 = vpack.c.bf16 %v9358_v1, %v9355_v28  ;;  %v9457_v51 = vsub.f32 %v25695_v39, %v9456_v13  ;;  %v25785_v25 = vsub.f32 %v15841_v2, %v9919_v38  ;;  %v15846_v28 = vld [vmem:[%s26703_s5 + $0x88] sm:$0xff]  ;;  %v15850_v2 = vld [vmem:[%s26704_s6 + $0x30] sm:$0xff] }
 0x796   :  { %21578 = vmatpush3.bf16.msra.mxu0 %v25605_v18  ;;  %v25680_v18 = vsub.f32 %v8764_v30, %v9349_v33  ;;  %v15842_v30 = vld [vmem:[%s26703_s5 + $0x68] sm:$0xff]  ;;  %v25799_v1 = vand.u32 4294901760, %v25631_v5  ;;  %v9934_v61 = vand.u32 4294901760, %v15846_v28 }
 0x797   :  { %21580 = vmatprep.subr.bf16.mxu0 %v25564_v29  ;;  %v9463_v59 = vand.u32 4294901760, %v25703_v12  ;;  %v9458_v37 = vand.u32 4294901760, %v9457_v51  ;;  %v21619_v22 = vpack.c.bf16 %v25703_v12, %v25695_v39 }
 0x798   :  { %v9442_v31 = vand.u32 4294901760, %v25680_v18 }
 0x799   :  { %19402 = vmatmul.mubr.f32.vlgmr.msra.gmra.mrb[78].mxu0 %v25628_v36  ;;  %v9464_v8 = vsub.f32 %v25703_v12, %v9463_v59  ;;  %v21643_v34 = vpack.c.bf16 %v9463_v59, %v9456_v13  ;;  %v25831_v59 = vsub.f32 %v15846_v28, %v9934_v61 }
 0x79a   :  { %21582 = vmatpush3.bf16.msra.mxu0 %v25564_v29  ;;  %19416 = vmatprep.mubr.f32.mxu0 %v8861_v10  ;;  %v8768_v29 = vld [vmem:[%s26703_s5 + $0x20] sm:$0xff]  ;;  %v9443_v55 = vsub.f32 %v25680_v18, %v9442_v31  ;;  %v9433_v10 = vand.u32 4294901760, %v9432_v9  ;;  %v21639_v35 = vpack.c.bf16 %v9449_v19, %v9442_v31 }
 0x79b   :  { %21584 = vmatprep.subr.bf16.mxu0 %v25574_v60  ;;  %v9361_v6 = vand.u32 4294901760, %v8768_v29  ;;  %v9465_v24 = vand.u32 4294901760, %v9464_v8 }
 0x79c   :  { %v9444_v32 = vand.u32 4294901760, %v9443_v55 }
 0x79d   :  { %v25728_v45 = vpack.c.bf16 %v9364_v62, %v9361_v6  ;;  %v21607_v47 = vpack.c.bf16 %v9465_v24, %v9458_v37  ;;  %v25818_v62 = vsub.f32 %v25631_v5, %v25799_v1 }
 0x79e   :  { %21586 = vmatpush3.bf16.msra.mxu0 %v25574_v60  ;;  %v25701_v60 = vpack.c.bf16 %v9352_v17, %v9349_v33  ;;  %v21603_v0 = vpack.c.bf16 %v9451_v15, %v9444_v32  ;;  %v9922_v33 = vand.u32 4294901760, %v15842_v30  ;;  %v25774_v17 = vsub.f32 %v25623_v57, %v25763_v42 }
 0x79f   :  { %21588 = vmatprep.subr.bf16.mxu0 %v25584_v20 }
 0x7a0   :  { %v9991_v57 = vand.u32 4294901760, %v25774_v17  ;;  %v25804_v31 = vpack.c.bf16 %v9922_v33, %v9919_v38 }
 0x7a2   :  { %21590 = vmatpush3.bf16.msra.mxu0 %v25584_v20  ;;  %v25722_v20 = vsub.f32 %v8768_v29, %v9361_v6  ;;  %v10012_v29 = vand.u32 4294901760, %v25785_v25 }
 0x7a3   :  { %21592 = vmatprep.subr.bf16.mxu0 %v25701_v60 }
 0x7a4   :  { %v9470_v23 = vand.u32 4294901760, %v25722_v20  ;;  %v21623_v53 = vpack.c.bf16 %v25724_v49, %v25722_v20  ;;  %v10001_v49 = vand.u32 4294901760, %v25818_v62 }
 0x7a5   :  { %19417 = vmatmul.mubr.f32.vlgmr.msra.gmra.mrb[78].mxu0 %v25628_v36  ;;  %v21615_v36 = vpack.c.bf16 %v25682_v21, %v25680_v18  ;;  %v25787_v18 = vsub.f32 %v15842_v30, %v9922_v33  ;;  %v15851_v30 = vld [vmem:[%s26704_s6 + $0x38] sm:$0xff] }
 0x7a6   :  { %21594 = vmatpush3.bf16.msra.mxu0 %v25701_v60  ;;  %19431 = vmatprep.mubr.f32.mxu0 %v9423_v58  ;;  %v9471_v54 = vsub.f32 %v25722_v20, %v9470_v23  ;;  %v21647_v14 = vpack.c.bf16 %v9477_v43, %v9470_v23 }
 0x7a7   :  { %21596 = vmatprep.subr.bf16.mxu0 %v25709_v52  ;;  %v10019_v48 = vand.u32 4294901760, %v25787_v18 }
 0x7a8   :  { %v9472_v16 = vand.u32 4294901760, %v9471_v54 }
 0x7a9   :  { %v10020_v55 = vsub.f32 %v25787_v18, %v10019_v48 }
 0x7aa   :  { %21598 = vmatpush3.bf16.msra.mxu0 %v25709_v52  ;;  %v21611_v50 = vpack.c.bf16 %v9479_v4, %v9472_v16 }
 0x7ab   :  { %21600 = vmatprep.subr.bf16.mxu0 %v25728_v45 }
 0x7ae   :  { %21602 = vmatpush3.bf16.msra.mxu0 %v25728_v45 }
 0x7af   :  { %21604 = vmatprep.subr.bf16.mxu0 %v21603_v0 }
 0x7b1   :  { %19432 = vmatmul.mubr.f32.vlgmr.msra.gmra.mrb[78].mxu0 %v9433_v10 }
 0x7b2   :  { %21606 = vmatpush3.bf16.msra.mxu0 %v21603_v0  ;;  %19446 = vmatprep.mubr.f32.mxu0 %v25658_v27 }
 0x7b3   :  { %21608 = vmatprep.subr.bf16.mxu0 %v21607_v47 }
 0x7b6   :  { %21610 = vmatpush3.bf16.msra.mxu0 %v21607_v47  ;;  %v21687_v47 = vpack.c.bf16 %v25787_v18, %v25785_v25 }
 0x7b7   :  { %21612 = vmatprep.subr.bf16.mxu0 %v21611_v50 }
 0x7ba   :  { %21614 = vmatpush3.bf16.msra.mxu0 %v21611_v50  ;;  %v21711_v50 = vpack.c.bf16 %v10019_v48, %v10012_v29 }
 0x7bb   :  { %21616 = vmatprep.subr.bf16.mxu0 %v21615_v36 }
 0x7bd   :  { %19447 = vmatmul.mubr.f32.vlgmr.msra.gmra.mrb[78].mxu0 %v25698_v56 }
 0x7be   :  { %21618 = vmatpush3.bf16.msra.mxu0 %v21615_v36  ;;  %19461 = vmatprep.mubr.f32.mxu0 %v25670_v44  ;;  %v15843_v44 = vld [vmem:[%s26703_s5 + $0x70] sm:$0xff] }
 0x7bf   :  { %21620 = vmatprep.subr.bf16.mxu0 %v21619_v22  ;;  %v9925_v21 = vand.u32 4294901760, %v15843_v44 }
 0x7c1   :  { %v25806_v19 = vsub.f32 %v15843_v44, %v9925_v21  ;;  %v10512_v44 = vand.u32 4294901760, %v15851_v30 }
 0x7c2   :  { %21622 = vmatpush3.bf16.msra.mxu0 %v21619_v22 }
 0x7c3   :  { %21624 = vmatprep.subr.bf16.mxu0 %v21623_v53  ;;  %v10026_v7 = vand.u32 4294901760, %v25806_v19 }
 0x7c5   :  { %v10027_v32 = vsub.f32 %v25806_v19, %v10026_v7 }
 0x7c6   :  { %21626 = vmatpush3.bf16.msra.mxu0 %v21623_v53  ;;  %v15848_v53 = vld [vmem:[%s26704_s6 + $0x20] sm:$0xff] }
 0x7c7   :  { %21628 = vmatprep.subr.bf16.mxu0 %v25701_v60  ;;  %v10028_v23 = vand.u32 4294901760, %v10027_v32 }
 0x7c9   :  { %19462 = vmatmul.mubr.f32.vlgmr.msra.gmra.mrb[78].mxu0 %v9430_v40 }
 0x7ca   :  { %21630 = vmatpush3.bf16.msra.mxu0 %v25701_v60  ;;  %19476 = vmatprep.mubr.f32.mxu0 %v9421_v63  ;;  %v9928_v63 = vand.u32 4294901760, %v15844_v46 }
 0x7cb   :  { %21632 = vmatprep.subr.bf16.mxu0 %v25709_v52 }
 0x7cc   :  { %v25808_v39 = vsub.f32 %v15844_v46, %v9928_v63  ;;  %v25814_v6 = vpack.c.bf16 %v9928_v63, %v9925_v21 }
 0x7ce   :  { %21634 = vmatpush3.bf16.msra.mxu0 %v25709_v52  ;;  %v10033_v13 = vand.u32 4294901760, %v25808_v39  ;;  %v21691_v16 = vpack.c.bf16 %v25808_v39, %v25806_v19 }
 0x7cf   :  { %21636 = vmatprep.subr.bf16.mxu0 %v25728_v45 }
 0x7d0   :  { %v10034_v15 = vsub.f32 %v25808_v39, %v10033_v13  ;;  %v21715_v36 = vpack.c.bf16 %v10033_v13, %v10026_v7  ;;  %v15847_v7 = vld [vmem:[%s26705_s7 + $0x2] ss:$0 sm:$0xff] }
 0x7d2   :  { %21638 = vmatpush3.bf16.msra.mxu0 %v25728_v45  ;;  %v10035_v43 = vand.u32 4294901760, %v10034_v15 }
 0x7d3   :  { %21640 = vmatprep.subr.bf16.mxu0 %v21639_v35 }
 0x7d4   :  { %v21679_v24 = vpack.c.bf16 %v10035_v43, %v10028_v23 }
 0x7d5   :  { %19477 = vmatmul.mubr.f32.vlgmr.msra.gmra.mrb[78].mxu0 %v9431_v11  ;;  %v10047_v11 = vand.u32 4294901760, %v25831_v59 }
 0x7d6   :  { %21642 = vmatpush3.bf16.msra.mxu0 %v21639_v35  ;;  %19491 = vmatprep.mubr.f32.mxu0 %v25658_v27  ;;  %v15849_v35 = vld [vmem:[%s26704_s6 + $0x28] sm:$0xff] }
 0x7d7   :  { %21644 = vmatprep.subr.bf16.mxu0 %v21643_v34  ;;  %v10048_v37 = vsub.f32 %v25831_v59, %v10047_v11 }
 0x7d9   :  { %v10049_v26 = vand.u32 4294901760, %v10048_v37 }
 0x7da   :  { %21646 = vmatpush3.bf16.msra.mxu0 %v21643_v34  ;;  %v10503_v34 = vand.u32 4294901760, %v15848_v53 }
 0x7db   :  { %21648 = vmatprep.subr.bf16.mxu0 %v21647_v14 }
 0x7dc   :  { %v10593_v38 = vsub.f32 %v15848_v53, %v10503_v34 }
 0x7de   :  { %21650 = vmatpush3.bf16.msra.mxu0 %v21647_v14  ;;  %v10506_v14 = vand.u32 4294901760, %v15849_v35  ;;  %v10594_v46 = vand.u32 4294901760, %v10593_v38 }
 0x7df   :  { %21652 = vmatprep.subr.bf16.mxu0 %v25701_v60 }
 0x7e0   :  { %v10600_v33 = vsub.f32 %v15849_v35, %v10506_v14  ;;  %v10485_v35 = vld [vmem:[%s26704_s6 + $0x10] sm:$0xff] }
 0x7e1   :  { %19492 = vmatmul.mubr.f32.vlgmr.msra.gmra.mrb[78].mxu0 %v25698_v56 }
 0x7e2   :  { %21654 = vmatpush3.bf16.msra.mxu0 %v25701_v60  ;;  %19506 = vmatprep.mubr.f32.mxu0 %v25658_v27  ;;  %v15845_v27 = vld [vmem:[%s26703_s5 + $0x80] sm:$0xff]  ;;  %v9992_v60 = vsub.f32 %v25774_v17, %v9991_v57 }
 0x7e3   :  { %21656 = vmatprep.subr.bf16.mxu0 %v25709_v52  ;;  %v9931_v12 = vand.u32 4294901760, %v15845_v27 }
 0x7e4   :  { %v9993_v5 = vand.u32 4294901760, %v9992_v60 }
 0x7e5   :  { %v25829_v40 = vsub.f32 %v15845_v27, %v9931_v12  ;;  %v25835_v20 = vpack.c.bf16 %v9934_v61, %v9931_v12  ;;  %v10614_v27 = vsub.f32 %v15851_v30, %v10512_v44 }
 0x7e6   :  { %21658 = vmatpush3.bf16.msra.mxu0 %v25709_v52  ;;  %v10013_v52 = vsub.f32 %v25785_v25, %v10012_v29  ;;  %v10601_v25 = vand.u32 4294901760, %v10600_v33 }
 0x7e7   :  { %21660 = vmatprep.subr.bf16.mxu0 %v25728_v45  ;;  %v10040_v51 = vand.u32 4294901760, %v25829_v40  ;;  %v21695_v4 = vpack.c.bf16 %v25831_v59, %v25829_v40  ;;  %v10615_v48 = vand.u32 4294901760, %v10614_v27 }
 0x7e8   :  { %v10014_v58 = vand.u32 4294901760, %v10013_v52  ;;  %v10602_v21 = vsub.f32 %v10600_v33, %v10601_v25  ;;  %v21767_v52 = vpack.c.bf16 %v10601_v25, %v10594_v46 }
 0x7e9   :  { %v10041_v0 = vsub.f32 %v25829_v40, %v10040_v51  ;;  %v21719_v22 = vpack.c.bf16 %v10047_v11, %v10040_v51  ;;  %v10616_v39 = vsub.f32 %v10614_v27, %v10615_v48 }
 0x7ea   :  { %21662 = vmatpush3.bf16.msra.mxu0 %v25728_v45  ;;  %v10021_v45 = vand.u32 4294901760, %v10020_v55 }
 0x7eb   :  { %21664 = vmatprep.subr.bf16.mxu0 %v25804_v31  ;;  %v10042_v54 = vand.u32 4294901760, %v10041_v0  ;;  %v10617_v12 = vand.u32 4294901760, %v10616_v39 }
 0x7ec   :  { %v21675_v8 = vpack.c.bf16 %v10021_v45, %v10014_v58 }
 0x7ed   :  { %19507 = vmatmul.mubr.f32.vlgmr.msra.gmra.mrb[78].mxu0 %v25698_v56  ;;  %v10002_v56 = vsub.f32 %v25818_v62, %v10001_v49  ;;  %v21683_v10 = vpack.c.bf16 %v10049_v26, %v10042_v54 }
 0x7ee   :  { %21666 = vmatpush3.bf16.msra.mxu0 %v25804_v31  ;;  %19521 = vmatprep.mubr.f32.mxu0 %v9993_v5 }
 0x7ef   :  { %21668 = vmatprep.subr.bf16.mxu0 %v25814_v6  ;;  %v10003_v9 = vand.u32 4294901760, %v10002_v56 }
 0x7f2   :  { %21670 = vmatpush3.bf16.msra.mxu0 %v25814_v6 }
 0x7f3   :  { %21672 = vmatprep.subr.bf16.mxu0 %v25835_v20 }
 0x7f6   :  { %21674 = vmatpush3.bf16.msra.mxu0 %v25835_v20 }
 0x7f7   :  { %21676 = vmatprep.subr.bf16.mxu0 %v21675_v8 }
 0x7f9   :  { %19522 = vmatmul.mubr.f32.vlgmr.msra.gmra.mrb[78].mxu0 %v10003_v9 }
 0x7fa   :  { %21678 = vmatpush3.bf16.msra.mxu0 %v21675_v8  ;;  %19536 = vmatprep.mubr.f32.mxu0 %v25763_v42 }
 0x7fb   :  { %21680 = vmatprep.subr.bf16.mxu0 %v21679_v24 }
 0x7fe   :  { %21682 = vmatpush3.bf16.msra.mxu0 %v21679_v24 }
 0x7ff   :  { %21684 = vmatprep.subr.bf16.mxu0 %v21683_v10 }
 0x802   :  { %21686 = vmatpush3.bf16.msra.mxu0 %v21683_v10 }
 0x803   :  { %21688 = vmatprep.subr.bf16.mxu0 %v21687_v47 }
 0x805   :  { %19537 = vmatmul.mubr.f32.vlgmr.msra.gmra.mrb[78].mxu0 %v25799_v1 }
 0x806   :  { %21690 = vmatpush3.bf16.msra.mxu0 %v21687_v47  ;;  %19551 = vmatprep.mubr.f32.mxu0 %v25774_v17  ;;  %v10509_v17 = vand.u32 4294901760, %v15850_v2 }
 0x807   :  { %21692 = vmatprep.subr.bf16.mxu0 %v21691_v16 }
 0x808   :  { %v25900_v18 = vpack.c.bf16 %v10512_v44, %v10509_v17  ;;  %v10607_v63 = vsub.f32 %v15850_v2, %v10509_v17  ;;  %v11041_v2 = vand.u32 4294901760, %v10485_v35 }
 0x80a   :  { %21694 = vmatpush3.bf16.msra.mxu0 %v21691_v16  ;;  %v10608_v29 = vand.u32 4294901760, %v10607_v63  ;;  %v10483_v16 = vld [vmem:[%s26704_s6] sm:$0xff] }
 0x80b   :  { %21696 = vmatprep.subr.bf16.mxu0 %v21695_v4 }
 0x80c   :  { %v10609_v19 = vsub.f32 %v10607_v63, %v10608_v29  ;;  %v25904_v55 = vpack.c.bf16 %v10615_v48, %v10608_v29 }
 0x80e   :  { %21698 = vmatpush3.bf16.msra.mxu0 %v21695_v4  ;;  %v10610_v60 = vand.u32 4294901760, %v10609_v19  ;;  %v10484_v4 = vld [vmem:[%s26704_s6 + $0x8] sm:$0xff] }
 0x80f   :  { %21700 = vmatprep.subr.bf16.mxu0 %v25804_v31 }
 0x810   :  { %v21747_v61 = vpack.c.bf16 %v10617_v12, %v10610_v60 }
 0x811   :  { %19552 = vmatmul.mubr.f32.vlgmr.msra.gmra.mrb[78].mxu0 %v25818_v62  ;;  %v21755_v62 = vpack.c.bf16 %v10614_v27, %v10607_v63 }
 0x812   :  { %21702 = vmatpush3.bf16.msra.mxu0 %v25804_v31  ;;  %19566 = vmatprep.mubr.f32.mxu0 %v9991_v57  ;;  %v10595_v57 = vsub.f32 %v10593_v38, %v10594_v46 }
 0x813   :  { %21704 = vmatprep.subr.bf16.mxu0 %v25814_v6 }
 0x814   :  { %v10596_v28 = vand.u32 4294901760, %v10595_v57  ;;  %v11139_v57 = vsub.f32 %v10485_v35, %v11041_v2 }
 0x816   :  { %21706 = vmatpush3.bf16.msra.mxu0 %v25814_v6  ;;  %v11140_v48 = vand.u32 4294901760, %v11139_v57 }
 0x817   :  { %21708 = vmatprep.subr.bf16.mxu0 %v25835_v20 }
 0x81a   :  { %21710 = vmatpush3.bf16.msra.mxu0 %v25835_v20 }
 0x81b   :  { %21712 = vmatprep.subr.bf16.mxu0 %v21711_v50 }
 0x81d   :  { %19567 = vmatmul.mubr.f32.vlgmr.msra.gmra.mrb[78].mxu0 %v10001_v49 }
 0x81e   :  { %21714 = vmatpush3.bf16.msra.mxu0 %v21711_v50  ;;  %19581 = vmatprep.mubr.f32.mxu0 %v25763_v42 }
 0x81f   :  { %21716 = vmatprep.subr.bf16.mxu0 %v21715_v36 }
 0x822   :  { %21718 = vmatpush3.bf16.msra.mxu0 %v21715_v36  ;;  %v11035_v36 = vand.u32 4294901760, %v10483_v16 }
 0x823   :  { %21720 = vmatprep.subr.bf16.mxu0 %v21719_v22 }
 0x826   :  { %21722 = vmatpush3.bf16.msra.mxu0 %v21719_v22  ;;  %v11038_v22 = vand.u32 4294901760, %v10484_v4 }
 0x827   :  { %21724 = vmatprep.subr.bf16.mxu0 %v25804_v31 }
 0x828   :  { %v25957_v27 = vpack.c.bf16 %v11038_v22, %v11035_v36 }
 0x829   :  { %19582 = vmatmul.mubr.f32.vlgmr.msra.gmra.mrb[78].mxu0 %v25799_v1 }
 0x82a   :  { %21726 = vmatpush3.bf16.msra.mxu0 %v25804_v31  ;;  %19596 = vmatprep.mubr.f32.mxu0 %v25763_v42  ;;  %v25890_v42 = vpack.c.bf16 %v10506_v14, %v10503_v34  ;;  %v10486_v34 = vld [vmem:[%s26704_s6 + $0x18] sm:$0xff]  ;;  %v25944_v14 = vsub.f32 %v10483_v16, %v11035_v36 }
 0x82b   :  { %21728 = vmatprep.subr.bf16.mxu0 %v25814_v6  ;;  %v11044_v30 = vand.u32 4294901760, %v10486_v34 }
 0x82c   :  { %21736 = vmatprep.subr.bf16.mxu1 %v25890_v42  ;;  %v11126_v44 = vand.u32 4294901760, %v25944_v14 }
 0x82d   :  { %21738 = vmatpush3.bf16.msra.mxu1 %v25890_v42  ;;  %v25963_v39 = vpack.c.bf16 %v11044_v30, %v11041_v2 }
 0x82e   :  { %21730 = vmatpush3.bf16.msra.mxu0 %v25814_v6  ;;  %21740 = vmatprep.subr.bf16.mxu1 %v25900_v18  ;;  %v21751_v6 = vpack.c.bf16 %v10600_v33, %v10593_v38  ;;  %v11132_v38 = vsub.f32 %v10484_v4, %v11038_v22 }
 0x82f   :  { %21732 = vmatprep.subr.bf16.mxu0 %v25835_v20 }
 0x830   :  { %v11133_v25 = vand.u32 4294901760, %v11132_v38 }
 0x831   :  { %21742 = vmatpush3.bf16.msra.mxu1 %v25900_v18 }
 0x832   :  { %21734 = vmatpush3.bf16.msra.mxu0 %v25835_v20  ;;  %v11134_v29 = vsub.f32 %v11132_v38, %v11133_v25 }
 0x833   :  { %22095 = vmatprep.subr.bf16.mxu0 %v26834_v3 }
 0x834   :  { %v11135_v12 = vand.u32 4294901760, %v11134_v29 }
 0x835   :  { %19597 = vmatmul.mubr.f32.vlgmr.msra.gmra.mrb[78].mxu0 %v25799_v1  ;;  %v10603_v1 = vand.u32 4294901760, %v10602_v21  ;;  %v11146_v21 = vsub.f32 %v10486_v34, %v11044_v30 }
 0x836   :  { %20225 = vmatprep.mubr.msk.f32.mxu0 %vm22701_vm4, %v26833_v41 }
 0x837   :  { %v21743_v31 = vpack.c.bf16 %v10603_v1, %v10596_v28  ;;  %v11127_v28 = vsub.f32 %v25944_v14, %v11126_v44 }
 0x839   :  { %21744 = vmatprep.subr.bf16.mxu1 %v21743_v31  ;;  %v11128_v60 = vand.u32 4294901760, %v11127_v28 }
 0x908   :  { %v19598_v13 = vpop.f32.mrb[78].mxu0 }
 0x909   :  { %v10480_v40 = vadd.f32 %v19598_v13, %v15847_v7  ;;  %v10462_v59 = vpop.f32.mrb[79].mxu0 }
 0x90a   :  { %v10479_v5 = vadd.f32 %v15847_v7, %v10462_v59  ;;  %v21799_v59 = vpack.c.bf16 %v11132_v38, %v25944_v14 }
 0x90b   :  { %v25909_v20 = vmax.f32 %v10480_v40, 0.0 }
 0x90c   :  { %v10481_v49 = vmax.f32 %v10479_v5, 0.0  ;;  %v21803_v5 = vpack.c.bf16 %v11146_v21, %v11139_v57 }
 0x90d   :  { %v10495_v58 = vrot.slane %v25909_v20, 2  ;;  %v11568_v45 = vrot.slane %v25909_v20, 4  ;;  %v11032_v33 = vsel %vm10497_vm9, %v25909_v20, 0 }
 0x90e   :  { %v10494_v32 = vrot.slane %v10481_v49, 2  ;;  %v11567_v15 = vrot.slane %v10481_v49, 4  ;;  %v11030_v50 = vsel %vm10497_vm9, %v10481_v49, 0  ;;  %v25952_v46 = vand.u32 4294901760, %v11032_v33 }
 0x90f   :  { %v10500_v51 = vsel %vm10497_vm9, %v10495_v58, 0  ;;  %v25936_v53 = vand.u32 4294901760, %v11030_v50  ;;  %v21815_v49 = vpack.c.bf16 %v11133_v25, %v11126_v44 }
 0x910   :  { %v25914_v11 = vand.u32 4294901760, %v10500_v51  ;;  %v10496_v56 = vsel %vm1738_vm2, %v10494_v32, %v10495_v58  ;;  %v25920_v8 = vsel %vm4754_vm6, %v11567_v15, %v11568_v45  ;;  %v11114_v1 = vsub.f32 %v11032_v33, %v25952_v46  ;;  %v15852_v58 = vld [vmem:[%s26704_s6 + $0x40] sm:$0xff]  ;;  %v15853_v32 = vld [vmem:[%s26704_s6 + $0x48] sm:$0xff] }
 0x911   :  { %v10498_v23 = vsel %vm10497_vm9, %v10496_v56, 0  ;;  %v11104_v17 = vsub.f32 %v11030_v50, %v25936_v53  ;;  %v11570_v15 = vsel %vm10497_vm9, %v25920_v8, 0  ;;  %v11578_v56 = vand.u32 4294901760, %v15853_v32 }
 0x912   :  { %v10582_v43 = vsub.f32 %v10500_v51, %v25914_v11  ;;  %v10571_v0 = vand.u32 4294901760, %v10498_v23  ;;  %v11575_v51 = vand.u32 4294901760, %v15852_v58 }
 0x913   :  { %v11105_v63 = vand.u32 4294901760, %v11104_v17 }
 0x914   :  { %v10583_v37 = vand.u32 4294901760, %v10582_v43  ;;  %v10572_v9 = vsub.f32 %v10498_v23, %v10571_v0  ;;  %v25985_v23 = vand.u32 4294901760, %v11570_v15  ;;  %v25994_v8 = vsub.f32 %v15852_v58, %v11575_v51 }
 0x915   :  { %v11106_v19 = vsub.f32 %v11104_v17, %v11105_v63  ;;  %v21831_v20 = vpack.c.bf16 %v11578_v56, %v11575_v51 }
 0x916   :  { %v10573_v24 = vand.u32 4294901760, %v10572_v9  ;;  %v10584_v54 = vsub.f32 %v10582_v43, %v10583_v37 }
 0x918   :  { %v10574_v26 = vsub.f32 %v10572_v9, %v10573_v24  ;;  %v10585_v47 = vand.u32 4294901760, %v10584_v54  ;;  %v11572_v54 = vsel %vm10497_vm9, %v11568_v45, 0 }
 0x91a   :  { %v10575_v10 = vand.u32 4294901760, %v10574_v26  ;;  %v11644_v26 = vsub.f32 %v11570_v15, %v25985_v23 }
 0x91c   :  { %19607 = vmatprep.mubr.f32.mxu1 %v10575_v10  ;;  %v11666_v10 = vand.u32 4294901760, %v25994_v8  ;;  %v11645_v36 = vand.u32 4294901760, %v11644_v26 }
 0x91d   :  { %19608 = vmatmul.mubr.f32.vlgmr.msra.gmra.mrb[78].mxu1 %v10585_v47  ;;  %v26001_v47 = vand.u32 4294901760, %v11572_v54 }
 0x91e   :  { %21746 = vmatpush3.bf16.msra.mxu1 %v21743_v31  ;;  %19618 = vmatprep.mubr.f32.mxu1 %v10571_v0  ;;  %v11147_v31 = vand.u32 4294901760, %v11146_v21  ;;  %v11667_v45 = vsub.f32 %v25994_v8, %v11666_v10  ;;  %v11646_v2 = vsub.f32 %v11644_v26, %v11645_v36 }
 0x91f   :  { %21748 = vmatprep.subr.bf16.mxu1 %v21747_v61  ;;  %v11654_v22 = vsub.f32 %v11572_v54, %v26001_v47 }
 0x920   :  { %v11668_v38 = vand.u32 4294901760, %v11667_v45  ;;  %v11647_v25 = vand.u32 4294901760, %v11646_v2  ;;  %v15858_v2 = vld [vmem:[%s26706_s8 + $0x20] sm:$0xff] }
 0x921   :  { %v11655_v33 = vand.u32 4294901760, %v11654_v22 }
 0x922   :  { %21750 = vmatpush3.bf16.msra.mxu1 %v21747_v61  ;;  %v11141_v61 = vsub.f32 %v11139_v57, %v11140_v48 }
 0x923   :  { %21752 = vmatprep.subr.bf16.mxu1 %v21751_v6  ;;  %v11656_v57 = vsub.f32 %v11654_v22, %v11655_v33 }
 0x925   :  { %19619 = vmatmul.mubr.f32.vlgmr.msra.gmra.mrb[78].mxu1 %v25914_v11  ;;  %v11657_v28 = vand.u32 4294901760, %v11656_v57 }
 0x926   :  { %21754 = vmatpush3.bf16.msra.mxu1 %v21751_v6  ;;  %19629 = vmatprep.mubr.f32.mxu1 %v10572_v9  ;;  %v11148_v6 = vsub.f32 %v11146_v21, %v11147_v31 }
 0x927   :  { %21756 = vmatprep.subr.bf16.mxu1 %v21755_v62 }
 0x928   :  { %v11149_v7 = vand.u32 4294901760, %v11148_v6 }
 0x92a   :  { %21758 = vmatpush3.bf16.msra.mxu1 %v21755_v62  ;;  %v11107_v62 = vand.u32 4294901760, %v11106_v19  ;;  %v12114_v19 = vld [vmem:[%s26706_s8] sm:$0xff] }
 0x92b   :  { %21760 = vmatprep.subr.bf16.mxu1 %v25890_v42 }
 0x92d   :  { %19630 = vmatmul.mubr.f32.vlgmr.msra.gmra.mrb[78].mxu1 %v10582_v43  ;;  %v15854_v43 = vld [vmem:[%s26704_s6 + $0x50] sm:$0xff] }
 0x92e   :  { %21762 = vmatpush3.bf16.msra.mxu1 %v25890_v42  ;;  %19640 = vmatprep.mubr.f32.mxu1 %v10573_v24  ;;  %v11672_v24 = vsub.f32 %v15853_v32, %v11578_v56 }
 0x92f   :  { %21764 = vmatprep.subr.bf16.mxu1 %v25900_v18 }
 0x930   :  { %v11673_v16 = vand.u32 4294901760, %v11672_v24  ;;  %v21847_v29 = vpack.c.bf16 %v11672_v24, %v25994_v8 }
 0x932   :  { %21766 = vmatpush3.bf16.msra.mxu1 %v25900_v18  ;;  %v11674_v35 = vsub.f32 %v11672_v24, %v11673_v16 }
 0x933   :  { %21768 = vmatprep.subr.bf16.mxu1 %v21767_v52 }
 0x935   :  { %19641 = vmatmul.mubr.f32.vlgmr.msra.gmra.mrb[78].mxu1 %v10583_v37  ;;  %v11581_v37 = vand.u32 4294901760, %v15854_v43 }
 0x936   :  { %21770 = vmatpush3.bf16.msra.mxu1 %v21767_v52  ;;  %19651 = vmatprep.mubr.f32.mxu1 %v10571_v0 }
 0x937   :  { %21772 = vmatprep.subr.bf16.mxu1 %v25904_v55  ;;  %v11679_v4 = vsub.f32 %v15854_v43, %v11581_v37 }
 0x939   :  { %v11680_v34 = vand.u32 4294901760, %v11679_v4 }
 0x93a   :  { %21774 = vmatpush3.bf16.msra.mxu1 %v25904_v55  ;;  %v21791_v55 = vpack.c.bf16 %v11135_v12, %v11128_v60  ;;  %v12122_v60 = vand.u32 4294901760, %v12114_v19 }
 0x93b   :  { %21776 = vmatprep.subr.bf16.mxu1 %v25890_v42  ;;  %v11681_v44 = vsub.f32 %v11679_v4, %v11680_v34 }
 0x93d   :  { %19652 = vmatmul.mubr.f32.vlgmr.msra.gmra.mrb[78].mxu1 %v25914_v11 }
 0x93e   :  { %21778 = vmatpush3.bf16.msra.mxu1 %v25890_v42  ;;  %19662 = vmatprep.mubr.f32.mxu1 %v10571_v0  ;;  %v11115_v42 = vand.u32 4294901760, %v11114_v1  ;;  %v15855_v0 = vld [vmem:[%s26704_s6 + $0x58] sm:$0xff] }
 0x93f   :  { %21780 = vmatprep.subr.bf16.mxu1 %v25900_v18  ;;  %v11584_v9 = vand.u32 4294901760, %v15855_v0 }
 0x940   :  { %v11116_v52 = vsub.f32 %v11114_v1, %v11115_v42 }
 0x941   :  { %v11686_v50 = vsub.f32 %v15855_v0, %v11584_v9  ;;  %v21835_v30 = vpack.c.bf16 %v11584_v9, %v11581_v37 }
 0x942   :  { %21782 = vmatpush3.bf16.msra.mxu1 %v25900_v18  ;;  %v11142_v18 = vand.u32 4294901760, %v11141_v61  ;;  %v11117_v13 = vand.u32 4294901760, %v11116_v52  ;;  %v12202_v61 = vsub.f32 %v12114_v19, %v12122_v60  ;;  %v12117_v52 = vld [vmem:[%s26706_s8 + $0x18] sm:$0xff] }
 0x943   :  { %21784 = vmatprep.subr.bf16.mxu1 %v25957_v27  ;;  %v11687_v14 = vand.u32 4294901760, %v11686_v50 }
 0x944   :  { %v21795_v40 = vpack.c.bf16 %v11149_v7, %v11142_v18  ;;  %v12131_v18 = vand.u32 4294901760, %v12117_v52  ;;  %v12203_v7 = vand.u32 4294901760, %v12202_v61 }
 0x945   :  { %19663 = vmatmul.mubr.f32.vlgmr.msra.gmra.mrb[78].mxu1 %v25914_v11  ;;  %v21819_v11 = vpack.c.bf16 %v11147_v31, %v11140_v48  ;;  %v21863_v48 = vpack.c.bf16 %v11673_v16, %v11666_v10  ;;  %v21867_v31 = vpack.c.bf16 %v11687_v14, %v11680_v34  ;;  %v15856_v10 = vld [vmem:[%s26705_s7 + $0x3] ss:$0 sm:$0xff] }
 0x946   :  { %21786 = vmatpush3.bf16.msra.mxu1 %v25957_v27  ;;  %19673 = vmatprep.mubr.f32.mxu1 %v11107_v62  ;;  %v12116_v62 = vld [vmem:[%s26706_s8 + $0x10] sm:$0xff] }
 0x947   :  { %21788 = vmatprep.subr.bf16.mxu1 %v25963_v39 }
 0x94a   :  { %21790 = vmatpush3.bf16.msra.mxu1 %v25963_v39 }
 0x94b   :  { %21792 = vmatprep.subr.bf16.mxu1 %v21791_v55 }
 0x94d   :  { %19674 = vmatmul.mubr.f32.vlgmr.msra.gmra.mrb[78].mxu1 %v11117_v13 }
 0x94e   :  { %21794 = vmatpush3.bf16.msra.mxu1 %v21791_v55  ;;  %19684 = vmatprep.mubr.f32.mxu1 %v25936_v53  ;;  %v12128_v55 = vand.u32 4294901760, %v12116_v62 }
 0x94f   :  { %21796 = vmatprep.subr.bf16.mxu1 %v21795_v40 }
 0x952   :  { %21798 = vmatpush3.bf16.msra.mxu1 %v21795_v40  ;;  %v26038_v40 = vpack.c.bf16 %v12131_v18, %v12128_v55 }
 0x953   :  { %21800 = vmatprep.subr.bf16.mxu1 %v21799_v59 }
 0x955   :  { %19685 = vmatmul.mubr.f32.vlgmr.msra.gmra.mrb[78].mxu1 %v25952_v46 }
 0x956   :  { %21802 = vmatpush3.bf16.msra.mxu1 %v21799_v59  ;;  %19695 = vmatprep.mubr.f32.mxu1 %v11104_v17  ;;  %v11675_v17 = vand.u32 4294901760, %v11674_v35  ;;  %v12216_v59 = vsub.f32 %v12116_v62, %v12128_v55 }
 0x957   :  { %21804 = vmatprep.subr.bf16.mxu1 %v21803_v5 }
 0x958   :  { %v21839_v21 = vpack.c.bf16 %v11675_v17, %v11668_v38  ;;  %v12217_v15 = vand.u32 4294901760, %v12216_v59 }
 0x95a   :  { %21806 = vmatpush3.bf16.msra.mxu1 %v21803_v5  ;;  %v12223_v5 = vsub.f32 %v12117_v52, %v12131_v18  ;;  %v12218_v56 = vsub.f32 %v12216_v59, %v12217_v15 }
 0x95b   :  { %21808 = vmatprep.subr.bf16.mxu1 %v25957_v27 }
 0x95c   :  { %v12224_v51 = vand.u32 4294901760, %v12223_v5  ;;  %v12219_v0 = vand.u32 4294901760, %v12218_v56  ;;  %v21895_v24 = vpack.c.bf16 %v12223_v5, %v12216_v59 }
 0x95d   :  { %19696 = vmatmul.mubr.f32.vlgmr.msra.gmra.mrb[78].mxu1 %v11114_v1 }
 0x95e   :  { %21810 = vmatpush3.bf16.msra.mxu1 %v25957_v27  ;;  %19706 = vmatprep.mubr.f32.mxu1 %v11105_v63  ;;  %v11682_v63 = vand.u32 4294901760, %v11681_v44  ;;  %v15860_v44 = vld [vmem:[%s26706_s8 + $0x30] sm:$0xff] }
 0x95f   :  { %21812 = vmatprep.subr.bf16.mxu1 %v25963_v39 }
 0x962   :  { %21814 = vmatpush3.bf16.msra.mxu1 %v25963_v39 }
 0x963   :  { %21816 = vmatprep.subr.bf16.mxu1 %v21815_v49 }
 0x965   :  { %19707 = vmatmul.mubr.f32.vlgmr.msra.gmra.mrb[78].mxu1 %v11115_v42 }
 0x966   :  { %21818 = vmatpush3.bf16.msra.mxu1 %v21815_v49  ;;  %19717 = vmatprep.mubr.f32.mxu1 %v25936_v53  ;;  %v12204_v49 = vsub.f32 %v12202_v61, %v12203_v7 }
 0x967   :  { %21820 = vmatprep.subr.bf16.mxu1 %v21819_v11 }
 0x968   :  { %v12205_v32 = vand.u32 4294901760, %v12204_v49 }
 0x96a   :  { %21822 = vmatpush3.bf16.msra.mxu1 %v21819_v11 }
 0x96b   :  { %21824 = vmatprep.subr.bf16.mxu1 %v25957_v27 }
 0x96d   :  { %19718 = vmatmul.mubr.f32.vlgmr.msra.gmra.mrb[78].mxu1 %v25952_v46 }
 0x96e   :  { %21826 = vmatpush3.bf16.msra.mxu1 %v25957_v27  ;;  %19728 = vmatprep.mubr.f32.mxu1 %v25936_v53  ;;  %v11688_v53 = vsub.f32 %v11686_v50, %v11687_v14 }
 0x96f   :  { %21828 = vmatprep.subr.bf16.mxu1 %v25963_v39 }
 0x970   :  { %v11689_v27 = vand.u32 4294901760, %v11688_v53  ;;  %v15861_v53 = vld [vmem:[%s26706_s8 + $0x38] sm:$0xff] }
 0x972   :  { %21830 = vmatpush3.bf16.msra.mxu1 %v25963_v39  ;;  %v21843_v1 = vpack.c.bf16 %v11689_v27, %v11682_v63  ;;  %v12115_v39 = vld [vmem:[%s26706_s8 + $0x8] sm:$0xff]  ;;  %v12626_v63 = vand.u32 4294901760, %v15860_v44  ;;  %v12629_v27 = vand.u32 4294901760, %v15861_v53 }
 0x973   :  { %21832 = vmatprep.subr.bf16.mxu1 %v21831_v20  ;;  %v12125_v42 = vand.u32 4294901760, %v12115_v39 }
 0x975   :  { %19729 = vmatmul.mubr.f32.vlgmr.msra.gmra.mrb[78].mxu1 %v25952_v46  ;;  %v21851_v46 = vpack.c.bf16 %v11686_v50, %v11679_v4  ;;  %v26028_v12 = vpack.c.bf16 %v12125_v42, %v12122_v60  ;;  %v12209_v6 = vsub.f32 %v12115_v39, %v12125_v42 }
 0x976   :  { %21834 = vmatpush3.bf16.msra.mxu1 %v21831_v20  ;;  %19739 = vmatprep.mubr.f32.mxu1 %v11647_v25 }
 0x977   :  { %21836 = vmatprep.subr.bf16.mxu1 %v21835_v30  ;;  %v12210_v13 = vand.u32 4294901760, %v12209_v6  ;;  %v21892_v9 = vpack.c.bf16 %v12209_v6, %v12202_v61 }
 0x979   :  { %v12211_v58 = vsub.f32 %v12209_v6, %v12210_v13  ;;  %v21904_v54 = vpack.c.bf16 %v12210_v13, %v12203_v7  ;;  %v26094_v6 = vpack.c.bf16 %v12629_v27, %v12626_v63 }
 0x97a   :  { %21838 = vmatpush3.bf16.msra.mxu1 %v21835_v30 }
 0x97b   :  { %21840 = vmatprep.subr.bf16.mxu1 %v21839_v21  ;;  %v12212_v11 = vand.u32 4294901760, %v12211_v58 }
 0x97d   :  { %19740 = vmatmul.mubr.f32.vlgmr.msra.gmra.mrb[78].mxu1 %v11657_v28  ;;  %v21886_v43 = vpack.c.bf16 %v12212_v11, %v12205_v32  ;;  %v15863_v11 = vld [vmem:[%s26706_s8 + $0x48] sm:$0xff] }
 0x97e   :  { %21842 = vmatpush3.bf16.msra.mxu1 %v21839_v21  ;;  %19750 = vmatprep.mubr.f32.mxu1 %v25985_v23 }
 0x97f   :  { %21844 = vmatprep.subr.bf16.mxu1 %v21843_v1 }
 0x982   :  { %21846 = vmatpush3.bf16.msra.mxu1 %v21843_v1  ;;  %v12714_v1 = vsub.f32 %v15860_v44, %v12626_v63 }
 0x983   :  { %21848 = vmatprep.subr.bf16.mxu1 %v21847_v29 }
 0x984   :  { %v12715_v42 = vand.u32 4294901760, %v12714_v1 }
 0x985   :  { %19751 = vmatmul.mubr.f32.vlgmr.msra.gmra.mrb[78].mxu1 %v26001_v47 }
 0x986   :  { %21850 = vmatpush3.bf16.msra.mxu1 %v21847_v29  ;;  %19761 = vmatprep.mubr.f32.mxu1 %v11644_v26  ;;  %v21907_v26 = vpack.c.bf16 %v12224_v51, %v12217_v15  ;;  %v12721_v29 = vsub.f32 %v15861_v53, %v12629_v27  ;;  %v12716_v55 = vsub.f32 %v12714_v1, %v12715_v42 }
 0x987   :  { %21852 = vmatprep.subr.bf16.mxu1 %v21851_v46 }
 0x988   :  { %v12722_v61 = vand.u32 4294901760, %v12721_v29  ;;  %v21931_v32 = vpack.c.bf16 %v12721_v29, %v12714_v1 }
 0x98a   :  { %21854 = vmatpush3.bf16.msra.mxu1 %v21851_v46  ;;  %v12723_v18 = vsub.f32 %v12721_v29, %v12722_v61 }
 0x98b   :  { %21856 = vmatprep.subr.bf16.mxu1 %v21831_v20 }
 0x98c   :  { %v12724_v59 = vand.u32 4294901760, %v12723_v18 }
 0x98d   :  { %19762 = vmatmul.mubr.f32.vlgmr.msra.gmra.mrb[78].mxu1 %v11654_v22 }
 0x98e   :  { %21858 = vmatpush3.bf16.msra.mxu1 %v21831_v20  ;;  %19772 = vmatprep.mubr.f32.mxu1 %v11645_v36 }
 0x98f   :  { %21860 = vmatprep.subr.bf16.mxu1 %v21835_v30 }
 0x992   :  { %21862 = vmatpush3.bf16.msra.mxu1 %v21835_v30 }
 0x993   :  { %21864 = vmatprep.subr.bf16.mxu1 %v21863_v48 }
 0x995   :  { %19773 = vmatmul.mubr.f32.vlgmr.msra.gmra.mrb[78].mxu1 %v11655_v33  ;;  %v12620_v33 = vand.u32 4294901760, %v15858_v2 }
 0x996   :  { %21866 = vmatpush3.bf16.msra.mxu1 %v21863_v48  ;;  %19783 = vmatprep.mubr.f32.mxu1 %v25985_v23 }
 0x997   :  { %21868 = vmatprep.subr.bf16.mxu1 %v21867_v31  ;;  %v12700_v57 = vsub.f32 %v15858_v2, %v12620_v33 }
 0x999   :  { %v12701_v46 = vand.u32 4294901760, %v12700_v57 }
 0x99a   :  { %21870 = vmatpush3.bf16.msra.mxu1 %v21867_v31 }
 0x99b   :  { %21872 = vmatprep.subr.bf16.mxu1 %v21831_v20  ;;  %v12702_v39 = vsub.f32 %v12700_v57, %v12701_v46 }
 0x99d   :  { %19784 = vmatmul.mubr.f32.vlgmr.msra.gmra.mrb[78].mxu1 %v26001_v47  ;;  %v12703_v62 = vand.u32 4294901760, %v12702_v39 }
 0x99e   :  { %21874 = vmatpush3.bf16.msra.mxu1 %v21831_v20  ;;  %19794 = vmatprep.mubr.f32.mxu1 %v25985_v23  ;;  %v12225_v23 = vsub.f32 %v12223_v5, %v12224_v51  ;;  %v15862_v51 = vld [vmem:[%s26706_s8 + $0x40] sm:$0xff] }
 0x99f   :  { %21876 = vmatprep.subr.bf16.mxu1 %v21835_v30 }
 0x9a0   :  { %v12226_v8 = vand.u32 4294901760, %v12225_v23  ;;  %v21943_v23 = vpack.c.bf16 %v12722_v61, %v12715_v42 }
 0x9a2   :  { %21878 = vmatpush3.bf16.msra.mxu1 %v21835_v30  ;;  %v21889_v37 = vpack.c.bf16 %v12226_v8, %v12219_v0  ;;  %v15859_v30 = vld [vmem:[%s26706_s8 + $0x28] sm:$0xff]  ;;  %v13117_v0 = vand.u32 4294901760, %v15863_v11  ;;  %v15864_v8 = vld [vmem:[%s26706_s8 + $0x50] sm:$0xff] }
 0x9a3   :  { %21879 = vmatprep.subr.bf16.mxu1 %v26834_v3  ;;  %v12623_v17 = vand.u32 4294901760, %v15859_v30 }
 0x9a5   :  { %19795 = vmatmul.mubr.f32.vlgmr.msra.gmra.mrb[78].mxu1 %v26001_v47  ;;  %v12707_v21 = vsub.f32 %v15859_v30, %v12623_v17  ;;  %v26090_v19 = vpack.c.bf16 %v12623_v17, %v12620_v33 }
 0x9a6   :  { %19805 = vmatprep.mubr.msk.f32.mxu1 %vm22701_vm4, %v26833_v41  ;;  %21881 = vmatpush3.bf16.msra.mxu1 %v26028_v12 }
 0x9a7   :  { %21882 = vmatprep.subr.bf16.mxu1 %v26834_v3  ;;  %v12708_v48 = vand.u32 4294901760, %v12707_v21  ;;  %v21928_v58 = vpack.c.bf16 %v12707_v21, %v12700_v57 }
 0x9a9   :  { %v12709_v60 = vsub.f32 %v12707_v21, %v12708_v48  ;;  %v21940_v15 = vpack.c.bf16 %v12708_v48, %v12701_v46 }
 0x9aa   :  { %21884 = vmatpush3.bf16.msra.mxu1 %v26038_v40 }
 0x9ab   :  { %21885 = vmatprep.subr.bf16.mxu1 %v26834_v3  ;;  %v12710_v52 = vand.u32 4294901760, %v12709_v60 }
 0x9ad   :  { %v21922_v13 = vpack.c.bf16 %v12710_v52, %v12703_v62 }
 0xa78   :  { %v19796_v47 = vpop.f32.mrb[78].mxu1 }
 0xa79   :  { %v26045_v16 = vadd.f32 %v19796_v47, %v15856_v10  ;;  %v12092_v4 = vpop.f32.mrb[79].mxu1 }
 0xa7a   :  { %v12109_v50 = vadd.f32 %v15856_v10, %v12092_v4 }
 0xa7c   :  { %v26047_v36 = vmax.f32 %v12109_v50, 0.0 }
 0xa7e   :  { %v12119_v20 = vsel %vm10497_vm9, %v26047_v36, 0  ;;  %v12616_v38 = vrot.slane %v26047_v36, 2  ;;  %v13110_v56 = vrot.slane %v26047_v36, 4  ;;  %v13604_v39 = vrot.slane %v26047_v36, 6 }
 0xa7f   :  { %v12190_v45 = vand.u32 4294901760, %v12119_v20 }
 0xa80   :  { %v12617_v25 = vsel %vm10497_vm9, %v12616_v38, 0  ;;  %v13605_v36 = vsel %vm10497_vm9, %v13604_v39, 0 }
 0xa81   :  { %v12191_v22 = vsub.f32 %v12119_v20, %v12190_v45  ;;  %v26082_v28 = vand.u32 4294901760, %v12617_v25 }
 0xa83   :  { %v12192_v35 = vand.u32 4294901760, %v12191_v22  ;;  %v12689_v31 = vsub.f32 %v12617_v25, %v26082_v28 }
 0xa85   :  { %v12193_v34 = vsub.f32 %v12191_v22, %v12192_v35 }
 0xa87   :  { %v12194_v14 = vand.u32 4294901760, %v12193_v34 }
 0xa89   :  { %19806 = vmatmul.mubr.f32.vlgmr.msra.gmra.mrb[80].mxu1 %v12194_v14 }
 0xa8a   :  { %21887 = vmatpush3.bf16.msra.mxu1 %v21886_v43  ;;  %19816 = vmatprep.mubr.msk.f32.mxu1 %vm22701_vm4, %v26833_v41  ;;  %v13114_v43 = vand.u32 4294901760, %v15862_v51 }
 0xa8b   :  { %21888 = vmatprep.subr.bf16.mxu1 %v26834_v3 }
 0xa8e   :  { %21890 = vmatpush3.bf16.msra.mxu1 %v21889_v37  ;;  %v15865_v37 = vld [vmem:[%s26706_s8 + $0x58] sm:$0xff] }
 0xa8f   :  { %21891 = vmatprep.subr.bf16.mxu1 %v26834_v3  ;;  %v13123_v10 = vand.u32 4294901760, %v15865_v37 }
 0xa91   :  { %19817 = vmatmul.mubr.f32.vlgmr.msra.gmra.mrb[80].mxu1 %v12190_v45  ;;  %v13215_v50 = vsub.f32 %v15865_v37, %v13123_v10 }
 0xa92   :  { %21893 = vmatpush3.bf16.msra.mxu1 %v21892_v9  ;;  %19827 = vmatprep.mubr.msk.f32.mxu1 %vm22701_vm4, %v26833_v41  ;;  %v13111_v9 = vsel %vm10497_vm9, %v13110_v56, 0 }
 0xa93   :  { %21894 = vmatprep.subr.bf16.mxu1 %v26834_v3  ;;  %v26134_v47 = vand.u32 4294901760, %v13111_v9  ;;  %v13216_v30 = vand.u32 4294901760, %v13215_v50 }
 0xa95   :  { %v13217_v25 = vsub.f32 %v13215_v50, %v13216_v30 }
 0xa96   :  { %21896 = vmatpush3.bf16.msra.mxu1 %v21895_v24  ;;  %v13194_v24 = vsub.f32 %v15862_v51, %v13114_v43 }
 0xa97   :  { %21897 = vmatprep.subr.bf16.mxu1 %v26834_v3  ;;  %v13218_v27 = vand.u32 4294901760, %v13217_v25  ;;  %v15089_v25 = vld [vmem:[%s26707_s9 + $0x38] sm:$0xff] }
 0xa98   :  { %v13195_v20 = vand.u32 4294901760, %v13194_v24 }
 0xa99   :  { %19828 = vmatmul.mubr.f32.vlgmr.msra.gmra.mrb[80].mxu1 %v12191_v22  ;;  %v13183_v22 = vsub.f32 %v13111_v9, %v26134_v47 }
 0xa9a   :  { %21899 = vmatpush3.bf16.msra.mxu1 %v26028_v12  ;;  %19838 = vmatprep.mubr.msk.f32.mxu1 %vm22701_vm4, %v26833_v41  ;;  %v13196_v34 = vsub.f32 %v13194_v24, %v13195_v20 }
 0xa9b   :  { %21900 = vmatprep.subr.bf16.mxu1 %v26834_v3  ;;  %v13184_v38 = vand.u32 4294901760, %v13183_v22 }
 0xa9c   :  { %v13197_v17 = vand.u32 4294901760, %v13196_v34 }
 0xa9d   :  { %v13185_v57 = vsub.f32 %v13183_v22, %v13184_v38 }
 0xa9e   :  { %21902 = vmatpush3.bf16.msra.mxu1 %v26038_v40 }
 0xa9f   :  { %21903 = vmatprep.subr.bf16.mxu1 %v26834_v3 }
 0xaa1   :  { %19839 = vmatmul.mubr.f32.vlgmr.msra.gmra.mrb[80].mxu1 %v12192_v35  ;;  %v26143_v35 = vpack.c.bf16 %v13117_v0, %v13114_v43 }
 0xaa2   :  { %21905 = vmatpush3.bf16.msra.mxu1 %v21904_v54  ;;  %19849 = vmatprep.mubr.msk.f32.mxu1 %vm22701_vm4, %v26833_v41  ;;  %v13201_v54 = vsub.f32 %v15863_v11, %v13117_v0 }
 0xaa3   :  { %21906 = vmatprep.subr.bf16.mxu1 %v26834_v3 }
 0xaa4   :  { %v21964_v29 = vpack.c.bf16 %v13201_v54, %v13194_v24 }
 0xaa6   :  { %21908 = vmatpush3.bf16.msra.mxu1 %v21907_v26  ;;  %v13120_v26 = vand.u32 4294901760, %v15864_v8 }
 0xaa7   :  { %21909 = vmatprep.subr.bf16.mxu1 %v26834_v3 }
 0xaa8   :  { %v13208_v4 = vsub.f32 %v15864_v8, %v13120_v26  ;;  %v26148_v33 = vpack.c.bf16 %v13123_v10, %v13120_v26 }
 0xaa9   :  { %19850 = vmatmul.mubr.f32.vlgmr.msra.gmra.mrb[80].mxu1 %v12190_v45 }
 0xaaa   :  { %21911 = vmatpush3.bf16.msra.mxu1 %v26028_v12  ;;  %19860 = vmatprep.mubr.msk.f32.mxu1 %vm22701_vm4, %v26833_v41  ;;  %v12690_v12 = vand.u32 4294901760, %v12689_v31  ;;  %v13209_v2 = vand.u32 4294901760, %v13208_v4  ;;  %v21967_v46 = vpack.c.bf16 %v13215_v50, %v13208_v4  ;;  %v15082_v50 = vld [vmem:[%s26707_s9] sm:$0xff] }
 0xaab   :  { %21912 = vmatprep.subr.bf16.mxu1 %v26834_v3 }
 0xaac   :  { %v12691_v7 = vsub.f32 %v12689_v31, %v12690_v12  ;;  %v13210_v53 = vsub.f32 %v13208_v4, %v13209_v2  ;;  %v21979_v60 = vpack.c.bf16 %v13216_v30, %v13209_v2  ;;  %v15086_v30 = vld [vmem:[%s26707_s9 + $0x20] sm:$0xff] }
 0xaae   :  { %21914 = vmatpush3.bf16.msra.mxu1 %v26038_v40  ;;  %v12717_v40 = vand.u32 4294901760, %v12716_v55  ;;  %v12692_v5 = vand.u32 4294901760, %v12691_v7  ;;  %v13211_v63 = vand.u32 4294901760, %v13210_v53  ;;  %v26192_v7 = vand.u32 4294901760, %v13605_v36  ;;  %v15088_v53 = vld [vmem:[%s26707_s9 + $0x30] sm:$0xff] }
 0xaaf   :  { %21915 = vmatprep.subr.bf16.mxu1 %v26834_v3 }
 0xab0   :  { %v21925_v49 = vpack.c.bf16 %v12724_v59, %v12717_v40  ;;  %v21961_v1 = vpack.c.bf16 %v13218_v27, %v13211_v63 }
 0xab1   :  { %19861 = vmatmul.mubr.f32.vlgmr.msra.gmra.mrb[80].mxu1 %v12190_v45  ;;  %v13202_v45 = vand.u32 4294901760, %v13201_v54 }
 0xab2   :  { %21917 = vmatpush3.bf16.msra.mxu1 %v26090_v19  ;;  %19871 = vmatprep.mubr.msk.f32.mxu1 %vm22701_vm4, %v26833_v41 }
 0xab3   :  { %21918 = vmatprep.subr.bf16.mxu1 %v26834_v3  ;;  %v13203_v14 = vsub.f32 %v13201_v54, %v13202_v45  ;;  %v21976_v48 = vpack.c.bf16 %v13202_v45, %v13195_v20  ;;  %v15083_v20 = vld [vmem:[%s26707_s9 + $0x8] sm:$0xff]  ;;  %v15084_v45 = vld [vmem:[%s26707_s9 + $0x10] sm:$0xff] }
 0xab4   :  { %v15107_v34 = vand.u32 4294901760, %v15083_v20  ;;  %v15110_v2 = vand.u32 4294901760, %v15084_v45 }
 0xab5   :  { %v13204_v44 = vand.u32 4294901760, %v13203_v14  ;;  %v15085_v14 = vld [vmem:[%s26707_s9 + $0x18] sm:$0xff] }
 0xab6   :  { %21920 = vmatpush3.bf16.msra.mxu1 %v26094_v6  ;;  %v26283_v27 = vsub.f32 %v15083_v20, %v15107_v34 }
 0xab7   :  { %21921 = vmatprep.subr.bf16.mxu1 %v26834_v3  ;;  %v21958_v21 = vpack.c.bf16 %v13204_v44, %v13197_v17  ;;  %v15116_v17 = vand.u32 4294901760, %v15086_v30 }
 0xab9   :  { %19872 = vmatmul.mubr.f32.vlgmr.msra.gmra.mrb[80].mxu1 %v12692_v5 }
 0xaba   :  { %21923 = vmatpush3.bf16.msra.mxu1 %v21922_v13  ;;  %19882 = vmatprep.mubr.msk.f32.mxu1 %vm22701_vm4, %v26833_v41 }
 0xabb   :  { %21924 = vmatprep.subr.bf16.mxu1 %v26834_v3 }
 0xabe   :  { %21926 = vmatpush3.bf16.msra.mxu1 %v21925_v49  ;;  %v26206_v49 = vsub.f32 %v13605_v36, %v26192_v7 }
 0xabf   :  { %21927 = vmatprep.subr.bf16.mxu1 %v26834_v3 }
 0xac0   :  { %v13678_v56 = vand.u32 4294901760, %v26206_v49 }
 0xac1   :  { %19883 = vmatmul.mubr.f32.vlgmr.msra.gmra.mrb[80].mxu1 %v26082_v28 }
 0xac2   :  { %21929 = vmatpush3.bf16.msra.mxu1 %v21928_v58  ;;  %19893 = vmatprep.mubr.msk.f32.mxu1 %vm22701_vm4, %v26833_v41  ;;  %v13679_v9 = vsub.f32 %v26206_v49, %v13678_v56 }
 0xac3   :  { %21930 = vmatprep.subr.bf16.mxu1 %v26834_v3 }
 0xac4   :  { %v13680_v10 = vand.u32 4294901760, %v13679_v9 }
 0xac6   :  { %21932 = vmatpush3.bf16.msra.mxu1 %v21931_v32 }
 0xac7   :  { %21933 = vmatprep.subr.bf16.mxu1 %v26834_v3 }
 0xac9   :  { %19894 = vmatmul.mubr.f32.vlgmr.msra.gmra.mrb[80].mxu1 %v12689_v31  ;;  %v15866_v31 = vld [vmem:[%s26706_s8 + $0x60] sm:$0xff] }
 0xaca   :  { %21935 = vmatpush3.bf16.msra.mxu1 %v26090_v19  ;;  %19904 = vmatprep.mubr.msk.f32.mxu1 %vm22701_vm4, %v26833_v41  ;;  %v13608_v42 = vand.u32 4294901760, %v15866_v31 }
 0xacb   :  { %21936 = vmatprep.subr.bf16.mxu1 %v26834_v3 }
 0xacc   :  { %v26188_v62 = vsub.f32 %v15866_v31, %v13608_v42  ;;  %v15122_v31 = vand.u32 4294901760, %v15088_v53 }
 0xace   :  { %21938 = vmatpush3.bf16.msra.mxu1 %v26094_v6  ;;  %v13689_v59 = vand.u32 4294901760, %v26188_v62 }
 0xacf   :  { %21939 = vmatprep.subr.bf16.mxu1 %v26834_v3 }
 0xad0   :  { %v13690_v32 = vsub.f32 %v26188_v62, %v13689_v59 }
 0xad1   :  { %19905 = vmatmul.mubr.f32.vlgmr.msra.gmra.mrb[80].mxu1 %v12690_v12  ;;  %v15868_v12 = vld [vmem:[%s26706_s8 + $0x70] sm:$0xff] }
 0xad2   :  { %21941 = vmatpush3.bf16.msra.mxu1 %v21940_v15  ;;  %19915 = vmatprep.mubr.msk.f32.mxu1 %vm22701_vm4, %v26833_v41  ;;  %v13614_v55 = vand.u32 4294901760, %v15868_v12  ;;  %v13691_v43 = vand.u32 4294901760, %v13690_v32  ;;  %v15870_v32 = vld [vmem:[%s26706_s8 + $0x80] sm:$0xff] }
 0xad3   :  { %21942 = vmatprep.subr.bf16.mxu1 %v26834_v3 }
 0xad4   :  { %v26199_v13 = vsub.f32 %v15868_v12, %v13614_v55 }
 0xad6   :  { %21944 = vmatpush3.bf16.msra.mxu1 %v21943_v23  ;;  %v13703_v51 = vand.u32 4294901760, %v26199_v13 }
 0xad7   :  { %21945 = vmatprep.subr.bf16.mxu1 %v26834_v3 }
 0xad8   :  { %v13704_v8 = vsub.f32 %v26199_v13, %v13703_v51 }
 0xad9   :  { %19916 = vmatmul.mubr.f32.vlgmr.msra.gmra.mrb[80].mxu1 %v26082_v28 }
 0xada   :  { %21947 = vmatpush3.bf16.msra.mxu1 %v26090_v19  ;;  %19926 = vmatprep.mubr.msk.f32.mxu1 %vm22701_vm4, %v26833_v41  ;;  %v15867_v19 = vld [vmem:[%s26706_s8 + $0x68] sm:$0xff]  ;;  %v13705_v54 = vand.u32 4294901760, %v13704_v8 }
 0xadb   :  { %21948 = vmatprep.subr.bf16.mxu1 %v26834_v3  ;;  %v13611_v61 = vand.u32 4294901760, %v15867_v19 }
 0xadd   :  { %v26190_v52 = vsub.f32 %v15867_v19, %v13611_v61  ;;  %v26209_v58 = vpack.c.bf16 %v13611_v61, %v13608_v42  ;;  %v15125_v19 = vand.u32 4294901760, %v15089_v25  ;;  %v26301_v61 = vsub.f32 %v15088_v53, %v15122_v31 }
 0xade   :  { %21950 = vmatpush3.bf16.msra.mxu1 %v26094_v6  ;;  %v15869_v6 = vld [vmem:[%s26706_s8 + $0x78] sm:$0xff] }
 0xadf   :  { %21951 = vmatprep.subr.bf16.mxu1 %v26834_v3  ;;  %v13617_v18 = vand.u32 4294901760, %v15869_v6  ;;  %v13696_v5 = vand.u32 4294901760, %v26190_v52  ;;  %v22000_v4 = vpack.c.bf16 %v26190_v52, %v26188_v62  ;;  %v26303_v12 = vsub.f32 %v15089_v25, %v15125_v19 }
 0xae1   :  { %19927 = vmatmul.mubr.f32.vlgmr.msra.gmra.mrb[80].mxu1 %v26082_v28  ;;  %v13186_v28 = vand.u32 4294901760, %v13185_v57  ;;  %v26201_v40 = vsub.f32 %v15869_v6, %v13617_v18  ;;  %v13697_v15 = vsub.f32 %v26190_v52, %v13696_v5  ;;  %v26223_v23 = vpack.c.bf16 %v13617_v18, %v13614_v55  ;;  %v15090_v57 = vld [vmem:[%s26707_s9 + $0x40] sm:$0xff] }
 0xae2   :  { %21953 = vmatpush3.bf16.msra.mxu1 %v26143_v35  ;;  %19937 = vmatprep.mubr.msk.f32.mxu1 %vm22701_vm4, %v26833_v41  ;;  %v15128_v39 = vand.u32 4294901760, %v15090_v57  ;;  %v22012_v18 = vpack.c.bf16 %v13696_v5, %v13689_v59  ;;  %v14102_v52 = vand.u32 4294901760, %v15870_v32  ;;  %v15872_v5 = vld [vmem:[%s26706_s8 + $0x90] sm:$0xff] }
 0xae3   :  { %21954 = vmatprep.subr.bf16.mxu1 %v26834_v3  ;;  %v13710_v11 = vand.u32 4294901760, %v26201_v40  ;;  %v13698_v0 = vand.u32 4294901760, %v13697_v15  ;;  %v15871_v15 = vld [vmem:[%s26706_s8 + $0x88] sm:$0xff] }
 0xae4   :  { %v26305_v6 = vsub.f32 %v15090_v57, %v15128_v39  ;;  %v14105_v59 = vand.u32 4294901760, %v15871_v15  ;;  %v15874_v57 = vld [vmem:[%s26706_s8 + $0xa0] sm:$0xff] }
 0xae5   :  { %v13711_v37 = vsub.f32 %v26201_v40, %v13710_v11  ;;  %v21994_v24 = vpack.c.bf16 %v13698_v0, %v13691_v43  ;;  %v26331_v43 = vpack.c.bf16 %v15125_v19, %v15122_v31  ;;  %v12112_v0 = vmax.f32 %v26045_v16, 0.0 }
 0xae6   :  { %21956 = vmatpush3.bf16.msra.mxu1 %v26148_v33  ;;  %v22015_v62 = vpack.c.bf16 %v13710_v11, %v13703_v51  ;;  %v14182_v51 = vsub.f32 %v15870_v32, %v14102_v52  ;;  %v14189_v11 = vsub.f32 %v15871_v15, %v14105_v59  ;;  %v15877_v32 = vld [vmem:[%s26706_s8 + $0xb8] sm:$0xff] }
 0xae7   :  { %21957 = vmatprep.subr.bf16.mxu1 %v26834_v3  ;;  %v13712_v26 = vand.u32 4294901760, %v13711_v37  ;;  %v14592_v31 = vrot.slane %v12112_v0, 2 }
 0xae9   :  { %19938 = vmatmul.mubr.f32.vlgmr.msra.gmra.mrb[80].mxu1 %v13186_v28  ;;  %v26285_v28 = vsub.f32 %v15084_v45, %v15110_v2  ;;  %v14593_v16 = vsel %vm10497_vm9, %v14592_v31, 0 }
 0xaea   :  { %21959 = vmatpush3.bf16.msra.mxu1 %v21958_v21  ;;  %19948 = vmatprep.mubr.msk.f32.mxu1 %vm22701_vm4, %v26833_v41 }
 0xaeb   :  { %21960 = vmatprep.subr.bf16.mxu1 %v26834_v3 }
 0xaee   :  { %21962 = vmatpush3.bf16.msra.mxu1 %v21961_v1  ;;  %v15091_v1 = vld [vmem:[%s26707_s9 + $0x48] sm:$0xff] }
 0xaef   :  { %21963 = vmatprep.subr.bf16.mxu1 %v26834_v3  ;;  %v15131_v42 = vand.u32 4294901760, %v15091_v1 }
 0xaf1   :  { %19949 = vmatmul.mubr.f32.vlgmr.msra.gmra.mrb[80].mxu1 %v26134_v47  ;;  %v26308_v36 = vsub.f32 %v15091_v1, %v15131_v42  ;;  %v15875_v1 = vld [vmem:[%s26706_s8 + $0xa8] sm:$0xff] }
 0xaf2   :  { %21965 = vmatpush3.bf16.msra.mxu1 %v21964_v29  ;;  %19959 = vmatprep.mubr.msk.f32.mxu1 %vm22701_vm4, %v26833_v41 }
 0xaf3   :  { %21966 = vmatprep.subr.bf16.mxu1 %v26834_v3 }
 0xaf6   :  { %21968 = vmatpush3.bf16.msra.mxu1 %v21967_v46  ;;  %v26292_v46 = vsub.f32 %v15086_v30, %v15116_v17 }
 0xaf7   :  { %21969 = vmatprep.subr.bf16.mxu1 %v26834_v3 }
 0xaf9   :  { %19960 = vmatmul.mubr.f32.vlgmr.msra.gmra.mrb[80].mxu1 %v13183_v22  ;;  %v22003_v22 = vpack.c.bf16 %v26201_v40, %v26199_v13  ;;  %v26351_v13 = vpack.c.bf16 %v15131_v42, %v15128_v39  ;;  %v14099_v40 = vsel %vm10497_vm9, %v12112_v0, 0  ;;  %v14596_v39 = vand.u32 4294901760, %v15874_v57 }
 0xafa   :  { %21971 = vmatpush3.bf16.msra.mxu1 %v26143_v35  ;;  %19970 = vmatprep.mubr.msk.f32.mxu1 %vm22701_vm4, %v26833_v41  ;;  %v26357_v37 = vand.u32 4294901760, %v14099_v40  ;;  %v14599_v42 = vand.u32 4294901760, %v15875_v1 }
 0xafb   :  { %21972 = vmatprep.subr.bf16.mxu1 %v26834_v3  ;;  %v14676_v15 = vsub.f32 %v15874_v57, %v14596_v39 }
 0xafc   :  { %v14683_v0 = vsub.f32 %v15875_v1, %v14599_v42 }
 0xafe   :  { %21974 = vmatpush3.bf16.msra.mxu1 %v26148_v33 }
 0xaff   :  { %21975 = vmatprep.subr.bf16.mxu1 %v26834_v3 }
 0xb01   :  { %19971 = vmatmul.mubr.f32.vlgmr.msra.gmra.mrb[80].mxu1 %v13184_v38  ;;  %v15087_v38 = vld [vmem:[%s26707_s9 + $0x28] sm:$0xff] }
 0xb02   :  { %21977 = vmatpush3.bf16.msra.mxu1 %v21976_v48  ;;  %19981 = vmatprep.mubr.msk.f32.mxu1 %vm22701_vm4, %v26833_v41  ;;  %v15119_v44 = vand.u32 4294901760, %v15087_v38 }
 0xb03   :  { %21978 = vmatprep.subr.bf16.mxu1 %v26834_v3 }
 0xb04   :  { %v26295_v48 = vsub.f32 %v15087_v38, %v15119_v44  ;;  %v26315_v55 = vpack.c.bf16 %v15119_v44, %v15116_v17  ;;  %v22036_v44 = vpack.c.bf16 %v14189_v11, %v14182_v51 }
 0xb06   :  { %21980 = vmatpush3.bf16.msra.mxu1 %v21979_v60 }
 0xb07   :  { %21981 = vmatprep.subr.bf16.mxu1 %v26834_v3 }
 0xb09   :  { %19982 = vmatmul.mubr.f32.vlgmr.msra.gmra.mrb[80].mxu1 %v26134_v47 }
 0xb0a   :  { %21983 = vmatpush3.bf16.msra.mxu1 %v26143_v35  ;;  %19992 = vmatprep.mubr.msk.f32.mxu1 %vm22701_vm4, %v26833_v41  ;;  %v15104_v35 = vand.u32 4294901760, %v15082_v50 }
 0xb0b   :  { %21984 = vmatprep.subr.bf16.mxu1 %v26834_v3 }
 0xb0c   :  { %v26279_v21 = vpack.c.bf16 %v15107_v34, %v15104_v35  ;;  %v26281_v63 = vsub.f32 %v15082_v50, %v15104_v35 }
 0xb0e   :  { %21986 = vmatpush3.bf16.msra.mxu1 %v26148_v33  ;;  %v15113_v33 = vand.u32 4294901760, %v15085_v14  ;;  %22097 = vmatpush3.bf16.msra.mxu0 %v26279_v21 }
 0xb0f   :  { %21987 = vmatprep.subr.bf16.mxu1 %v26834_v3  ;;  %22098 = vmatprep.subr.bf16.mxu0 %v26834_v3 }
 0xb10   :  { %v26290_v29 = vsub.f32 %v15085_v14, %v15113_v33  ;;  %v26299_v60 = vpack.c.bf16 %v15113_v33, %v15110_v2 }
 0xb11   :  { %19993 = vmatmul.mubr.f32.vlgmr.msra.gmra.mrb[80].mxu1 %v26134_v47  ;;  %v21997_v47 = vpack.c.bf16 %v13712_v26, %v13705_v54  ;;  %v14183_v54 = vand.u32 4294901760, %v14182_v51  ;;  %v14190_v26 = vand.u32 4294901760, %v14189_v11 }
 0xb12   :  { %21989 = vmatpush3.bf16.msra.mxu1 %v26209_v58  ;;  %20003 = vmatprep.mubr.msk.f32.mxu1 %vm22701_vm4, %v26833_v41 }
 0xb13   :  { %21990 = vmatprep.subr.bf16.mxu1 %v26834_v3  ;;  %22100 = vmatpush3.bf16.msra.mxu0 %v26299_v60  ;;  %v14191_v50 = vsub.f32 %v14189_v11, %v14190_v26  ;;  %v22048_v25 = vpack.c.bf16 %v14190_v26, %v14183_v54 }
 0xb14   :  { %22101 = vmatprep.subr.bf16.mxu0 %v26834_v3 }
 0xb15   :  { %v14192_v34 = vand.u32 4294901760, %v14191_v50 }
 0xb16   :  { %21992 = vmatpush3.bf16.msra.mxu1 %v26223_v23 }
 0xb17   :  { %21993 = vmatprep.subr.bf16.mxu1 %v26834_v3  ;;  %22103 = vmatpush3.bf16.msra.mxu0 %v26315_v55 }
 0xb18   :  { %22104 = vmatprep.subr.bf16.mxu0 %v26834_v3 }
 0xb19   :  { %20004 = vmatmul.mubr.f32.vlgmr.msra.gmra.mrb[80].mxu1 %v13680_v10  ;;  %v14171_v10 = vsub.f32 %v14099_v40, %v26357_v37  ;;  %v14677_v40 = vand.u32 4294901760, %v14676_v15 }
 0xb1a   :  { %21995 = vmatpush3.bf16.msra.mxu1 %v21994_v24  ;;  %20014 = vmatprep.mubr.msk.f32.mxu1 %vm22701_vm4, %v26833_v41 }
 0xb1b   :  { %21996 = vmatprep.subr.bf16.mxu1 %v26834_v3  ;;  %22106 = vmatpush3.bf16.msra.mxu0 %v26331_v43 }
 0xb1c   :  { %22107 = vmatprep.subr.bf16.mxu0 %v26834_v3 }
 0xb1e   :  { %21998 = vmatpush3.bf16.msra.mxu1 %v21997_v47  ;;  %v26368_v47 = vpack.c.bf16 %v14105_v59, %v14102_v52  ;;  %v14605_v52 = vand.u32 4294901760, %v15877_v32  ;;  %v26414_v59 = vand.u32 4294901760, %v14593_v16 }
 0xb1f   :  { %21999 = vmatprep.subr.bf16.mxu1 %v26834_v3  ;;  %22109 = vmatpush3.bf16.msra.mxu0 %v26351_v13 }
 0xb20   :  { %22110 = vmatprep.subr.bf16.mxu0 %v26834_v3  ;;  %v14665_v11 = vsub.f32 %v14593_v16, %v26414_v59  ;;  %v15204_v16 = vand.u32 4294901760, %v26283_v27 }
 0xb21   :  { %20015 = vmatmul.mubr.f32.vlgmr.msra.gmra.mrb[80].mxu1 %v26192_v7 }
 0xb22   :  { %22001 = vmatpush3.bf16.msra.mxu1 %v22000_v4  ;;  %20025 = vmatprep.mubr.msk.f32.mxu1 %vm22701_vm4, %v26833_v41  ;;  %v14184_v4 = vsub.f32 %v14182_v51, %v14183_v54  ;;  %v14684_v51 = vand.u32 4294901760, %v14683_v0  ;;  %v14666_v26 = vand.u32 4294901760, %v14665_v11 }
 0xb23   :  { %22002 = vmatprep.subr.bf16.mxu1 %v26834_v3 }
 0xb24   :  { %v14185_v35 = vand.u32 4294901760, %v14184_v4 }
 0xb26   :  { %22004 = vmatpush3.bf16.msra.mxu1 %v22003_v22  ;;  %v22030_v30 = vpack.c.bf16 %v14192_v34, %v14185_v35 }
 0xb27   :  { %22005 = vmatprep.subr.bf16.mxu1 %v26834_v3 }
 0xb29   :  { %20026 = vmatmul.mubr.f32.vlgmr.msra.gmra.mrb[80].mxu1 %v26206_v49  ;;  %v15873_v49 = vld [vmem:[%s26706_s8 + $0x98] sm:$0xff] }
 0xb2a   :  { %22007 = vmatpush3.bf16.msra.mxu1 %v26209_v58  ;;  %20036 = vmatprep.mubr.msk.f32.mxu1 %vm22701_vm4, %v26833_v41  ;;  %v14111_v8 = vand.u32 4294901760, %v15873_v49 }
 0xb2b   :  { %22008 = vmatprep.subr.bf16.mxu1 %v26834_v3 }
 0xb2c   :  { %v14203_v24 = vsub.f32 %v15873_v49, %v14111_v8  ;;  %v14697_v49 = vsub.f32 %v15877_v32, %v14605_v52  ;;  %v15197_v32 = vand.u32 4294901760, %v26281_v63 }
 0xb2e   :  { %22010 = vmatpush3.bf16.msra.mxu1 %v26223_v23  ;;  %v14204_v45 = vand.u32 4294901760, %v14203_v24  ;;  %v14698_v54 = vand.u32 4294901760, %v14697_v49 }
 0xb2f   :  { %22011 = vmatprep.subr.bf16.mxu1 %v26834_v3 }
 0xb31   :  { %20037 = vmatmul.mubr.f32.vlgmr.msra.gmra.mrb[80].mxu1 %v13678_v56  ;;  %v14108_v56 = vand.u32 4294901760, %v15872_v5 }
 0xb32   :  { %22013 = vmatpush3.bf16.msra.mxu1 %v22012_v18  ;;  %20047 = vmatprep.mubr.msk.f32.mxu1 %vm22701_vm4, %v26833_v41  ;;  %v15876_v18 = vld [vmem:[%s26706_s8 + $0xb0] sm:$0xff] }
 0xb33   :  { %22014 = vmatprep.subr.bf16.mxu1 %v26834_v3  ;;  %v14196_v9 = vsub.f32 %v15872_v5, %v14108_v56  ;;  %v26373_v22 = vpack.c.bf16 %v14111_v8, %v14108_v56  ;;  %v22060_v56 = vpack.c.bf16 %v14599_v42, %v14596_v39  ;;  %v14678_v8 = vsub.f32 %v14676_v15, %v14677_v40  ;;  %v15097_v39 = vld [vmem:[%s26707_s9 + $0x78] sm:$0xff] }
 0xb35   :  { %v14197_v20 = vand.u32 4294901760, %v14196_v9  ;;  %v22039_v53 = vpack.c.bf16 %v14203_v24, %v14196_v9 }
 0xb36   :  { %22016 = vmatpush3.bf16.msra.mxu1 %v22015_v62  ;;  %v14602_v62 = vand.u32 4294901760, %v15876_v18 }
 0xb37   :  { %22017 = vmatprep.subr.bf16.mxu1 %v26834_v3  ;;  %v14198_v14 = vsub.f32 %v14196_v9, %v14197_v20  ;;  %v22051_v19 = vpack.c.bf16 %v14204_v45, %v14197_v20  ;;  %v14685_v9 = vsub.f32 %v14683_v0, %v14684_v51  ;;  %v14699_v20 = vsub.f32 %v14697_v49, %v14698_v54 }
 0xb38   :  { %v14690_v5 = vsub.f32 %v15876_v18, %v14602_v62  ;;  %v15149_v18 = vand.u32 4294901760, %v15097_v39 }
 0xb39   :  { %20048 = vmatmul.mubr.f32.vlgmr.msra.gmra.mrb[80].mxu1 %v26192_v7  ;;  %v14199_v38 = vand.u32 4294901760, %v14198_v14  ;;  %v14686_v4 = vand.u32 4294901760, %v14685_v9  ;;  %v14700_v35 = vand.u32 4294901760, %v14699_v20  ;;  %v22072_v14 = vpack.c.bf16 %v14683_v0, %v14676_v15 }
 0xb3a   :  { %22019 = vmatpush3.bf16.msra.mxu1 %v26209_v58  ;;  %20058 = vmatprep.mubr.msk.f32.mxu1 %vm22701_vm4, %v26833_v41  ;;  %v14172_v58 = vand.u32 4294901760, %v14171_v10 }
 0xb3b   :  { %22020 = vmatprep.subr.bf16.mxu1 %v26834_v3 }
 0xb3c   :  { %v14173_v2 = vsub.f32 %v14171_v10, %v14172_v58 }
 0xb3e   :  { %22022 = vmatpush3.bf16.msra.mxu1 %v26223_v23  ;;  %v14205_v23 = vsub.f32 %v14203_v24, %v14204_v45  ;;  %v14691_v24 = vand.u32 4294901760, %v14690_v5  ;;  %v14667_v45 = vsub.f32 %v14665_v11, %v14666_v26 }
 0xb3f   :  { %22023 = vmatprep.subr.bf16.mxu1 %v26834_v3 }
 0xb40   :  { %v14206_v33 = vand.u32 4294901760, %v14205_v23  ;;  %v14692_v50 = vsub.f32 %v14690_v5, %v14691_v24  ;;  %v14668_v34 = vand.u32 4294901760, %v14667_v45  ;;  %v22075_v23 = vpack.c.bf16 %v14697_v49, %v14690_v5 }
 0xb41   :  { %20059 = vmatmul.mubr.f32.vlgmr.msra.gmra.mrb[80].mxu1 %v26192_v7  ;;  %v14174_v7 = vand.u32 4294901760, %v14173_v2  ;;  %v22084_v2 = vpack.c.bf16 %v14684_v51, %v14677_v40  ;;  %v26492_v49 = vsub.f32 %v15097_v39, %v15149_v18  ;;  %v15198_v40 = vsub.f32 %v26281_v63, %v15197_v32 }
 0xb42   :  { %22025 = vmatpush3.bf16.msra.mxu1 %v26368_v47  ;;  %20069 = vmatprep.mubr.msk.f32.mxu1 %vm22701_vm4, %v26833_v41  ;;  %v22033_v17 = vpack.c.bf16 %v14206_v33, %v14199_v38  ;;  %v15092_v38 = vld [vmem:[%s26707_s9 + $0x50] sm:$0xff]  ;;  %v15093_v33 = vld [vmem:[%s26707_s9 + $0x58] sm:$0xff]  ;;  %v15205_v51 = vsub.f32 %v26283_v27, %v15204_v16 }
 0xb43   :  { %22026 = vmatprep.subr.bf16.mxu1 %v26834_v3 }
 0xb44   :  { %v15206_v9 = vand.u32 4294901760, %v15205_v51 }
 0xb46   :  { %22028 = vmatpush3.bf16.msra.mxu1 %v26373_v22 }
 0xb47   :  { %22029 = vmatprep.subr.bf16.mxu1 %v26834_v3 }
 0xb49   :  { %20070 = vmatmul.mubr.f32.vlgmr.msra.gmra.mrb[80].mxu1 %v14174_v7  ;;  %v15134_v7 = vand.u32 4294901760, %v15092_v38 }
 0xb4a   :  { %22031 = vmatpush3.bf16.msra.mxu1 %v22030_v30  ;;  %20080 = vmatprep.mubr.msk.f32.mxu1 %vm22701_vm4, %v26833_v41  ;;  %v22087_v30 = vpack.c.bf16 %v14698_v54, %v14691_v24 }
 0xb4b   :  { %22032 = vmatprep.subr.bf16.mxu1 %v26834_v3  ;;  %v26480_v15 = vsub.f32 %v15092_v38, %v15134_v7 }
 0xb4e   :  { %22034 = vmatpush3.bf16.msra.mxu1 %v22033_v17  ;;  %v15137_v17 = vand.u32 4294901760, %v15093_v33 }
 0xb4f   :  { %22035 = vmatprep.subr.bf16.mxu1 %v26834_v3 }
 0xb50   :  { %v26482_v0 = vsub.f32 %v15093_v33, %v15137_v17  ;;  %v15253_v33 = vand.u32 4294901760, %v26305_v6 }
 0xb51   :  { %20081 = vmatmul.mubr.f32.vlgmr.msra.gmra.mrb[80].mxu1 %v26357_v37 }
 0xb52   :  { %22037 = vmatpush3.bf16.msra.mxu1 %v22036_v44  ;;  %20091 = vmatprep.mubr.msk.f32.mxu1 %vm22701_vm4, %v26833_v41  ;;  %v26458_v44 = vpack.c.bf16 %v15137_v17, %v15134_v7  ;;  %v15260_v7 = vand.u32 4294901760, %v26308_v36  ;;  %v15274_v39 = vand.u32 4294901760, %v26482_v0 }
 0xb53   :  { %22038 = vmatprep.subr.bf16.mxu1 %v26834_v3 }
 0xb54   :  { %22112 = vmatpush3.bf16.msra.mxu0 %v26458_v44 }
 0xb55   :  { %22113 = vmatprep.subr.bf16.mxu0 %v26834_v3 }
 0xb56   :  { %22040 = vmatpush3.bf16.msra.mxu1 %v22039_v53  ;;  %v15094_v53 = vld [vmem:[%s26707_s9 + $0x60] sm:$0xff] }
 0xb57   :  { %22041 = vmatprep.subr.bf16.mxu1 %v26834_v3  ;;  %v15140_v57 = vand.u32 4294901760, %v15094_v53 }
 0xb59   :  { %20092 = vmatmul.mubr.f32.vlgmr.msra.gmra.mrb[80].mxu1 %v14171_v10  ;;  %v22063_v10 = vpack.c.bf16 %v14605_v52, %v14602_v62  ;;  %v26484_v62 = vsub.f32 %v15094_v53, %v15140_v57  ;;  %v15254_v53 = vsub.f32 %v26305_v6, %v15253_v33 }
 0xb5a   :  { %22043 = vmatpush3.bf16.msra.mxu1 %v26368_v47  ;;  %20102 = vmatprep.mubr.msk.f32.mxu1 %vm22701_vm4, %v26833_v41 }
 0xb5b   :  { %22044 = vmatprep.subr.bf16.mxu1 %v26834_v3 }
 0xb5e   :  { %22046 = vmatpush3.bf16.msra.mxu1 %v26373_v22 }
 0xb5f   :  { %22047 = vmatprep.subr.bf16.mxu1 %v26834_v3 }
 0xb61   :  { %20103 = vmatmul.mubr.f32.vlgmr.msra.gmra.mrb[80].mxu1 %v14172_v58 }
 0xb62   :  { %22049 = vmatpush3.bf16.msra.mxu1 %v22048_v25  ;;  %20113 = vmatprep.mubr.msk.f32.mxu1 %vm22701_vm4, %v26833_v41  ;;  %v15095_v25 = vld [vmem:[%s26707_s9 + $0x68] sm:$0xff] }
 0xb63   :  { %22050 = vmatprep.subr.bf16.mxu1 %v26834_v3  ;;  %v15143_v1 = vand.u32 4294901760, %v15095_v25 }
 0xb65   :  { %v26468_v31 = vpack.c.bf16 %v15143_v1, %v15140_v57  ;;  %v26486_v52 = vsub.f32 %v15095_v25, %v15143_v1  ;;  %v15261_v25 = vsub.f32 %v26308_v36, %v15260_v7  ;;  %v15255_v57 = vand.u32 4294901760, %v15254_v53 }
 0xb66   :  { %22052 = vmatpush3.bf16.msra.mxu1 %v22051_v19  ;;  %v15096_v19 = vld [vmem:[%s26707_s9 + $0x70] sm:$0xff] }
 0xb67   :  { %22053 = vmatprep.subr.bf16.mxu1 %v26834_v3  ;;  %22115 = vmatpush3.bf16.msra.mxu0 %v26468_v31  ;;  %v15146_v42 = vand.u32 4294901760, %v15096_v19  ;;  %v15262_v1 = vand.u32 4294901760, %v15261_v25 }
 0xb68   :  { %22116 = vmatprep.subr.bf16.mxu0 %v26834_v3 }
 0xb69   :  { %20114 = vmatmul.mubr.f32.vlgmr.msra.gmra.mrb[80].mxu1 %v26357_v37  ;;  %v26490_v5 = vsub.f32 %v15096_v19, %v15146_v42  ;;  %v15267_v19 = vand.u32 4294901760, %v26480_v15 }
 0xb6a   :  { %22055 = vmatpush3.bf16.msra.mxu1 %v26368_v47  ;;  %20124 = vmatprep.mubr.msk.f32.mxu1 %vm22701_vm4, %v26833_v41  ;;  %v14679_v47 = vand.u32 4294901760, %v14678_v8  ;;  %v15199_v8 = vand.u32 4294901760, %v15198_v40  ;;  %v15275_v40 = vsub.f32 %v26482_v0, %v15274_v39 }
 0xb6b   :  { %22056 = vmatprep.subr.bf16.mxu1 %v26834_v3 }
 0xb6c   :  { %v22066_v58 = vpack.c.bf16 %v14686_v4, %v14679_v47  ;;  %v15225_v4 = vand.u32 4294901760, %v26292_v46 }
 0xb6e   :  { %22058 = vmatpush3.bf16.msra.mxu1 %v26373_v22  ;;  %v14693_v22 = vand.u32 4294901760, %v14692_v50  ;;  %v15232_v50 = vand.u32 4294901760, %v26295_v48  ;;  %v15226_v45 = vsub.f32 %v26292_v46, %v15225_v4 }
 0xb6f   :  { %22059 = vmatprep.subr.bf16.mxu1 %v26834_v3 }
 0xb71   :  { %20125 = vmatmul.mubr.f32.vlgmr.msra.gmra.mrb[80].mxu1 %v26357_v37  ;;  %v22069_v37 = vpack.c.bf16 %v14700_v35, %v14693_v22  ;;  %v15227_v22 = vand.u32 4294901760, %v15226_v45  ;;  %v15239_v35 = vand.u32 4294901760, %v26301_v61 }
 0xb72   :  { %22061 = vmatpush3.bf16.msra.mxu1 %v22060_v56  ;;  %20135 = vmatprep.mubr.msk.f32.mxu1 %vm22701_vm4, %v26833_v41 }
 0xb73   :  { %22062 = vmatprep.subr.bf16.mxu1 %v26834_v3 }
 0xb76   :  { %22064 = vmatpush3.bf16.msra.mxu1 %v22063_v10 }
 0xb77   :  { %22065 = vmatprep.subr.bf16.mxu1 %v26834_v3 }
 0xb79   :  { %20136 = vmatmul.mubr.f32.vlgmr.msra.gmra.mrb[80].mxu1 %v14668_v34  ;;  %v15246_v34 = vand.u32 4294901760, %v26303_v12 }
 0xb7a   :  { %22067 = vmatpush3.bf16.msra.mxu1 %v22066_v58  ;;  %20146 = vmatprep.mubr.msk.f32.mxu1 %vm22701_vm4, %v26833_v41  ;;  %v15233_v58 = vsub.f32 %v26295_v48, %v15232_v50 }
 0xb7b   :  { %22068 = vmatprep.subr.bf16.mxu1 %v26834_v3 }
 0xb7e   :  { %22070 = vmatpush3.bf16.msra.mxu1 %v22069_v37  ;;  %v15234_v37 = vand.u32 4294901760, %v15233_v58 }
 0xb7f   :  { %22071 = vmatprep.subr.bf16.mxu1 %v26834_v3 }
 0xb81   :  { %20147 = vmatmul.mubr.f32.vlgmr.msra.gmra.mrb[80].mxu1 %v26414_v59 }
 0xb82   :  { %22073 = vmatpush3.bf16.msra.mxu1 %v22072_v14  ;;  %20157 = vmatprep.mubr.msk.f32.mxu1 %vm22701_vm4, %v26833_v41  ;;  %v15240_v14 = vsub.f32 %v26301_v61, %v15239_v35 }
 0xb83   :  { %22074 = vmatprep.subr.bf16.mxu1 %v26834_v3 }
 0xb86   :  { %22076 = vmatpush3.bf16.msra.mxu1 %v22075_v23  ;;  %v15247_v23 = vsub.f32 %v26303_v12, %v15246_v34 }
 0xb87   :  { %22077 = vmatprep.subr.bf16.mxu1 %v26834_v3 }
 0xb88   :  { %v15248_v38 = vand.u32 4294901760, %v15247_v23 }
 0xb89   :  { %20158 = vmatmul.mubr.f32.vlgmr.msra.gmra.mrb[80].mxu1 %v14665_v11  ;;  %v15211_v11 = vand.u32 4294901760, %v26285_v28 }
 0xb8a   :  { %22079 = vmatpush3.bf16.msra.mxu1 %v22060_v56  ;;  %20168 = vmatprep.mubr.msk.f32.mxu1 %vm22701_vm4, %v26833_v41 }
 0xb8b   :  { %22080 = vmatprep.subr.bf16.mxu1 %v26834_v3  ;;  %v15212_v24 = vsub.f32 %v26285_v28, %v15211_v11 }
 0xb8e   :  { %22082 = vmatpush3.bf16.msra.mxu1 %v22063_v10 }
 0xb8f   :  { %22083 = vmatprep.subr.bf16.mxu1 %v26834_v3 }
 0xb91   :  { %20169 = vmatmul.mubr.f32.vlgmr.msra.gmra.mrb[80].mxu1 %v14666_v26  ;;  %v26510_v26 = vpack.c.bf16 %v15206_v9, %v15199_v8  ;;  %v15276_v8 = vand.u32 4294901760, %v15275_v40  ;;  %v26789_v9 = vand.u32 4294901760, %v26484_v62  ;;  %v22153_v40 = vpack.c.bf16 %v26303_v12, %v26301_v61 }
 0xb92   :  { %22085 = vmatpush3.bf16.msra.mxu1 %v22084_v2  ;;  %20179 = vmatprep.mubr.msk.f32.mxu1 %vm22701_vm4, %v26833_v41  ;;  %v22126_v2 = vpack.c.bf16 %v15234_v37, %v15227_v22  ;;  %v26787_v22 = vand.u32 4294901760, %v26490_v5  ;;  %v26786_v37 = vand.u32 4294901760, %v26492_v49  ;;  %v26915_v12 = vand.u32 4294901760, %v26490_v5 }
 0xb93   :  { %22086 = vmatprep.subr.bf16.mxu1 %v26834_v3 }
 0xb94   :  { %v15296_v23 = vsub.f32 %v26490_v5, %v26787_v22 }
 0xb96   :  { %22088 = vmatpush3.bf16.msra.mxu1 %v22087_v30  ;;  %v15241_v30 = vand.u32 4294901760, %v15240_v14 }
 0xb97   :  { %22089 = vmatprep.subr.bf16.mxu1 %v26834_v3 }
 0xb98   :  { %v22129_v17 = vpack.c.bf16 %v15248_v38, %v15241_v30  ;;  %v15303_v30 = vsub.f32 %v26492_v49, %v26786_v37  ;;  %v15297_v38 = vand.u32 4294901760, %v15296_v23 }
 0xb99   :  { %20180 = vmatmul.mubr.f32.vlgmr.msra.gmra.mrb[80].mxu1 %v26414_v59 }
 0xb9a   :  { %22091 = vmatpush3.bf16.msra.mxu1 %v22060_v56  ;;  %20190 = vmatprep.mubr.msk.f32.mxu1 %vm22701_vm4, %v26833_v41  ;;  %v15218_v56 = vand.u32 4294901760, %v26290_v29  ;;  %v15304_v53 = vand.u32 4294901760, %v15303_v30 }
 0xb9b   :  { %22092 = vmatprep.subr.bf16.mxu1 %v26834_v3 }
 0xb9c   :  { %v15219_v54 = vsub.f32 %v26290_v29, %v15218_v56  ;;  %v22141_v25 = vpack.c.bf16 %v15304_v53, %v15297_v38 }
 0xb9e   :  { %22094 = vmatpush3.bf16.msra.mxu1 %v22063_v10  ;;  %v15213_v10 = vand.u32 4294901760, %v15212_v24  ;;  %v15220_v47 = vand.u32 4294901760, %v15219_v54  ;;  %v26788_v24 = vand.u32 4294901760, %v26486_v52 }
 0xba0   :  { %v22123_v20 = vpack.c.bf16 %v15220_v47, %v15213_v10  ;;  %v15282_v10 = vsub.f32 %v26484_v62, %v26789_v9  ;;  %v15289_v47 = vsub.f32 %v26486_v52, %v26788_v24 }
 0xba1   :  { %20191 = vmatmul.mubr.f32.vlgmr.msra.gmra.mrb[80].mxu1 %v26414_v59  ;;  %v26488_v59 = vpack.c.bf16 %v15149_v18, %v15146_v42  ;;  %v22132_v42 = vpack.c.bf16 %v15262_v1, %v15255_v57  ;;  %v15268_v18 = vsub.f32 %v26480_v15, %v15267_v19  ;;  %v22144_v57 = vpack.c.bf16 %v26283_v27, %v26281_v63 }
 0xba2   :  { %v15283_v45 = vand.u32 4294901760, %v15282_v10  ;;  %v15290_v58 = vand.u32 4294901760, %v15289_v47  ;;  %v22147_v1 = vpack.c.bf16 %v26290_v29, %v26285_v28  ;;  %v22162_v10 = vpack.c.bf16 %v26486_v52, %v26484_v62 }
 0xba3   :  { %22118 = vmatpush3.bf16.msra.mxu0 %v26488_v59  ;;  %v15269_v51 = vand.u32 4294901760, %v15268_v18  ;;  %v22150_v18 = vpack.c.bf16 %v26295_v48, %v26292_v46  ;;  %v22165_v47 = vpack.c.bf16 %v26492_v49, %v26490_v5  ;;  %v22198_v63 = vpack.c.bf16 %v15232_v50, %v15225_v4 }
 0xba4   :  { %22119 = vmatprep.subr.bf16.mxu0 %v26834_v3  ;;  %v22138_v14 = vpack.c.bf16 %v15290_v58, %v15283_v45  ;;  %v15857_v45 = vld [vmem:[%s26705_s7 + $0x4] ss:$0 sm:$0xff]  ;;  %v22201_v27 = vpack.c.bf16 %v15246_v34, %v15239_v35  ;;  %v22204_v28 = vpack.c.bf16 %v15260_v7, %v15253_v33  ;;  %v22207_v29 = vpack.c.bf16 %v15274_v39, %v15267_v19 }
 0xba5   :  { %v22135_v54 = vpack.c.bf16 %v15276_v8, %v15269_v51  ;;  %v22156_v51 = vpack.c.bf16 %v26308_v36, %v26305_v6  ;;  %v22159_v8 = vpack.c.bf16 %v26482_v0, %v26480_v15  ;;  %v26913_v46 = vand.u32 4294901760, %v26484_v62 }
 0xba6   :  { %v26914_v48 = vand.u32 4294901760, %v26486_v52  ;;  %v26916_v6 = vand.u32 4294901760, %v26492_v49 }
 0xba8   :  { %v22210_v61 = vpack.c.bf16 %v26914_v48, %v26913_v46  ;;  %v22213_v36 = vpack.c.bf16 %v26916_v6, %v26915_v12 }
 0xc74   :  { %v15076_v58 = vpop.f32.mrb[80].mxu1 }
 0xc75   :  { %v22242_v23 = vadd.f32 %v15857_v45, %v15076_v58  ;;  %v20192_v30 = vpop.f32.mrb[81].mxu1 }
 0xc77   :  { %v15081_v38 = vmax.f32 %v22242_v23, 0.0 }
 0xc79   :  { %v26579_v53 = vand.u32 4294901760, %v15081_v38 }
 0xc7b   :  { %v15185_v37 = vsub.f32 %v15081_v38, %v26579_v53 }
 0xc7d   :  { %v15186_v22 = vand.u32 4294901760, %v15185_v37 }
 0xc7f   :  { %v15187_v24 = vsub.f32 %v15185_v37, %v15186_v22 }
 0xc81   :  { %v15188_v9 = vand.u32 4294901760, %v15187_v24 }
 0xc83   :  { %20226 = vmatmul.mubr.f32.vlgmr.msra.gmra.mrb[80].mxu0 %v15188_v9 }
 0xc84   :  { %22121 = vmatpush3.bf16.msra.mxu0 %v26510_v26  ;;  %20260 = vmatprep.mubr.msk.f32.mxu0 %vm22701_vm4, %v26833_v41  ;;  %v22192_v26 = vpack.c.bf16 %v15204_v16, %v15197_v32 }
 0xc85   :  { %22122 = vmatprep.subr.bf16.mxu0 %v26834_v3 }
 0xc88   :  { %22124 = vmatpush3.bf16.msra.mxu0 %v22123_v20  ;;  %v22195_v20 = vpack.c.bf16 %v15218_v56, %v15211_v11 }
 0xc89   :  { %22125 = vmatprep.subr.bf16.mxu0 %v26834_v3 }
 0xc8c   :  { %22127 = vmatpush3.bf16.msra.mxu0 %v22126_v2 }
 0xc8d   :  { %22128 = vmatprep.subr.bf16.mxu0 %v26834_v3 }
 0xc90   :  { %22130 = vmatpush3.bf16.msra.mxu0 %v22129_v17 }
 0xc91   :  { %22131 = vmatprep.subr.bf16.mxu0 %v26834_v3 }
 0xc94   :  { %22133 = vmatpush3.bf16.msra.mxu0 %v22132_v42 }
 0xc95   :  { %22134 = vmatprep.subr.bf16.mxu0 %v26834_v3 }
 0xc98   :  { %22136 = vmatpush3.bf16.msra.mxu0 %v22135_v54 }
 0xc99   :  { %22137 = vmatprep.subr.bf16.mxu0 %v26834_v3 }
 0xc9c   :  { %22139 = vmatpush3.bf16.msra.mxu0 %v22138_v14 }
 0xc9d   :  { %22140 = vmatprep.subr.bf16.mxu0 %v26834_v3 }
 0xca0   :  { %22142 = vmatpush3.bf16.msra.mxu0 %v22141_v25 }
 0xca1   :  { %22143 = vmatprep.subr.bf16.mxu0 %v26834_v3 }
 0xca3   :  { %20261 = vmatmul.mubr.f32.vlgmr.msra.gmra.mrb[80].mxu0 %v26579_v53 }
 0xca4   :  { %22145 = vmatpush3.bf16.msra.mxu0 %v22144_v57  ;;  %20295 = vmatprep.mubr.msk.f32.mxu0 %vm22701_vm4, %v26833_v41 }
 0xca5   :  { %22146 = vmatprep.subr.bf16.mxu0 %v26834_v3 }
 0xca8   :  { %22148 = vmatpush3.bf16.msra.mxu0 %v22147_v1 }
 0xca9   :  { %22149 = vmatprep.subr.bf16.mxu0 %v26834_v3 }
 0xcac   :  { %22151 = vmatpush3.bf16.msra.mxu0 %v22150_v18 }
 0xcad   :  { %22152 = vmatprep.subr.bf16.mxu0 %v26834_v3 }
 0xcb0   :  { %22154 = vmatpush3.bf16.msra.mxu0 %v22153_v40 }
 0xcb1   :  { %22155 = vmatprep.subr.bf16.mxu0 %v26834_v3 }
 0xcb4   :  { %22157 = vmatpush3.bf16.msra.mxu0 %v22156_v51 }
 0xcb5   :  { %22158 = vmatprep.subr.bf16.mxu0 %v26834_v3 }
 0xcb8   :  { %22160 = vmatpush3.bf16.msra.mxu0 %v22159_v8 }
 0xcb9   :  { %22161 = vmatprep.subr.bf16.mxu0 %v26834_v3 }
 0xcbc   :  { %22163 = vmatpush3.bf16.msra.mxu0 %v22162_v10 }
 0xcbd   :  { %22164 = vmatprep.subr.bf16.mxu0 %v26834_v3 }
 0xcc0   :  { %22166 = vmatpush3.bf16.msra.mxu0 %v22165_v47 }
 0xcc1   :  { %22167 = vmatprep.subr.bf16.mxu0 %v26834_v3 }
 0xcc3   :  { %20296 = vmatmul.mubr.f32.vlgmr.msra.gmra.mrb[80].mxu0 %v15185_v37 }
 0xcc4   :  { %22169 = vmatpush3.bf16.msra.mxu0 %v26279_v21  ;;  %20330 = vmatprep.mubr.msk.f32.mxu0 %vm22701_vm4, %v26833_v41 }
 0xcc5   :  { %22170 = vmatprep.subr.bf16.mxu0 %v26834_v3 }
 0xcc8   :  { %22172 = vmatpush3.bf16.msra.mxu0 %v26299_v60 }
 0xcc9   :  { %22173 = vmatprep.subr.bf16.mxu0 %v26834_v3 }
 0xccc   :  { %22175 = vmatpush3.bf16.msra.mxu0 %v26315_v55 }
 0xccd   :  { %22176 = vmatprep.subr.bf16.mxu0 %v26834_v3 }
 0xcd0   :  { %22178 = vmatpush3.bf16.msra.mxu0 %v26331_v43 }
 0xcd1   :  { %22179 = vmatprep.subr.bf16.mxu0 %v26834_v3 }
 0xcd4   :  { %22181 = vmatpush3.bf16.msra.mxu0 %v26351_v13 }
 0xcd5   :  { %22182 = vmatprep.subr.bf16.mxu0 %v26834_v3 }
 0xcd8   :  { %22184 = vmatpush3.bf16.msra.mxu0 %v26458_v44 }
 0xcd9   :  { %22185 = vmatprep.subr.bf16.mxu0 %v26834_v3 }
 0xcdc   :  { %22187 = vmatpush3.bf16.msra.mxu0 %v26468_v31 }
 0xcdd   :  { %22188 = vmatprep.subr.bf16.mxu0 %v26834_v3 }
 0xce0   :  { %22190 = vmatpush3.bf16.msra.mxu0 %v26488_v59 }
 0xce1   :  { %22191 = vmatprep.subr.bf16.mxu0 %v26834_v3 }
 0xce3   :  { %20331 = vmatmul.mubr.f32.vlgmr.msra.gmra.mrb[80].mxu0 %v15186_v22 }
 0xce4   :  { %22193 = vmatpush3.bf16.msra.mxu0 %v22192_v26  ;;  %20365 = vmatprep.mubr.msk.f32.mxu0 %vm22701_vm4, %v26833_v41 }
 0xce5   :  { %22194 = vmatprep.subr.bf16.mxu0 %v26834_v3 }
 0xce8   :  { %22196 = vmatpush3.bf16.msra.mxu0 %v22195_v20 }
 0xce9   :  { %22197 = vmatprep.subr.bf16.mxu0 %v26834_v3 }
 0xcec   :  { %22199 = vmatpush3.bf16.msra.mxu0 %v22198_v63 }
 0xced   :  { %22200 = vmatprep.subr.bf16.mxu0 %v26834_v3 }
 0xcf0   :  { %22202 = vmatpush3.bf16.msra.mxu0 %v22201_v27 }
 0xcf1   :  { %22203 = vmatprep.subr.bf16.mxu0 %v26834_v3 }
 0xcf4   :  { %22205 = vmatpush3.bf16.msra.mxu0 %v22204_v28 }
 0xcf5   :  { %22206 = vmatprep.subr.bf16.mxu0 %v26834_v3 }
 0xcf8   :  { %22208 = vmatpush3.bf16.msra.mxu0 %v22207_v29 }
 0xcf9   :  { %22209 = vmatprep.subr.bf16.mxu0 %v26834_v3 }
 0xcfc   :  { %22211 = vmatpush3.bf16.msra.mxu0 %v22210_v61 }
 0xcfd   :  { %22212 = vmatprep.subr.bf16.mxu0 %v26834_v3 }
 0xd00   :  { %22214 = vmatpush3.bf16.msra.mxu0 %v22213_v36 }
 0xd01   :  { %22215 = vmatprep.subr.bf16.mxu0 %v26834_v3 }
 0xd03   :  { %20366 = vmatmul.mubr.f32.vlgmr.msra.gmra.mrb[80].mxu0 %v26579_v53 }
 0xd04   :  { %22217 = vmatpush3.bf16.msra.mxu0 %v26279_v21  ;;  %20400 = vmatprep.mubr.msk.f32.mxu0 %vm22701_vm4, %v26833_v41  ;;  %v22703_v41 = vmov 0   ;;  %v15878_v21 = vld [vmem:[%s26705_s7 + $0x5] ss:$0 sm:$0xff]  ;;  %s22676_s7 = scalar_lea.vmem %s15772_s13, 32 }
 0xd05   :  { %22218 = vmatprep.subr.bf16.mxu0 %v26834_v3  ;;  %22674 = vset.pattern.permute.xlu1 %v22703_v41  ;;  %p22677_p0 = scmp.ne.s32.totalorder %s15772_s13, %s22676_s7  ;;  %p22682_p2 = scmp.lt.s32.totalorder %s22676_s7, %s22676_s7 }
 0xd06   :  { %22675 = vset.pattern.permute.xlu0 %v22703_v41 }
 0xd07   :  { %p22683_p3 = por %p22682_p2, %p22681_p1 }
 0xd08   :  { %22220 = vmatpush3.bf16.msra.mxu0 %v26299_v60 }
 0xd09   :  { %22221 = vmatprep.subr.bf16.mxu0 %v26834_v3  ;;  %p22684_p4 = pnand %p22683_p3, %p22677_p0 }
 0xd0c   :  { %22223 = vmatpush3.bf16.msra.mxu0 %v26315_v55 }
 0xd0d   :  { %22224 = vmatprep.subr.bf16.mxu0 %v26834_v3 }
 0xd10   :  { %22226 = vmatpush3.bf16.msra.mxu0 %v26331_v43 }
 0xd11   :  { %22227 = vmatprep.subr.bf16.mxu0 %v26834_v3 }
 0xd14   :  { %22229 = vmatpush3.bf16.msra.mxu0 %v26351_v13 }
 0xd15   :  { %22230 = vmatprep.subr.bf16.mxu0 %v26834_v3 }
 0xd18   :  { %22232 = vmatpush3.bf16.msra.mxu0 %v26458_v44 }
 0xd19   :  { %22233 = vmatprep.subr.bf16.mxu0 %v26834_v3 }
 0xd1c   :  { %22235 = vmatpush3.bf16.msra.mxu0 %v26468_v31 }
 0xd1d   :  { %22236 = vmatprep.subr.bf16.mxu0 %v26834_v3 }
 0xd20   :  { %22238 = vmatpush3.bf16.msra.mxu0 %v26488_v59 }
 0xd23   :  { %20401 = vmatmul.mubr.f32.vlgmr.msra.gmra.mrb[80].mxu0 %v26579_v53 }
 0xdf6   :  { %v15740_v60 = vpop.f32.mrb[80].mxu0 }
 0xdf7   :  { %v22243_v55 = vadd.f32 %v15878_v21, %v15740_v60  ;;  %v20402_v43 = vpop.f32.mrb[81].mxu0 }
 0xdf9   :  { %15746 = vperm.xlu1 %22674, %v22243_v55   ;;  %15750 = vrot.lane.b32.xlu0 %v22243_v55, %s22704_s3 }
 0xe6b   :  { %v15751_v13 = vpop.permute.xlu0 %15750 }
 0xe6c   :  { %v15754_v3 = vsel %vm15753_vm10, %v15751_v13, 0.0 }
 0xe6d   :  { %15755 = vadd.xlane.f32.xlu0 %v15754_v3 }
 0xe78   :  { %v15747_v44 = vpop.permute.xlu1 %15746 }
 0xe79   :  { %v15749_v32 = vadd.f32 %v22243_v55, %v15747_v44 }
 0xefa   :  { %v15756_v31 = vpop.xlane.xlu0 %15755 }
 0xefb   :  { %v15758_v16 = vmul.f32 0.125, %v15756_v31 }
 0xefd   :  { %v15759_v15 = vsub.f32 %v15749_v32, %v15758_v16 }
 0xeff   :  { %15761 = vrot.lane.b32.xlu1 %v15759_v15, %s22704_s3 }
 0xf71   :  { %v15762_v0 = vpop.permute.xlu1 %15761 }
 0xf72   :  { %15764 = vst.msk [vmem:[#allocation2] sm:$0x3] %vm15753_vm10, %v15762_v0 }
 0xf73   :  { %22687 = shalt.err (!%p22684_p4)
}
 0xf74   :  { %s22688_s16 = scalar_lea.hbm %s26708_s10, 32 }
 0xf75   :  { %p22689_p5 = scmp.ne.s32.totalorder %s26708_s10, %s22688_s16  ;;  %p22692_p6 = scmp.lt.u32.totalorder %s22688_s16, %s26708_s10 }
 0xf77   :  { %p22694_p7 = pnand %p22692_p6, %p22689_p5 }
 0xf79   :  { %22697 = shalt.err (!%p22694_p7)
}
 0xf7a   :  { %15774 = dma.vmem_to_hbm [thread:$0]  %s15772_s13, 32, %s26708_s10, [#allocation3]  }
 0xf7b   :  { %22698 = dma.done.wait [#allocation3], 32  }
 0xf7c   :  { %22699 = vsyncadd [#allocation3], 4294967264 }
 0xf7d   :  { %15778 = vsyncpa [#allocation3], 1 }

</bundles_post_ra>
